<compile_context>
chip_gen: v7x
topology: tpu7x:2x2x1
jax: 0.10.0
libtpu: 0.0.40
codegen_flags: <defaults>
</compile_context>

<pallas_src>
import math
import functools

import jax
import jax.numpy as jnp
from jax import lax
from jax.experimental import pallas as pl
from jax.experimental.pallas import tpu as pltpu

# ----------------------------- config (small, consistent with the module) -----------------------
B = 2            # training batch_size
MAX_NODES = 8    # nodes per graph
N_TOTAL = B * MAX_NODES   # big-batch node count
T = 8            # timesteps
F_IN = 4         # input_dim
HIDDEN = 32      # hidden_dim
NUM_HEADS = 4
HEAD_DIM = HIDDEN // NUM_HEADS
# TODO(synk): self.lstm and self.fc are declared but never used in forward(); omitted.

# stacking order of the per-node attention weights/biases on axis 0 of w_attn / b_attn
_Q, _K, _V, _QI, _KI, _VI, _O = range(7)


# ----------------------------- the fused kernel --------------------------------------------------
def _temporal_gcn_kernel(x_ref, at_ref, eye_ref, perm_ref, mc_ref, mr_ref, mcol_nt_ref,
                         w1_ref, b1_ref, w2_ref, b2_ref,
                         b_qkv_ref, b_o_ref, hmask_ref,
                         w_qkv_hbm, w_o_hbm,
                         out_ref,
                         w_qkv_vmem, w_o_vmem, dma_sem,
                         *, num_heads):
    f32 = jnp.float32
    tn, hid = out_ref.shape                      # 128, 32
    n_total = b_qkv_ref.shape[0]                 # 16
    t_steps = tn // n_total                      # 8
    hd = hid // num_heads                        # 8

    # ---- kick off the attention-weight DMAs; they overlap with the GCN stage below -------------
    cp_qkv = pltpu.make_async_copy(w_qkv_hbm, w_qkv_vmem, dma_sem.at[0])
    cp_out = pltpu.make_async_copy(w_o_hbm, w_o_vmem, dma_sem.at[1])
    cp_qkv.start()
    cp_out.start()

    # ---------------- GCN stage: one block-diagonal graph over all timesteps --------------------
    # Rows/cols are flattened (t, node).  at_ref already holds the TRANSPOSED block-diagonal
    # adjacency, so both aggregations are plain MXU matmuls (no in-kernel 128x128 transpose).
    mc = mc_ref[...]                                                   # [TN, 1] ego mask (col)
    mr = mr_ref[...]                                                   # [1, TN] ego mask (row)
    at = at_ref[...] * (mc * mr) + eye_ref[...] * mc                   # A_hat^T (masked + loops)
    deg = jnp.sum(at, axis=1, keepdims=True)                           # col sums of A_hat -> [TN,1]
    dinv = jnp.where(deg > 0.0, lax.rsqrt(deg), 0.0)                   # D^-1/2

    # P^T @ y  ==  dinv * (A_hat^T @ (dinv * y))
    x = x_ref[...]                                                     # [TN, F_in]
    y1 = jnp.dot(x, w1_ref[...], preferred_element_type=f32)           # [128, H]
    h1 = jnp.maximum(
        dinv * jnp.dot(at, dinv * y1, preferred_element_type=f32) + b1_ref[...], 0.0)
    y2 = jnp.dot(h1, w2_ref[...], preferred_element_type=f32)
    agg2 = dinv * jnp.dot(at, dinv * y2, preferred_element_type=f32)   # [TN, H] (t, node) order

    # (t, node) -> (node, t) reorder via a precomputed 0/1 permutation matmul (stays on the MXU)
    emb_flat = (jnp.dot(perm_ref[...], agg2, preferred_element_type=f32)
                + b2_ref[...]) * mcol_nt_ref[...]                      # non-ego rows exactly 0
    emb = emb_flat.reshape(n_total, t_steps, hid)                      # [N, T, H]

    # ---------------- per-node temporal attention, batched over all nodes -----------------------
    cp_qkv.wait()
    # fused (query/key/value Linear ∘ MHA in-projection): one batched matmul -> qp | kp | vp
    qkv = jnp.einsum('nth,nhk->ntk', emb, w_qkv_vmem[...],
                     preferred_element_type=f32) + b_qkv_ref[...]      # [N, T, 3H]
    qp = qkv[:, :, 0 * hid:1 * hid]
    kp = qkv[:, :, 1 * hid:2 * hid]
    vp = qkv[:, :, 2 * hid:3 * hid]

    scale = 1.0 / math.sqrt(hd)
    attn = jnp.zeros((n_total, t_steps, hid), f32)
    for hh in range(num_heads):       # heads live in disjoint lanes; masks replace slicing/concat
        m_h = hmask_ref[hh]                                            # [1, H] 0/1 head mask
        s = jnp.einsum('nqd,nkd->nqk', qp * m_h, kp,
                       preferred_element_type=f32) * scale             # [N, T, T]
        s = s - jnp.max(s, axis=-1, keepdims=True)
        e = jnp.exp(s)
        w = e * pl.reciprocal(jnp.sum(e, axis=-1, keepdims=True))      # exact reciprocal
        attn = attn + jnp.einsum('nqk,nkd->nqd', w, vp * m_h,
                                 preferred_element_type=f32)           # only head-hh lanes nonzero

    cp_out.wait()
    out = jnp.einsum('nth,nhk->ntk', attn, w_o_vmem[...],              # MHA out-projection
                     preferred_element_type=f32) + b_o_ref[...]        # [N, T, H]
    out_ref[...] = out.reshape(tn, hid).astype(out_ref.dtype)          # flat [128, 32] store


# ----------------------------- forward wrapper ---------------------------------------------------
def temporal_gcn_forward(params, x, adjacency, ego_mask):
    f32 = jnp.float32
    b, t, mn = ego_mask.shape
    ntot = b * mn
    tn = t * ntot
    hid = params['w1'].shape[1]
    n_heads = NUM_HEADS
    hd = hid // n_heads

    # ---- layout plumbing: reshapes / transposes / constant matrices (no hoisted activations) ---
    mask_tn = jnp.transpose(ego_mask, (1, 0, 2)).reshape(t, ntot).astype(f32)   # (t, node)
    mc = mask_tn.reshape(tn, 1)                       # (t, node) row order, column layout
    mr = mask_tn.reshape(1, tn)                       # (t, node) row order, row layout
    mc_nt = jnp.transpose(mask_tn).reshape(tn, 1)     # (node, t) row order, column layout
    x_flat = x.reshape(tn, -1)

    # transposed block-diagonal adjacency: a_bdT[t*N+i, s*N+j] = adjacency[t, j, i] * (t == s)
    adj_t = jnp.transpose(adjacency, (0, 2, 1))
    eye_t = jnp.eye(t, dtype=f32)
    a_bdT = (adj_t[:, :, None, :] * eye_t[:, None, :, None]).reshape(tn, tn)

    eye = jnp.eye(tn, dtype=f32)
    # permutation: row (n*T + t)  <-  col (t*N + n)
    rows = jnp.arange(tn)
    perm_cols = (rows % t) * ntot + (rows // t)
    perm = jnp.zeros((tn, tn), f32).at[rows, perm_cols].set(1.0)

    # head masks [num_heads, 1, hid]
    lane = jnp.arange(hid)
    hmask = jnp.stack([((lane // hd) == h).astype(f32) for h in range(n_heads)], 0)[:, None, :]

    # ---- fold per-node Q/K/V linears with the MHA in-projections (weight-only fusion) ----------
    wa, ba = params['w_attn'], params['b_attn']

    def fold(w_first, b_first, w_second, b_second):
        w = jnp.einsum('nij,njk->nik', w_first, w_second)
        bias = jnp.einsum('nij,njk->nik', b_first, w_second) + b_second
        return w, bias

    wq_f, bq_f = fold(wa[_Q], ba[_Q], wa[_QI], ba[_QI])
    wk_f, bk_f = fold(wa[_K], ba[_K], wa[_KI], ba[_KI])
    wv_f, bv_f = fold(wa[_V], ba[_V], wa[_VI], ba[_VI])
    w_qkv = jnp.concatenate([wq_f, wk_f, wv_f], axis=-1)     # [N, H, 3H]
    b_qkv = jnp.concatenate([bq_f, bk_f, bv_f], axis=-1)     # [N, 1, 3H]
    w_o, b_o = wa[_O], ba[_O]                                 # [N, H, H], [N, 1, H]

    vmem_spec = pl.BlockSpec(memory_space=pltpu.MemorySpace.VMEM)
    any_spec = pl.BlockSpec(memory_space=pl.ANY)

    kernel = functools.partial(_temporal_gcn_kernel, num_heads=n_heads)
    out = pl.pallas_call(
        kernel,
        out_shape=jax.ShapeDtypeStruct((tn, hid), f32),
        in_specs=[vmem_spec] * 14 + [any_spec, any_spec],
        out_specs=vmem_spec,
        scratch_shapes=[
            pltpu.VMEM((ntot, hid, 3 * hid), f32),            # fused QKV weights
            pltpu.VMEM((ntot, hid, hid), f32),                # out-projection weights
            pltpu.SemaphoreType.DMA((2,)),
        ],
        compiler_params=pltpu.CompilerParams(vmem_limit_bytes=8 * 1024 * 1024),
    )(x_flat, a_bdT, eye, perm, mc, mr, mc_nt,
      params['w1'], params['b1'], params['w2'], params['b2'],
      b_qkv, b_o, hmask,
      w_qkv, w_o)
    return out.reshape(b, mn, t, hid)                         # [B, max_nodes, T, hidden]


# ----------------------------- pure-JAX reference (for validation) -------------------------------
def reference_forward(params, x, adjacency, ego_mask):
    b, t, mn = ego_mask.shape
    ntot = b * mn
    mask = jnp.transpose(ego_mask, (1, 0, 2)).reshape(t, ntot).astype(jnp.float32)
    eye = jnp.eye(ntot, dtype=jnp.float32)
    ph = []
    for tt in range(t):
        m = mask[tt]
        a_hat = adjacency[tt] * m[:, None] * m[None, :] + eye * m[:, None]
        deg = a_hat.sum(axis=0)
        dinv = jnp.where(deg > 0, lax.rsqrt(deg), 0.0)
        pm = dinv[:, None] * a_hat * dinv[None, :]
        h1 = jnp.maximum(pm.T @ (x[tt] @ params['w1']) + params['b1'], 0.0)
        h2 = pm.T @ (h1 @ params['w2']) + params['b2']
        ph.append(h2 * m[:, None])
    emb = jnp.stack(ph, 0).transpose(1, 0, 2)                           # [Ntot, T, H]

    wa, ba = params['w_attn'], params['b_attn']
    outs = []
    for n in range(ntot):
        e = emb[n]
        q = e @ wa[_Q, n] + ba[_Q, n]
        k = e @ wa[_K, n] + ba[_K, n]
        v = e @ wa[_V, n] + ba[_V, n]
        qp = q @ wa[_QI, n] + ba[_QI, n]
        kp = k @ wa[_KI, n] + ba[_KI, n]
        vp = v @ wa[_VI, n] + ba[_VI, n]
        hs = []
        for hh in range(NUM_HEADS):
            sl = slice(hh * HEAD_DIM, (hh + 1) * HEAD_DIM)
            s = (qp[:, sl] @ kp[:, sl].T) / math.sqrt(HEAD_DIM)
            hs.append(jax.nn.softmax(s, axis=-1) @ vp[:, sl])
        outs.append(jnp.concatenate(hs, -1) @ wa[_O, n] + ba[_O, n])
    return jnp.stack(outs, 0).reshape(b, mn, t, HIDDEN)


# ----------------------------- deterministic parameter init --------------------------------------
def init_params(key):
    keys = jax.random.split(key, 6)

    def w(k, shape):
        return jax.random.normal(k, shape, jnp.float32) * 0.1

    return {
        'w1': w(keys[0], (F_IN, HIDDEN)),   'b1': w(keys[1], (1, HIDDEN)),
        'w2': w(keys[2], (HIDDEN, HIDDEN)), 'b2': w(keys[3], (1, HIDDEN)),
        # per-node attention params stacked as [7, N_total, H, H] / [7, N_total, 1, H]
        # order: query, key, value, q_in_proj, k_in_proj, v_in_proj, out_proj
        'w_attn': w(keys[4], (7, N_TOTAL, HIDDEN, HIDDEN)),
        'b_attn': w(keys[5], (7, N_TOTAL, 1, HIDDEN)),
    }


if __name__ == "__main__":
    key = jax.random.PRNGKey(0)
    k_param, k_x, k_a, k_m = jax.random.split(key, 4)

    params = init_params(k_param)

    x = jax.random.normal(k_x, (T, N_TOTAL, F_IN), jnp.float32)
    adjacency = jax.random.bernoulli(k_a, 0.4, (T, N_TOTAL, N_TOTAL)).astype(jnp.float32)
    adjacency = adjacency * (1.0 - jnp.eye(N_TOTAL, dtype=jnp.float32))   # pruned: no self loops
    ego_mask = jax.random.bernoulli(k_m, 0.7, (B, T, MAX_NODES))

    fwd = jax.jit(temporal_gcn_forward)
    out = jax.block_until_ready(fwd(params, x, adjacency, ego_mask))
    assert out.shape == (B, MAX_NODES, T, HIDDEN)

    ref = jax.block_until_ready(reference_forward(params, x, adjacency, ego_mask))
    if not jnp.allclose(out, ref, atol=2e-5, rtol=1e-4):
        err = float(jnp.max(jnp.abs(out - ref)))
        raise AssertionError(f"Pallas output does not match JAX reference (max abs err {err})")

    print("KERNEL_OK")
</pallas_src>

<mosaic_0001>
module attributes {stable_mosaic.version = 11 : i64} {
  func.func @_temporal_gcn_kernel(%arg0: memref<128x4xf32, #tpu.memory_space<vmem>>, %arg1: memref<128x128xf32, #tpu.memory_space<vmem>>, %arg2: memref<128x128xf32, #tpu.memory_space<vmem>>, %arg3: memref<128x128xf32, #tpu.memory_space<vmem>>, %arg4: memref<128x1xf32, #tpu.memory_space<vmem>>, %arg5: memref<1x128xf32, #tpu.memory_space<vmem>>, %arg6: memref<128x1xf32, #tpu.memory_space<vmem>>, %arg7: memref<4x32xf32, #tpu.memory_space<vmem>>, %arg8: memref<1x32xf32, #tpu.memory_space<vmem>>, %arg9: memref<32x32xf32, #tpu.memory_space<vmem>>, %arg10: memref<1x32xf32, #tpu.memory_space<vmem>>, %arg11: memref<16x1x96xf32, #tpu.memory_space<vmem>>, %arg12: memref<16x1x32xf32, #tpu.memory_space<vmem>>, %arg13: memref<4x1x32xf32, #tpu.memory_space<vmem>>, %arg14: memref<16x32x96xf32, #tpu.memory_space<any>>, %arg15: memref<16x32x32xf32, #tpu.memory_space<any>>, %arg16: memref<128x32xf32, #tpu.memory_space<vmem>>, %arg17: memref<16x32x96xf32, #tpu.memory_space<vmem>>, %arg18: memref<16x32x32xf32, #tpu.memory_space<vmem>>, %arg19: memref<2x!tpu.dma_semaphore, #tpu.memory_space<semaphore_mem>>) attributes {dimension_semantics = [], scalar_prefetch = 0 : i64, scratch_operands = 3 : i64, tpu.core_type = #tpu.core_type<tc>} {
    %c0_i32 = arith.constant 0 : i32
    %0 = tpu.memref_slice %arg19[%c0_i32] : memref<2x!tpu.dma_semaphore, #tpu.memory_space<semaphore_mem>> -> memref<1x!tpu.dma_semaphore, #tpu.memory_space<semaphore_mem>>
    %1 = tpu.memref_squeeze %0 : memref<1x!tpu.dma_semaphore, #tpu.memory_space<semaphore_mem>> -> memref<!tpu.dma_semaphore, #tpu.memory_space<semaphore_mem>>
    tpu.enqueue_dma source(%arg14 : memref<16x32x96xf32, #tpu.memory_space<any>>) target(%arg17 : memref<16x32x96xf32, #tpu.memory_space<vmem>>) target_semaphore(%1 : memref<!tpu.dma_semaphore, #tpu.memory_space<semaphore_mem>>)
    %c1_i32 = arith.constant 1 : i32
    %2 = tpu.memref_slice %arg19[%c1_i32] : memref<2x!tpu.dma_semaphore, #tpu.memory_space<semaphore_mem>> -> memref<1x!tpu.dma_semaphore, #tpu.memory_space<semaphore_mem>>
    %3 = tpu.memref_squeeze %2 : memref<1x!tpu.dma_semaphore, #tpu.memory_space<semaphore_mem>> -> memref<!tpu.dma_semaphore, #tpu.memory_space<semaphore_mem>>
    tpu.enqueue_dma source(%arg15 : memref<16x32x32xf32, #tpu.memory_space<any>>) target(%arg18 : memref<16x32x32xf32, #tpu.memory_space<vmem>>) target_semaphore(%3 : memref<!tpu.dma_semaphore, #tpu.memory_space<semaphore_mem>>)
    %c0 = arith.constant 0 : index
    %c0_0 = arith.constant 0 : index
    %4 = vector.load %arg4[%c0, %c0_0] : memref<128x1xf32, #tpu.memory_space<vmem>>, vector<128x1xf32>
    %c0_1 = arith.constant 0 : index
    %c0_2 = arith.constant 0 : index
    %5 = vector.load %arg5[%c0_1, %c0_2] : memref<1x128xf32, #tpu.memory_space<vmem>>, vector<1x128xf32>
    %c0_3 = arith.constant 0 : index
    %c0_4 = arith.constant 0 : index
    %6 = vector.load %arg1[%c0_3, %c0_4] : memref<128x128xf32, #tpu.memory_space<vmem>>, vector<128x128xf32>
    %7 = vector.broadcast %4 : vector<128x1xf32> to vector<128x128xf32>
    %8 = vector.broadcast %5 : vector<1x128xf32> to vector<128x128xf32>
    %9 = arith.mulf %7, %8 : vector<128x128xf32>
    %10 = arith.mulf %6, %9 : vector<128x128xf32>
    %c0_5 = arith.constant 0 : index
    %c0_6 = arith.constant 0 : index
    %11 = vector.load %arg2[%c0_5, %c0_6] : memref<128x128xf32, #tpu.memory_space<vmem>>, vector<128x128xf32>
    %12 = vector.broadcast %4 : vector<128x1xf32> to vector<128x128xf32>
    %13 = arith.mulf %11, %12 : vector<128x128xf32>
    %14 = arith.addf %10, %13 : vector<128x128xf32>
    %cst = arith.constant dense<0.000000e+00> : vector<128xf32>
    %15 = vector.multi_reduction <add>, %14, %cst [1] : vector<128x128xf32> to vector<128xf32>
    %16 = vector.shape_cast %15 : vector<128xf32> to vector<128x1xf32>
    %cst_7 = arith.constant 0.000000e+00 : f32
    %17 = vector.broadcast %cst_7 : f32 to vector<128x1xf32>
    %18 = arith.cmpf ogt, %16, %17 : vector<128x1xf32>
    %19 = math.rsqrt %16 : vector<128x1xf32>
    %cst_8 = arith.constant 0.000000e+00 : f32
    %20 = vector.broadcast %cst_8 : f32 to vector<128x1xf32>
    %21 = arith.select %18, %19, %20 : vector<128x1xi1>, vector<128x1xf32>
    %c0_9 = arith.constant 0 : index
    %c0_10 = arith.constant 0 : index
    %22 = vector.load %arg0[%c0_9, %c0_10] : memref<128x4xf32, #tpu.memory_space<vmem>>, vector<128x4xf32>
    %c0_11 = arith.constant 0 : index
    %c0_12 = arith.constant 0 : index
    %23 = vector.load %arg7[%c0_11, %c0_12] : memref<4x32xf32, #tpu.memory_space<vmem>>, vector<4x32xf32>
    %cst_13 = arith.constant dense<0.000000e+00> : vector<128x32xf32>
    %24 = tpu.matmul %22, %23, %cst_13 {dimension_numbers = #tpu.dot_dimension_numbers<[1], [0], [0], [1], [0, 0, 1, 1], [], []>} : vector<128x4xf32>, vector<4x32xf32>, vector<128x32xf32> -> vector<128x32xf32>
    %25 = vector.broadcast %21 : vector<128x1xf32> to vector<128x32xf32>
    %26 = arith.mulf %25, %24 : vector<128x32xf32>
    %cst_14 = arith.constant dense<0.000000e+00> : vector<128x32xf32>
    %27 = tpu.matmul %14, %26, %cst_14 {dimension_numbers = #tpu.dot_dimension_numbers<[1], [0], [0], [1], [0, 0, 1, 1], [], []>} : vector<128x128xf32>, vector<128x32xf32>, vector<128x32xf32> -> vector<128x32xf32>
    %28 = vector.broadcast %21 : vector<128x1xf32> to vector<128x32xf32>
    %29 = arith.mulf %28, %27 : vector<128x32xf32>
    %c0_15 = arith.constant 0 : index
    %c0_16 = arith.constant 0 : index
    %30 = vector.load %arg8[%c0_15, %c0_16] : memref<1x32xf32, #tpu.memory_space<vmem>>, vector<1x32xf32>
    %31 = vector.broadcast %30 : vector<1x32xf32> to vector<128x32xf32>
    %32 = arith.addf %29, %31 : vector<128x32xf32>
    %cst_17 = arith.constant 0.000000e+00 : f32
    %33 = vector.broadcast %cst_17 : f32 to vector<128x32xf32>
    %34 = arith.maximumf %32, %33 : vector<128x32xf32>
    %c0_18 = arith.constant 0 : index
    %c0_19 = arith.constant 0 : index
    %35 = vector.load %arg9[%c0_18, %c0_19] : memref<32x32xf32, #tpu.memory_space<vmem>>, vector<32x32xf32>
    %cst_20 = arith.constant dense<0.000000e+00> : vector<128x32xf32>
    %36 = tpu.matmul %34, %35, %cst_20 {dimension_numbers = #tpu.dot_dimension_numbers<[1], [0], [0], [1], [0, 0, 1, 1], [], []>} : vector<128x32xf32>, vector<32x32xf32>, vector<128x32xf32> -> vector<128x32xf32>
    %37 = vector.broadcast %21 : vector<128x1xf32> to vector<128x32xf32>
    %38 = arith.mulf %37, %36 : vector<128x32xf32>
    %cst_21 = arith.constant dense<0.000000e+00> : vector<128x32xf32>
    %39 = tpu.matmul %14, %38, %cst_21 {dimension_numbers = #tpu.dot_dimension_numbers<[1], [0], [0], [1], [0, 0, 1, 1], [], []>} : vector<128x128xf32>, vector<128x32xf32>, vector<128x32xf32> -> vector<128x32xf32>
    %40 = vector.broadcast %21 : vector<128x1xf32> to vector<128x32xf32>
    %41 = arith.mulf %40, %39 : vector<128x32xf32>
    %c0_22 = arith.constant 0 : index
    %c0_23 = arith.constant 0 : index
    %42 = vector.load %arg3[%c0_22, %c0_23] : memref<128x128xf32, #tpu.memory_space<vmem>>, vector<128x128xf32>
    %cst_24 = arith.constant dense<0.000000e+00> : vector<128x32xf32>
    %43 = tpu.matmul %42, %41, %cst_24 {dimension_numbers = #tpu.dot_dimension_numbers<[1], [0], [0], [1], [0, 0, 1, 1], [], []>} : vector<128x128xf32>, vector<128x32xf32>, vector<128x32xf32> -> vector<128x32xf32>
    %c0_25 = arith.constant 0 : index
    %c0_26 = arith.constant 0 : index
    %44 = vector.load %arg10[%c0_25, %c0_26] : memref<1x32xf32, #tpu.memory_space<vmem>>, vector<1x32xf32>
    %45 = vector.broadcast %44 : vector<1x32xf32> to vector<128x32xf32>
    %46 = arith.addf %43, %45 : vector<128x32xf32>
    %c0_27 = arith.constant 0 : index
    %c0_28 = arith.constant 0 : index
    %47 = vector.load %arg6[%c0_27, %c0_28] : memref<128x1xf32, #tpu.memory_space<vmem>>, vector<128x1xf32>
    %48 = vector.broadcast %47 : vector<128x1xf32> to vector<128x32xf32>
    %49 = arith.mulf %46, %48 : vector<128x32xf32>
    %50 = vector.shape_cast %49 : vector<128x32xf32> to vector<16x8x32xf32>
    %c0_i32_29 = arith.constant 0 : i32
    %51 = tpu.memref_slice %arg19[%c0_i32_29] : memref<2x!tpu.dma_semaphore, #tpu.memory_space<semaphore_mem>> -> memref<1x!tpu.dma_semaphore, #tpu.memory_space<semaphore_mem>>
    %52 = tpu.memref_squeeze %51 : memref<1x!tpu.dma_semaphore, #tpu.memory_space<semaphore_mem>> -> memref<!tpu.dma_semaphore, #tpu.memory_space<semaphore_mem>>
    tpu.wait_dma2 semaphore(%52 : memref<!tpu.dma_semaphore, #tpu.memory_space<semaphore_mem>>) src(%arg14 : memref<16x32x96xf32, #tpu.memory_space<any>>) dst(%arg17 : memref<16x32x96xf32, #tpu.memory_space<vmem>>)
    %c0_30 = arith.constant 0 : index
    %c0_31 = arith.constant 0 : index
    %c0_32 = arith.constant 0 : index
    %53 = vector.load %arg17[%c0_30, %c0_31, %c0_32] : memref<16x32x96xf32, #tpu.memory_space<vmem>>, vector<16x32x96xf32>
    "tpu.trace_start"() <{level = 10 : i32, message = "nth,nhk->ntk"}> : () -> ()
    %cst_33 = arith.constant dense<0.000000e+00> : vector<16x8x96xf32>
    %54 = tpu.matmul %50, %53, %cst_33 {dimension_numbers = #tpu.dot_dimension_numbers<[2], [1], [1], [2], [0, 0, 0, 1, 1, 2], [0], [0]>} : vector<16x8x32xf32>, vector<16x32x96xf32>, vector<16x8x96xf32> -> vector<16x8x96xf32>
    "tpu.trace_stop"() : () -> ()
    %c0_34 = arith.constant 0 : index
    %c0_35 = arith.constant 0 : index
    %c0_36 = arith.constant 0 : index
    %55 = vector.load %arg11[%c0_34, %c0_35, %c0_36] : memref<16x1x96xf32, #tpu.memory_space<vmem>>, vector<16x1x96xf32>
    %56 = vector.broadcast %55 : vector<16x1x96xf32> to vector<16x8x96xf32>
    %57 = arith.addf %54, %56 : vector<16x8x96xf32>
    %58 = vector.extract_strided_slice %57 {offsets = [0, 0, 0], sizes = [16, 8, 32], strides = [1, 1, 1]} : vector<16x8x96xf32> to vector<16x8x32xf32>
    %59 = vector.extract_strided_slice %57 {offsets = [0, 0, 32], sizes = [16, 8, 32], strides = [1, 1, 1]} : vector<16x8x96xf32> to vector<16x8x32xf32>
    %60 = vector.extract_strided_slice %57 {offsets = [0, 0, 64], sizes = [16, 8, 32], strides = [1, 1, 1]} : vector<16x8x96xf32> to vector<16x8x32xf32>
    %cst_37 = arith.constant 0.000000e+00 : f32
    %61 = vector.broadcast %cst_37 : f32 to vector<16x8x32xf32>
    %c0_38 = arith.constant 0 : index
    %c0_39 = arith.constant 0 : index
    %c0_40 = arith.constant 0 : index
    %62 = vector.load %arg13[%c0_38, %c0_39, %c0_40] : memref<4x1x32xf32, #tpu.memory_space<vmem>>, vector<1x1x32xf32>
    %63 = vector.shape_cast %62 : vector<1x1x32xf32> to vector<1x32xf32>
    %64 = vector.shape_cast %63 : vector<1x32xf32> to vector<1x1x32xf32>
    %65 = vector.broadcast %64 : vector<1x1x32xf32> to vector<16x8x32xf32>
    %66 = arith.mulf %58, %65 : vector<16x8x32xf32>
    "tpu.trace_start"() <{level = 10 : i32, message = "nqd,nkd->nqk"}> : () -> ()
    %cst_41 = arith.constant dense<0.000000e+00> : vector<16x8x8xf32>
    %67 = tpu.matmul %66, %59, %cst_41 {dimension_numbers = #tpu.dot_dimension_numbers<[2], [2], [1], [1], [0, 0, 0, 1, 1, 1], [0], [0]>} : vector<16x8x32xf32>, vector<16x8x32xf32>, vector<16x8x8xf32> -> vector<16x8x8xf32>
    "tpu.trace_stop"() : () -> ()
    %cst_42 = arith.constant 0.353553385 : f32
    %68 = vector.broadcast %cst_42 : f32 to vector<16x8x8xf32>
    %69 = arith.mulf %67, %68 : vector<16x8x8xf32>
    %cst_43 = arith.constant dense<0xFF800000> : vector<16x8xf32>
    %70 = vector.multi_reduction <maximumf>, %69, %cst_43 [2] : vector<16x8x8xf32> to vector<16x8xf32>
    %71 = vector.shape_cast %70 : vector<16x8xf32> to vector<16x8x1xf32>
    %72 = vector.broadcast %71 : vector<16x8x1xf32> to vector<16x8x8xf32>
    %73 = arith.subf %69, %72 : vector<16x8x8xf32>
    %74 = math.exp %73 : vector<16x8x8xf32>
    %cst_44 = arith.constant dense<0.000000e+00> : vector<16x8xf32>
    %75 = vector.multi_reduction <add>, %74, %cst_44 [2] : vector<16x8x8xf32> to vector<16x8xf32>
    %76 = vector.shape_cast %75 : vector<16x8xf32> to vector<16x8x1xf32>
    %77 = tpu.reciprocal %76 : vector<16x8x1xf32> -> vector<16x8x1xf32>
    %78 = vector.broadcast %77 : vector<16x8x1xf32> to vector<16x8x8xf32>
    %79 = arith.mulf %74, %78 : vector<16x8x8xf32>
    %80 = vector.shape_cast %63 : vector<1x32xf32> to vector<1x1x32xf32>
    %81 = vector.broadcast %80 : vector<1x1x32xf32> to vector<16x8x32xf32>
    %82 = arith.mulf %60, %81 : vector<16x8x32xf32>
    "tpu.trace_start"() <{level = 10 : i32, message = "nqk,nkd->nqd"}> : () -> ()
    %cst_45 = arith.constant dense<0.000000e+00> : vector<16x8x32xf32>
    %83 = tpu.matmul %79, %82, %cst_45 {dimension_numbers = #tpu.dot_dimension_numbers<[2], [1], [1], [2], [0, 0, 0, 1, 1, 2], [0], [0]>} : vector<16x8x8xf32>, vector<16x8x32xf32>, vector<16x8x32xf32> -> vector<16x8x32xf32>
    "tpu.trace_stop"() : () -> ()
    %84 = arith.addf %61, %83 : vector<16x8x32xf32>
    %c1 = arith.constant 1 : index
    %c0_46 = arith.constant 0 : index
    %c0_47 = arith.constant 0 : index
    %85 = vector.load %arg13[%c1, %c0_46, %c0_47] : memref<4x1x32xf32, #tpu.memory_space<vmem>>, vector<1x1x32xf32>
    %86 = vector.shape_cast %85 : vector<1x1x32xf32> to vector<1x32xf32>
    %87 = vector.shape_cast %86 : vector<1x32xf32> to vector<1x1x32xf32>
    %88 = vector.broadcast %87 : vector<1x1x32xf32> to vector<16x8x32xf32>
    %89 = arith.mulf %58, %88 : vector<16x8x32xf32>
    "tpu.trace_start"() <{level = 10 : i32, message = "nqd,nkd->nqk"}> : () -> ()
    %cst_48 = arith.constant dense<0.000000e+00> : vector<16x8x8xf32>
    %90 = tpu.matmul %89, %59, %cst_48 {dimension_numbers = #tpu.dot_dimension_numbers<[2], [2], [1], [1], [0, 0, 0, 1, 1, 1], [0], [0]>} : vector<16x8x32xf32>, vector<16x8x32xf32>, vector<16x8x8xf32> -> vector<16x8x8xf32>
    "tpu.trace_stop"() : () -> ()
    %cst_49 = arith.constant 0.353553385 : f32
    %91 = vector.broadcast %cst_49 : f32 to vector<16x8x8xf32>
    %92 = arith.mulf %90, %91 : vector<16x8x8xf32>
    %cst_50 = arith.constant dense<0xFF800000> : vector<16x8xf32>
    %93 = vector.multi_reduction <maximumf>, %92, %cst_50 [2] : vector<16x8x8xf32> to vector<16x8xf32>
    %94 = vector.shape_cast %93 : vector<16x8xf32> to vector<16x8x1xf32>
    %95 = vector.broadcast %94 : vector<16x8x1xf32> to vector<16x8x8xf32>
    %96 = arith.subf %92, %95 : vector<16x8x8xf32>
    %97 = math.exp %96 : vector<16x8x8xf32>
    %cst_51 = arith.constant dense<0.000000e+00> : vector<16x8xf32>
    %98 = vector.multi_reduction <add>, %97, %cst_51 [2] : vector<16x8x8xf32> to vector<16x8xf32>
    %99 = vector.shape_cast %98 : vector<16x8xf32> to vector<16x8x1xf32>
    %100 = tpu.reciprocal %99 : vector<16x8x1xf32> -> vector<16x8x1xf32>
    %101 = vector.broadcast %100 : vector<16x8x1xf32> to vector<16x8x8xf32>
    %102 = arith.mulf %97, %101 : vector<16x8x8xf32>
    %103 = vector.shape_cast %86 : vector<1x32xf32> to vector<1x1x32xf32>
    %104 = vector.broadcast %103 : vector<1x1x32xf32> to vector<16x8x32xf32>
    %105 = arith.mulf %60, %104 : vector<16x8x32xf32>
    "tpu.trace_start"() <{level = 10 : i32, message = "nqk,nkd->nqd"}> : () -> ()
    %cst_52 = arith.constant dense<0.000000e+00> : vector<16x8x32xf32>
    %106 = tpu.matmul %102, %105, %cst_52 {dimension_numbers = #tpu.dot_dimension_numbers<[2], [1], [1], [2], [0, 0, 0, 1, 1, 2], [0], [0]>} : vector<16x8x8xf32>, vector<16x8x32xf32>, vector<16x8x32xf32> -> vector<16x8x32xf32>
    "tpu.trace_stop"() : () -> ()
    %107 = arith.addf %84, %106 : vector<16x8x32xf32>
    %c2 = arith.constant 2 : index
    %c0_53 = arith.constant 0 : index
    %c0_54 = arith.constant 0 : index
    %108 = vector.load %arg13[%c2, %c0_53, %c0_54] : memref<4x1x32xf32, #tpu.memory_space<vmem>>, vector<1x1x32xf32>
    %109 = vector.shape_cast %108 : vector<1x1x32xf32> to vector<1x32xf32>
    %110 = vector.shape_cast %109 : vector<1x32xf32> to vector<1x1x32xf32>
    %111 = vector.broadcast %110 : vector<1x1x32xf32> to vector<16x8x32xf32>
    %112 = arith.mulf %58, %111 : vector<16x8x32xf32>
    "tpu.trace_start"() <{level = 10 : i32, message = "nqd,nkd->nqk"}> : () -> ()
    %cst_55 = arith.constant dense<0.000000e+00> : vector<16x8x8xf32>
    %113 = tpu.matmul %112, %59, %cst_55 {dimension_numbers = #tpu.dot_dimension_numbers<[2], [2], [1], [1], [0, 0, 0, 1, 1, 1], [0], [0]>} : vector<16x8x32xf32>, vector<16x8x32xf32>, vector<16x8x8xf32> -> vector<16x8x8xf32>
    "tpu.trace_stop"() : () -> ()
    %cst_56 = arith.constant 0.353553385 : f32
    %114 = vector.broadcast %cst_56 : f32 to vector<16x8x8xf32>
    %115 = arith.mulf %113, %114 : vector<16x8x8xf32>
    %cst_57 = arith.constant dense<0xFF800000> : vector<16x8xf32>
    %116 = vector.multi_reduction <maximumf>, %115, %cst_57 [2] : vector<16x8x8xf32> to vector<16x8xf32>
    %117 = vector.shape_cast %116 : vector<16x8xf32> to vector<16x8x1xf32>
    %118 = vector.broadcast %117 : vector<16x8x1xf32> to vector<16x8x8xf32>
    %119 = arith.subf %115, %118 : vector<16x8x8xf32>
    %120 = math.exp %119 : vector<16x8x8xf32>
    %cst_58 = arith.constant dense<0.000000e+00> : vector<16x8xf32>
    %121 = vector.multi_reduction <add>, %120, %cst_58 [2] : vector<16x8x8xf32> to vector<16x8xf32>
    %122 = vector.shape_cast %121 : vector<16x8xf32> to vector<16x8x1xf32>
    %123 = tpu.reciprocal %122 : vector<16x8x1xf32> -> vector<16x8x1xf32>
    %124 = vector.broadcast %123 : vector<16x8x1xf32> to vector<16x8x8xf32>
    %125 = arith.mulf %120, %124 : vector<16x8x8xf32>
    %126 = vector.shape_cast %109 : vector<1x32xf32> to vector<1x1x32xf32>
    %127 = vector.broadcast %126 : vector<1x1x32xf32> to vector<16x8x32xf32>
    %128 = arith.mulf %60, %127 : vector<16x8x32xf32>
    "tpu.trace_start"() <{level = 10 : i32, message = "nqk,nkd->nqd"}> : () -> ()
    %cst_59 = arith.constant dense<0.000000e+00> : vector<16x8x32xf32>
    %129 = tpu.matmul %125, %128, %cst_59 {dimension_numbers = #tpu.dot_dimension_numbers<[2], [1], [1], [2], [0, 0, 0, 1, 1, 2], [0], [0]>} : vector<16x8x8xf32>, vector<16x8x32xf32>, vector<16x8x32xf32> -> vector<16x8x32xf32>
    "tpu.trace_stop"() : () -> ()
    %130 = arith.addf %107, %129 : vector<16x8x32xf32>
    %c3 = arith.constant 3 : index
    %c0_60 = arith.constant 0 : index
    %c0_61 = arith.constant 0 : index
    %131 = vector.load %arg13[%c3, %c0_60, %c0_61] : memref<4x1x32xf32, #tpu.memory_space<vmem>>, vector<1x1x32xf32>
    %132 = vector.shape_cast %131 : vector<1x1x32xf32> to vector<1x32xf32>
    %133 = vector.shape_cast %132 : vector<1x32xf32> to vector<1x1x32xf32>
    %134 = vector.broadcast %133 : vector<1x1x32xf32> to vector<16x8x32xf32>
    %135 = arith.mulf %58, %134 : vector<16x8x32xf32>
    "tpu.trace_start"() <{level = 10 : i32, message = "nqd,nkd->nqk"}> : () -> ()
    %cst_62 = arith.constant dense<0.000000e+00> : vector<16x8x8xf32>
    %136 = tpu.matmul %135, %59, %cst_62 {dimension_numbers = #tpu.dot_dimension_numbers<[2], [2], [1], [1], [0, 0, 0, 1, 1, 1], [0], [0]>} : vector<16x8x32xf32>, vector<16x8x32xf32>, vector<16x8x8xf32> -> vector<16x8x8xf32>
    "tpu.trace_stop"() : () -> ()
    %cst_63 = arith.constant 0.353553385 : f32
    %137 = vector.broadcast %cst_63 : f32 to vector<16x8x8xf32>
    %138 = arith.mulf %136, %137 : vector<16x8x8xf32>
    %cst_64 = arith.constant dense<0xFF800000> : vector<16x8xf32>
    %139 = vector.multi_reduction <maximumf>, %138, %cst_64 [2] : vector<16x8x8xf32> to vector<16x8xf32>
    %140 = vector.shape_cast %139 : vector<16x8xf32> to vector<16x8x1xf32>
    %141 = vector.broadcast %140 : vector<16x8x1xf32> to vector<16x8x8xf32>
    %142 = arith.subf %138, %141 : vector<16x8x8xf32>
    %143 = math.exp %142 : vector<16x8x8xf32>
    %cst_65 = arith.constant dense<0.000000e+00> : vector<16x8xf32>
    %144 = vector.multi_reduction <add>, %143, %cst_65 [2] : vector<16x8x8xf32> to vector<16x8xf32>
    %145 = vector.shape_cast %144 : vector<16x8xf32> to vector<16x8x1xf32>
    %146 = tpu.reciprocal %145 : vector<16x8x1xf32> -> vector<16x8x1xf32>
    %147 = vector.broadcast %146 : vector<16x8x1xf32> to vector<16x8x8xf32>
    %148 = arith.mulf %143, %147 : vector<16x8x8xf32>
    %149 = vector.shape_cast %132 : vector<1x32xf32> to vector<1x1x32xf32>
    %150 = vector.broadcast %149 : vector<1x1x32xf32> to vector<16x8x32xf32>
    %151 = arith.mulf %60, %150 : vector<16x8x32xf32>
    "tpu.trace_start"() <{level = 10 : i32, message = "nqk,nkd->nqd"}> : () -> ()
    %cst_66 = arith.constant dense<0.000000e+00> : vector<16x8x32xf32>
    %152 = tpu.matmul %148, %151, %cst_66 {dimension_numbers = #tpu.dot_dimension_numbers<[2], [1], [1], [2], [0, 0, 0, 1, 1, 2], [0], [0]>} : vector<16x8x8xf32>, vector<16x8x32xf32>, vector<16x8x32xf32> -> vector<16x8x32xf32>
    "tpu.trace_stop"() : () -> ()
    %153 = arith.addf %130, %152 : vector<16x8x32xf32>
    %c1_i32_67 = arith.constant 1 : i32
    %154 = tpu.memref_slice %arg19[%c1_i32_67] : memref<2x!tpu.dma_semaphore, #tpu.memory_space<semaphore_mem>> -> memref<1x!tpu.dma_semaphore, #tpu.memory_space<semaphore_mem>>
    %155 = tpu.memref_squeeze %154 : memref<1x!tpu.dma_semaphore, #tpu.memory_space<semaphore_mem>> -> memref<!tpu.dma_semaphore, #tpu.memory_space<semaphore_mem>>
    tpu.wait_dma2 semaphore(%155 : memref<!tpu.dma_semaphore, #tpu.memory_space<semaphore_mem>>) src(%arg15 : memref<16x32x32xf32, #tpu.memory_space<any>>) dst(%arg18 : memref<16x32x32xf32, #tpu.memory_space<vmem>>)
    %c0_68 = arith.constant 0 : index
    %c0_69 = arith.constant 0 : index
    %c0_70 = arith.constant 0 : index
    %156 = vector.load %arg18[%c0_68, %c0_69, %c0_70] : memref<16x32x32xf32, #tpu.memory_space<vmem>>, vector<16x32x32xf32>
    "tpu.trace_start"() <{level = 10 : i32, message = "nth,nhk->ntk"}> : () -> ()
    %cst_71 = arith.constant dense<0.000000e+00> : vector<16x8x32xf32>
    %157 = tpu.matmul %153, %156, %cst_71 {dimension_numbers = #tpu.dot_dimension_numbers<[2], [1], [1], [2], [0, 0, 0, 1, 1, 2], [0], [0]>} : vector<16x8x32xf32>, vector<16x32x32xf32>, vector<16x8x32xf32> -> vector<16x8x32xf32>
    "tpu.trace_stop"() : () -> ()
    %c0_72 = arith.constant 0 : index
    %c0_73 = arith.constant 0 : index
    %c0_74 = arith.constant 0 : index
    %158 = vector.load %arg12[%c0_72, %c0_73, %c0_74] : memref<16x1x32xf32, #tpu.memory_space<vmem>>, vector<16x1x32xf32>
    %159 = vector.broadcast %158 : vector<16x1x32xf32> to vector<16x8x32xf32>
    %160 = arith.addf %157, %159 : vector<16x8x32xf32>
    %161 = vector.shape_cast %160 : vector<16x8x32xf32> to vector<128x32xf32>
    %c0_75 = arith.constant 0 : index
    %c0_76 = arith.constant 0 : index
    %162 = vector.load %arg16[%c0_75, %c0_76] : memref<128x32xf32, #tpu.memory_space<vmem>>, vector<128x32xf32>
    tpu.vector_store %arg16[%c0_75, %c0_76], %161 {strides = array<i32>} : memref<128x32xf32, #tpu.memory_space<vmem>>, vector<128x32xf32>,
    return
  }
}

</mosaic_0001>

<bundles_post_ra>
// kernel: temporal_gcn_forward.1
= control target key start
LH: loop header
LB: loop body
LE: loop exit
PB: predicated region body
PF: predicated region fallthrough
CT: control target
= control target key end

     0   :  { %s21689_s0 = inlined_call_operand.vmem [shape: f32[128,4], index: 0, kind: input, shape index: {}]   ;;  %s21690_s1 = inlined_call_operand.vmem [shape: f32[128,128], index: 1, kind: input, shape index: {}]   ;;  %s21691_s2 = inlined_call_operand.vmem [shape: f32[128,128], index: 2, kind: input, shape index: {}]   ;;  %s21692_s3 = inlined_call_operand.vmem [shape: f32[128,128], index: 3, kind: input, shape index: {}]   ;;  %s21693_s4 = inlined_call_operand.vmem [shape: f32[128,1], index: 4, kind: input, shape index: {}]   ;;  %s21694_s5 = inlined_call_operand.vmem [shape: f32[1,128], index: 5, kind: input, shape index: {}]   ;;  %s21695_s6 = inlined_call_operand.vmem [shape: f32[128,1], index: 6, kind: input, shape index: {}]   ;;  %s21696_s7 = inlined_call_operand.vmem [shape: f32[4,32], index: 7, kind: input, shape index: {}]   ;;  %s21697_s8 = inlined_call_operand.vmem [shape: f32[1,32], index: 8, kind: input, shape index: {}]   ;;  %s21698_s9 = inlined_call_operand.vmem [shape: f32[32,32], index: 9, kind: input, shape index: {}]   ;;  %s21699_s10 = inlined_call_operand.vmem [shape: f32[1,32], index: 10, kind: input, shape index: {}]   ;;  %s21700_s11 = inlined_call_operand.vmem [shape: f32[16,1,96], index: 11, kind: input, shape index: {}]   ;;  %s21701_s12 = inlined_call_operand.vmem [shape: f32[16,1,32], index: 12, kind: input, shape index: {}]   ;;  %s21702_s13 = inlined_call_operand.vmem [shape: f32[4,1,32], index: 13, kind: input, shape index: {}]   ;;  %s21703_s14 = inlined_call_operand.vmem [shape: f32[16,32,96], index: 14, kind: input, shape index: {}]   ;;  %s21704_s15 = inlined_call_operand.vmem [shape: f32[16,32,32], index: 15, kind: input, shape index: {}]   ;;  %s21705_s16 = inlined_call_operand.hbm [shape: f32[128,32], index: 16, kind: output, shape index: {}]  }
   0x1   :  { %21767 = sst [smem:[#allocation129_spill]] %s21689_s0 }
   0x2   :  { %21 = vsyncpa [#allocation6], 0  ;;  %v18043_v0 = vld [vmem:[%s21703_s14] sm:$0xff]  ;;  %v18048_v1 = vld [vmem:[%s21703_s14 + $0x8] sm:$0xff] }
   0x3   :  { %v18053_v2 = vld [vmem:[%s21703_s14 + $0x10] sm:$0xff]  ;;  %v18058_v3 = vld [vmem:[%s21703_s14 + $0x18] sm:$0xff]  ;;  %v18063_v4 = vld [vmem:[%s21703_s14 + $0x20] sm:$0xff] }
   0x4   :  { %v18068_v5 = vld [vmem:[%s21703_s14 + $0x28] sm:$0xff]  ;;  %v18073_v6 = vld [vmem:[%s21703_s14 + $0x30] sm:$0xff]  ;;  %v18078_v7 = vld [vmem:[%s21703_s14 + $0x38] sm:$0xff] }
   0x5   :  { %v18083_v8 = vld [vmem:[%s21703_s14 + $0x40] sm:$0xff]  ;;  %v18088_v9 = vld [vmem:[%s21703_s14 + $0x48] sm:$0xff]  ;;  %v18093_v10 = vld [vmem:[%s21703_s14 + $0x50] sm:$0xff] }
   0x6   :  { %21768 = vst [vmem:[#allocation12_spill] sm:$0xff] %v18093_v10  ;;  %v18098_v11 = vld [vmem:[%s21703_s14 + $0x58] sm:$0xff]  ;;  %v18103_v12 = vld [vmem:[%s21703_s14 + $0x60] sm:$0xff]  ;;  %v18108_v13 = vld [vmem:[%s21703_s14 + $0x68] sm:$0xff] }
   0x7   :  { %21769 = vst [vmem:[#allocation13_spill] sm:$0xff] %v18098_v11  ;;  %21770 = vst [vmem:[#allocation14_spill] sm:$0xff] %v18108_v13  ;;  %v18113_v14 = vld [vmem:[%s21703_s14 + $0x70] sm:$0xff]  ;;  %v18118_v15 = vld [vmem:[%s21703_s14 + $0x78] sm:$0xff] }
   0x8   :  { %21771 = vst [vmem:[#allocation15_spill] sm:$0xff] %v18113_v14  ;;  %21772 = vst [vmem:[#allocation16_spill] sm:$0xff] %v18118_v15  ;;  %v18123_v16 = vld [vmem:[%s21703_s14 + $0x80] sm:$0xff]  ;;  %v18128_v17 = vld [vmem:[%s21703_s14 + $0x88] sm:$0xff] }
   0x9   :  { %21773 = vst [vmem:[#allocation17_spill] sm:$0xff] %v18123_v16  ;;  %21774 = vst [vmem:[#allocation18_spill] sm:$0xff] %v18128_v17  ;;  %v18133_v18 = vld [vmem:[%s21703_s14 + $0x90] sm:$0xff]  ;;  %v18138_v19 = vld [vmem:[%s21703_s14 + $0x98] sm:$0xff] }
   0xa   :  { %21775 = vst [vmem:[#allocation19_spill] sm:$0xff] %v18133_v18  ;;  %21776 = vst [vmem:[#allocation20_spill] sm:$0xff] %v18138_v19  ;;  %v18143_v20 = vld [vmem:[%s21703_s14 + $0xa0] sm:$0xff]  ;;  %v18148_v21 = vld [vmem:[%s21703_s14 + $0xa8] sm:$0xff] }
   0xb   :  { %21777 = vst [vmem:[#allocation21_spill] sm:$0xff] %v18143_v20  ;;  %21778 = vst [vmem:[#allocation22_spill] sm:$0xff] %v18148_v21  ;;  %v18153_v22 = vld [vmem:[%s21703_s14 + $0xb0] sm:$0xff]  ;;  %v18158_v23 = vld [vmem:[%s21703_s14 + $0xb8] sm:$0xff] }
   0xc   :  { %21779 = vst [vmem:[#allocation23_spill] sm:$0xff] %v18153_v22  ;;  %21780 = vst [vmem:[#allocation24_spill] sm:$0xff] %v18158_v23  ;;  %v18163_v24 = vld [vmem:[%s21703_s14 + $0xc0] sm:$0xff]  ;;  %v18168_v25 = vld [vmem:[%s21703_s14 + $0xc8] sm:$0xff] }
   0xd   :  { %21781 = vst [vmem:[#allocation25_spill] sm:$0xff] %v18163_v24  ;;  %21782 = vst [vmem:[#allocation26_spill] sm:$0xff] %v18168_v25  ;;  %v18173_v26 = vld [vmem:[%s21703_s14 + $0xd0] sm:$0xff]  ;;  %v18178_v27 = vld [vmem:[%s21703_s14 + $0xd8] sm:$0xff] }
   0xe   :  { %21783 = vst [vmem:[#allocation27_spill] sm:$0xff] %v18173_v26  ;;  %21784 = vst [vmem:[#allocation28_spill] sm:$0xff] %v18178_v27  ;;  %v18183_v28 = vld [vmem:[%s21703_s14 + $0xe0] sm:$0xff]  ;;  %v18188_v29 = vld [vmem:[%s21703_s14 + $0xe8] sm:$0xff] }
   0xf   :  { %21785 = vst [vmem:[#allocation29_spill] sm:$0xff] %v18183_v28  ;;  %21786 = vst [vmem:[#allocation30_spill] sm:$0xff] %v18188_v29  ;;  %v18193_v30 = vld [vmem:[%s21703_s14 + $0xf0] sm:$0xff]  ;;  %v18198_v31 = vld [vmem:[%s21703_s14 + $0xf8] sm:$0xff] }
  0x10   :  { %21787 = vst [vmem:[#allocation31_spill] sm:$0xff] %v18193_v30  ;;  %21788 = vst [vmem:[#allocation32_spill] sm:$0xff] %v18198_v31  ;;  %v18203_v32 = vld [vmem:[%s21703_s14 + $0x100] sm:$0xff]  ;;  %v18208_v33 = vld [vmem:[%s21703_s14 + $0x108] sm:$0xff] }
  0x11   :  { %21789 = vst [vmem:[#allocation33_spill] sm:$0xff] %v18203_v32  ;;  %21790 = vst [vmem:[#allocation34_spill] sm:$0xff] %v18208_v33  ;;  %v18213_v34 = vld [vmem:[%s21703_s14 + $0x110] sm:$0xff]  ;;  %v18218_v35 = vld [vmem:[%s21703_s14 + $0x118] sm:$0xff] }
  0x12   :  { %21791 = vst [vmem:[#allocation35_spill] sm:$0xff] %v18213_v34  ;;  %21792 = vst [vmem:[#allocation36_spill] sm:$0xff] %v18218_v35  ;;  %v18223_v36 = vld [vmem:[%s21703_s14 + $0x120] sm:$0xff]  ;;  %v18228_v37 = vld [vmem:[%s21703_s14 + $0x128] sm:$0xff] }
  0x13   :  { %21793 = vst [vmem:[#allocation37_spill] sm:$0xff] %v18223_v36  ;;  %21794 = vst [vmem:[#allocation38_spill] sm:$0xff] %v18228_v37  ;;  %v18233_v38 = vld [vmem:[%s21703_s14 + $0x130] sm:$0xff]  ;;  %v18238_v39 = vld [vmem:[%s21703_s14 + $0x138] sm:$0xff] }
  0x14   :  { %21795 = vst [vmem:[#allocation39_spill] sm:$0xff] %v18233_v38  ;;  %21796 = vst [vmem:[#allocation40_spill] sm:$0xff] %v18238_v39  ;;  %v18243_v40 = vld [vmem:[%s21703_s14 + $0x140] sm:$0xff]  ;;  %v18248_v41 = vld [vmem:[%s21703_s14 + $0x148] sm:$0xff] }
  0x15   :  { %21797 = vst [vmem:[#allocation41_spill] sm:$0xff] %v18243_v40  ;;  %21798 = vst [vmem:[#allocation42_spill] sm:$0xff] %v18248_v41  ;;  %v18253_v42 = vld [vmem:[%s21703_s14 + $0x150] sm:$0xff]  ;;  %v18258_v43 = vld [vmem:[%s21703_s14 + $0x158] sm:$0xff] }
  0x16   :  { %21799 = vst [vmem:[#allocation43_spill] sm:$0xff] %v18253_v42  ;;  %21800 = vst [vmem:[#allocation44_spill] sm:$0xff] %v18258_v43  ;;  %v18263_v44 = vld [vmem:[%s21703_s14 + $0x160] sm:$0xff]  ;;  %v18268_v45 = vld [vmem:[%s21703_s14 + $0x168] sm:$0xff] }
  0x17   :  { %21801 = vst [vmem:[#allocation45_spill] sm:$0xff] %v18263_v44  ;;  %21802 = vst [vmem:[#allocation46_spill] sm:$0xff] %v18268_v45  ;;  %v18273_v46 = vld [vmem:[%s21703_s14 + $0x170] sm:$0xff]  ;;  %v18278_v47 = vld [vmem:[%s21703_s14 + $0x178] sm:$0xff] }
  0x18   :  { %21803 = vst [vmem:[#allocation47_spill] sm:$0xff] %v18273_v46  ;;  %21804 = vst [vmem:[#allocation48_spill] sm:$0xff] %v18278_v47  ;;  %v18283_v48 = vld [vmem:[%s21703_s14 + $0x180] sm:$0xff]  ;;  %v18288_v49 = vld [vmem:[%s21703_s14 + $0x188] sm:$0xff] }
  0x19   :  { %21805 = vst [vmem:[#allocation49_spill] sm:$0xff] %v18283_v48  ;;  %21806 = vst [vmem:[#allocation50_spill] sm:$0xff] %v18288_v49  ;;  %v18293_v50 = vld [vmem:[%s21703_s14 + $0x190] sm:$0xff]  ;;  %v18298_v51 = vld [vmem:[%s21703_s14 + $0x198] sm:$0xff] }
  0x1a   :  { %21807 = vst [vmem:[#allocation51_spill] sm:$0xff] %v18293_v50  ;;  %21808 = vst [vmem:[#allocation52_spill] sm:$0xff] %v18298_v51  ;;  %v18303_v52 = vld [vmem:[%s21703_s14 + $0x1a0] sm:$0xff]  ;;  %v18308_v53 = vld [vmem:[%s21703_s14 + $0x1a8] sm:$0xff] }
  0x1b   :  { %21809 = vst [vmem:[#allocation53_spill] sm:$0xff] %v18303_v52  ;;  %21810 = vst [vmem:[#allocation54_spill] sm:$0xff] %v18308_v53  ;;  %v18313_v54 = vld [vmem:[%s21703_s14 + $0x1b0] sm:$0xff]  ;;  %v18318_v55 = vld [vmem:[%s21703_s14 + $0x1b8] sm:$0xff] }
  0x1c   :  { %21811 = vst [vmem:[#allocation55_spill] sm:$0xff] %v18313_v54  ;;  %21812 = vst [vmem:[#allocation56_spill] sm:$0xff] %v18318_v55  ;;  %v18323_v56 = vld [vmem:[%s21703_s14 + $0x1c0] sm:$0xff]  ;;  %v18328_v57 = vld [vmem:[%s21703_s14 + $0x1c8] sm:$0xff] }
  0x1d   :  { %21813 = vst [vmem:[#allocation57_spill] sm:$0xff] %v18323_v56  ;;  %21814 = vst [vmem:[#allocation58_spill] sm:$0xff] %v18328_v57  ;;  %v18333_v58 = vld [vmem:[%s21703_s14 + $0x1d0] sm:$0xff]  ;;  %v18338_v59 = vld [vmem:[%s21703_s14 + $0x1d8] sm:$0xff] }
  0x1e   :  { %21815 = vst [vmem:[#allocation59_spill] sm:$0xff] %v18333_v58  ;;  %21816 = vst [vmem:[#allocation60_spill] sm:$0xff] %v18338_v59  ;;  %v18343_v60 = vld [vmem:[%s21703_s14 + $0x1e0] sm:$0xff]  ;;  %v18348_v61 = vld [vmem:[%s21703_s14 + $0x1e8] sm:$0xff] }
  0x1f   :  { %21817 = vst [vmem:[#allocation61_spill] sm:$0xff] %v18343_v60  ;;  %21818 = vst [vmem:[#allocation62_spill] sm:$0xff] %v18348_v61  ;;  %v18353_v62 = vld [vmem:[%s21703_s14 + $0x1f0] sm:$0xff]  ;;  %v18358_v63 = vld [vmem:[%s21703_s14 + $0x1f8] sm:$0xff] }
  0x20   :  { %21819 = vst [vmem:[#allocation63_spill] sm:$0xff] %v18353_v62  ;;  %21820 = vst [vmem:[#allocation64_spill] sm:$0xff] %v18358_v63 }
  0x21   :  { %217 = vsyncadd [#allocation4], 8192  ;;  %v18363_v59 = vld [vmem:[%s21704_s15] sm:$0xff]  ;;  %v18368_v58 = vld [vmem:[%s21704_s15 + $0x8] sm:$0xff]  ;;  %v17946_v60 = vmov 0   ;;  %vm732_vm0 = vcmask 1043456  }
  0x22   :  { %21821 = vst [vmem:[#allocation65_spill] sm:$0xff] %v18363_v59  ;;  %21822 = vst [vmem:[#allocation66_spill] sm:$0xff] %v18368_v58  ;;  %v18373_v62 = vld [vmem:[%s21704_s15 + $0x10] sm:$0xff]  ;;  %v18378_v63 = vld [vmem:[%s21704_s15 + $0x18] sm:$0xff]  ;;  %17629 = vset.pattern.permute.xlu1 %v17946_v60  ;;  %17628 = vset.pattern.permute.xlu0 %v17946_v60  ;;  %vm683_vm1 = vcmask 31744  }
  0x23   :  { %21823 = vst [vmem:[#allocation67_spill] sm:$0xff] %v18373_v62  ;;  %21824 = vst [vmem:[#allocation68_spill] sm:$0xff] %v18378_v63  ;;  %v18383_v61 = vld [vmem:[%s21704_s15 + $0x20] sm:$0xff]  ;;  %v18388_v59 = vld [vmem:[%s21704_s15 + $0x28] sm:$0xff] }
  0x24   :  { %21825 = vst [vmem:[#allocation69_spill] sm:$0xff] %v18383_v61  ;;  %21826 = vst [vmem:[#allocation70_spill] sm:$0xff] %v18388_v59  ;;  %v18393_v58 = vld [vmem:[%s21704_s15 + $0x30] sm:$0xff]  ;;  %v18398_v62 = vld [vmem:[%s21704_s15 + $0x38] sm:$0xff] }
  0x25   :  { %21827 = vst [vmem:[#allocation71_spill] sm:$0xff] %v18393_v58  ;;  %21828 = vst [vmem:[#allocation72_spill] sm:$0xff] %v18398_v62  ;;  %v18403_v63 = vld [vmem:[%s21704_s15 + $0x40] sm:$0xff]  ;;  %v18408_v61 = vld [vmem:[%s21704_s15 + $0x48] sm:$0xff] }
  0x26   :  { %21829 = vst [vmem:[#allocation73_spill] sm:$0xff] %v18403_v63  ;;  %21830 = vst [vmem:[#allocation74_spill] sm:$0xff] %v18408_v61  ;;  %v18413_v59 = vld [vmem:[%s21704_s15 + $0x50] sm:$0xff]  ;;  %v18418_v58 = vld [vmem:[%s21704_s15 + $0x58] sm:$0xff] }
  0x27   :  { %21831 = vst [vmem:[#allocation75_spill] sm:$0xff] %v18413_v59  ;;  %21832 = vst [vmem:[#allocation76_spill] sm:$0xff] %v18418_v58  ;;  %v18423_v62 = vld [vmem:[%s21704_s15 + $0x60] sm:$0xff]  ;;  %v18428_v63 = vld [vmem:[%s21704_s15 + $0x68] sm:$0xff] }
  0x28   :  { %21833 = vst [vmem:[#allocation77_spill] sm:$0xff] %v18423_v62  ;;  %21834 = vst [vmem:[#allocation78_spill] sm:$0xff] %v18428_v63  ;;  %v18433_v61 = vld [vmem:[%s21704_s15 + $0x70] sm:$0xff]  ;;  %v18438_v59 = vld [vmem:[%s21704_s15 + $0x78] sm:$0xff] }
  0x29   :  { %21835 = vst [vmem:[#allocation79_spill] sm:$0xff] %v18433_v61  ;;  %21836 = vst [vmem:[#allocation80_spill] sm:$0xff] %v18438_v59  ;;  %v18443_v58 = vld [vmem:[%s21704_s15 + $0x80] sm:$0xff]  ;;  %v18448_v62 = vld [vmem:[%s21704_s15 + $0x88] sm:$0xff] }
  0x2a   :  { %21837 = vst [vmem:[#allocation81_spill] sm:$0xff] %v18443_v58  ;;  %21838 = vst [vmem:[#allocation82_spill] sm:$0xff] %v18448_v62  ;;  %v18453_v63 = vld [vmem:[%s21704_s15 + $0x90] sm:$0xff]  ;;  %v18458_v61 = vld [vmem:[%s21704_s15 + $0x98] sm:$0xff] }
  0x2b   :  { %21839 = vst [vmem:[#allocation83_spill] sm:$0xff] %v18453_v63  ;;  %21840 = vst [vmem:[#allocation84_spill] sm:$0xff] %v18458_v61  ;;  %v18463_v59 = vld [vmem:[%s21704_s15 + $0xa0] sm:$0xff]  ;;  %v18468_v58 = vld [vmem:[%s21704_s15 + $0xa8] sm:$0xff] }
  0x2c   :  { %21841 = vst [vmem:[#allocation85_spill] sm:$0xff] %v18463_v59  ;;  %21842 = vst [vmem:[#allocation86_spill] sm:$0xff] %v18468_v58  ;;  %v18473_v62 = vld [vmem:[%s21704_s15 + $0xb0] sm:$0xff]  ;;  %v18478_v63 = vld [vmem:[%s21704_s15 + $0xb8] sm:$0xff] }
  0x2d   :  { %21843 = vst [vmem:[#allocation87_spill] sm:$0xff] %v18473_v62  ;;  %21844 = vst [vmem:[#allocation88_spill] sm:$0xff] %v18478_v63  ;;  %v18483_v61 = vld [vmem:[%s21704_s15 + $0xc0] sm:$0xff]  ;;  %v18488_v59 = vld [vmem:[%s21704_s15 + $0xc8] sm:$0xff] }
  0x2e   :  { %21845 = vst [vmem:[#allocation89_spill] sm:$0xff] %v18483_v61  ;;  %21846 = vst [vmem:[#allocation90_spill] sm:$0xff] %v18488_v59  ;;  %v18493_v58 = vld [vmem:[%s21704_s15 + $0xd0] sm:$0xff]  ;;  %v18498_v62 = vld [vmem:[%s21704_s15 + $0xd8] sm:$0xff] }
  0x2f   :  { %21847 = vst [vmem:[#allocation91_spill] sm:$0xff] %v18493_v58  ;;  %21848 = vst [vmem:[#allocation92_spill] sm:$0xff] %v18498_v62  ;;  %v18503_v63 = vld [vmem:[%s21704_s15 + $0xe0] sm:$0xff]  ;;  %v18508_v61 = vld [vmem:[%s21704_s15 + $0xe8] sm:$0xff] }
  0x30   :  { %21849 = vst [vmem:[#allocation93_spill] sm:$0xff] %v18503_v63  ;;  %21850 = vst [vmem:[#allocation94_spill] sm:$0xff] %v18508_v61  ;;  %v18513_v59 = vld [vmem:[%s21704_s15 + $0xf0] sm:$0xff]  ;;  %v18518_v58 = vld [vmem:[%s21704_s15 + $0xf8] sm:$0xff] }
  0x31   :  { %21851 = vst [vmem:[#allocation95_spill] sm:$0xff] %v18513_v59  ;;  %21852 = vst [vmem:[#allocation96_spill] sm:$0xff] %v18518_v58  ;;  %v18523_v62 = vld [vmem:[%s21704_s15 + $0x100] sm:$0xff]  ;;  %v18528_v63 = vld [vmem:[%s21704_s15 + $0x108] sm:$0xff] }
  0x32   :  { %21853 = vst [vmem:[#allocation97_spill] sm:$0xff] %v18523_v62  ;;  %21854 = vst [vmem:[#allocation98_spill] sm:$0xff] %v18528_v63  ;;  %v18533_v61 = vld [vmem:[%s21704_s15 + $0x110] sm:$0xff]  ;;  %v18538_v59 = vld [vmem:[%s21704_s15 + $0x118] sm:$0xff] }
  0x33   :  { %21855 = vst [vmem:[#allocation99_spill] sm:$0xff] %v18533_v61  ;;  %21856 = vst [vmem:[#allocation100_spill] sm:$0xff] %v18538_v59  ;;  %v18543_v58 = vld [vmem:[%s21704_s15 + $0x120] sm:$0xff]  ;;  %v18548_v62 = vld [vmem:[%s21704_s15 + $0x128] sm:$0xff] }
  0x34   :  { %21857 = vst [vmem:[#allocation101_spill] sm:$0xff] %v18543_v58  ;;  %21858 = vst [vmem:[#allocation102_spill] sm:$0xff] %v18548_v62  ;;  %v18553_v63 = vld [vmem:[%s21704_s15 + $0x130] sm:$0xff]  ;;  %v18558_v61 = vld [vmem:[%s21704_s15 + $0x138] sm:$0xff] }
  0x35   :  { %21859 = vst [vmem:[#allocation103_spill] sm:$0xff] %v18553_v63  ;;  %21860 = vst [vmem:[#allocation104_spill] sm:$0xff] %v18558_v61  ;;  %v18563_v59 = vld [vmem:[%s21704_s15 + $0x140] sm:$0xff]  ;;  %v18568_v58 = vld [vmem:[%s21704_s15 + $0x148] sm:$0xff] }
  0x36   :  { %21861 = vst [vmem:[#allocation105_spill] sm:$0xff] %v18563_v59  ;;  %21862 = vst [vmem:[#allocation106_spill] sm:$0xff] %v18568_v58  ;;  %v18573_v62 = vld [vmem:[%s21704_s15 + $0x150] sm:$0xff]  ;;  %v18578_v63 = vld [vmem:[%s21704_s15 + $0x158] sm:$0xff] }
  0x37   :  { %21863 = vst [vmem:[#allocation107_spill] sm:$0xff] %v18573_v62  ;;  %21864 = vst [vmem:[#allocation108_spill] sm:$0xff] %v18578_v63  ;;  %v18583_v61 = vld [vmem:[%s21704_s15 + $0x160] sm:$0xff]  ;;  %v18588_v59 = vld [vmem:[%s21704_s15 + $0x168] sm:$0xff] }
  0x38   :  { %21865 = vst [vmem:[#allocation109_spill] sm:$0xff] %v18583_v61  ;;  %21866 = vst [vmem:[#allocation110_spill] sm:$0xff] %v18588_v59  ;;  %v18593_v58 = vld [vmem:[%s21704_s15 + $0x170] sm:$0xff]  ;;  %v18598_v62 = vld [vmem:[%s21704_s15 + $0x178] sm:$0xff] }
  0x39   :  { %21867 = vst [vmem:[#allocation111_spill] sm:$0xff] %v18593_v58  ;;  %21868 = vst [vmem:[#allocation112_spill] sm:$0xff] %v18598_v62  ;;  %v18603_v63 = vld [vmem:[%s21704_s15 + $0x180] sm:$0xff]  ;;  %v18608_v61 = vld [vmem:[%s21704_s15 + $0x188] sm:$0xff] }
  0x3a   :  { %21869 = vst [vmem:[#allocation113_spill] sm:$0xff] %v18603_v63  ;;  %21870 = vst [vmem:[#allocation114_spill] sm:$0xff] %v18608_v61  ;;  %v18613_v59 = vld [vmem:[%s21704_s15 + $0x190] sm:$0xff]  ;;  %v18618_v58 = vld [vmem:[%s21704_s15 + $0x198] sm:$0xff] }
  0x3b   :  { %21871 = vst [vmem:[#allocation115_spill] sm:$0xff] %v18613_v59  ;;  %21872 = vst [vmem:[#allocation116_spill] sm:$0xff] %v18618_v58  ;;  %v18623_v62 = vld [vmem:[%s21704_s15 + $0x1a0] sm:$0xff]  ;;  %v18628_v63 = vld [vmem:[%s21704_s15 + $0x1a8] sm:$0xff] }
  0x3c   :  { %21873 = vst [vmem:[#allocation117_spill] sm:$0xff] %v18623_v62  ;;  %21874 = vst [vmem:[#allocation118_spill] sm:$0xff] %v18628_v63  ;;  %v18633_v61 = vld [vmem:[%s21704_s15 + $0x1b0] sm:$0xff]  ;;  %v18638_v59 = vld [vmem:[%s21704_s15 + $0x1b8] sm:$0xff] }
  0x3d   :  { %21875 = vst [vmem:[#allocation119_spill] sm:$0xff] %v18633_v61  ;;  %21876 = vst [vmem:[#allocation120_spill] sm:$0xff] %v18638_v59  ;;  %v18643_v58 = vld [vmem:[%s21704_s15 + $0x1c0] sm:$0xff]  ;;  %v18648_v62 = vld [vmem:[%s21704_s15 + $0x1c8] sm:$0xff] }
  0x3e   :  { %21877 = vst [vmem:[#allocation121_spill] sm:$0xff] %v18643_v58  ;;  %21878 = vst [vmem:[#allocation122_spill] sm:$0xff] %v18648_v62  ;;  %v18653_v63 = vld [vmem:[%s21704_s15 + $0x1d0] sm:$0xff]  ;;  %v18658_v61 = vld [vmem:[%s21704_s15 + $0x1d8] sm:$0xff] }
  0x3f   :  { %21879 = vst [vmem:[#allocation123_spill] sm:$0xff] %v18653_v63  ;;  %21880 = vst [vmem:[#allocation124_spill] sm:$0xff] %v18658_v61  ;;  %v18663_v59 = vld [vmem:[%s21704_s15 + $0x1e0] sm:$0xff]  ;;  %v18668_v58 = vld [vmem:[%s21704_s15 + $0x1e8] sm:$0xff] }
  0x40   :  { %21881 = vst [vmem:[#allocation125_spill] sm:$0xff] %v18663_v59  ;;  %21882 = vst [vmem:[#allocation126_spill] sm:$0xff] %v18668_v58  ;;  %v18673_v62 = vld [vmem:[%s21704_s15 + $0x1f0] sm:$0xff]  ;;  %v18678_v63 = vld [vmem:[%s21704_s15 + $0x1f8] sm:$0xff] }
  0x41   :  { %21883 = vst [vmem:[#allocation127_spill] sm:$0xff] %v18673_v62  ;;  %21884 = vst [vmem:[#allocation128_spill] sm:$0xff] %v18678_v63  ;;  %v389_v61 = vld [vmem:[%s21693_s4 + $0x10] sm:$0xff]  ;;  %v387_v59 = vld [vmem:[%s21693_s4] sm:$0xff] }
  0x42   :  { %432 = vperm.xlu1 %17629, %v389_v61   ;;  %422 = vperm.xlu0 %17628, %v387_v59   ;;  %v390_v62 = vld [vmem:[%s21693_s4 + $0x18] sm:$0xff]  ;;  %v388_v63 = vld [vmem:[%s21693_s4 + $0x8] sm:$0xff] }
  0x43   :  { %386 = vsyncadd [#allocation4 + $0x1], 8192  ;;  %v682_v58 = vld [vmem:[%s21696_s7] sm:$0xf]  ;;  %s21885_s24 = sld [smem:[#allocation129_spill]]  ;;  %v392_v61 = vld [vmem:[%s21693_s4 + $0x28] sm:$0xff] }
  0x44   :  { %v391_v57 = vld [vmem:[%s21693_s4 + $0x20] sm:$0xff]  ;;  %16009 = vmatprep.subr.msk.mxu0 %vm732_vm0, %v682_v58  ;;  %v394_v56 = vld [vmem:[%s21693_s4 + $0x38] sm:$0xff]  ;;  %v540_v55 = vld [vmem:[%s21691_s2 + $0x10] sm:$0xff] }
  0x45   :  { %16010 = vmatpush3.msk.msra.mxu0 %vm732_vm0, %v682_v58  ;;  %v393_v58 = vld [vmem:[%s21693_s4 + $0x30] sm:$0xff]  ;;  %v405_v46 = vld [vmem:[%s21690_s1 + $0x8] sm:$0xff] }
  0x46   :  { %437 = vperm.xlu1 %17629, %v390_v62   ;;  %427 = vperm.xlu0 %17628, %v388_v63   ;;  %v539_v43 = vld [vmem:[%s21691_s2 + $0x8] sm:$0xff] }
  0x49   :  { %v666_v59 = vld [vmem:[%s21885_s24] sm:$0xff]  ;;  %v667_v60 = vld [vmem:[%s21885_s24 + $0x8] sm:$0xff]  ;;  %v668_v62 = vld [vmem:[%s21885_s24 + $0x10] sm:$0xff] }
  0x4a   :  { %16011 = vmatprep.mubr.msk.f32.mxu0 %vm683_vm1, %v666_v59  ;;  %447 = vperm.xlu1 %17629, %v392_v61   ;;  %v669_v63 = vld [vmem:[%s21885_s24 + $0x18] sm:$0xff]  ;;  %v670_v59 = vld [vmem:[%s21885_s24 + $0x20] sm:$0xff] }
  0x4b   :  { %16012 = vmatmul.mubr.msk.f32.vlgmr.msra.gmra.mrb[0].mxu0 %vm683_vm1, %v667_v60  ;;  %442 = vperm.xlu0 %17628, %v391_v57   ;;  %v671_v57 = vld [vmem:[%s21885_s24 + $0x28] sm:$0xff]  ;;  %v395_v61 = vld [vmem:[%s21693_s4 + $0x40] sm:$0xff] }
  0x4c   :  { %16014 = vmatprep.mubr.msk.f32.mxu0 %vm683_vm1, %v668_v62  ;;  %v396_v60 = vld [vmem:[%s21693_s4 + $0x48] sm:$0xff]  ;;  %v672_v62 = vld [vmem:[%s21885_s24 + $0x30] sm:$0xff] }
  0x4e   :  { %457 = vperm.xlu1 %17629, %v394_v56   ;;  %v673_v56 = vld [vmem:[%s21885_s24 + $0x38] sm:$0xff] }
  0x4f   :  { %16015 = vmatmul.mubr.msk.f32.gmra.mrb[2].mxu0 %vm683_vm1, %v669_v63  ;;  %452 = vperm.xlu0 %17628, %v393_v58   ;;  %v398_v63 = vld [vmem:[%s21693_s4 + $0x58] sm:$0xff]  ;;  %v397_v58 = vld [vmem:[%s21693_s4 + $0x50] sm:$0xff] }
  0x50   :  { %16017 = vmatprep.mubr.msk.f32.mxu0 %vm683_vm1, %v670_v59  ;;  %v674_v59 = vld [vmem:[%s21885_s24 + $0x40] sm:$0xff] }
  0x52   :  { %467 = vperm.xlu1 %17629, %v396_v60   ;;  %v400_v60 = vld [vmem:[%s21693_s4 + $0x68] sm:$0xff] }
  0x53   :  { %16018 = vmatmul.mubr.msk.f32.gmra.mrb[4].mxu0 %vm683_vm1, %v671_v57  ;;  %462 = vperm.xlu0 %17628, %v395_v61   ;;  %v675_v57 = vld [vmem:[%s21885_s24 + $0x48] sm:$0xff]  ;;  %v399_v61 = vld [vmem:[%s21693_s4 + $0x60] sm:$0xff] }
  0x54   :  { %16020 = vmatprep.mubr.msk.f32.mxu0 %vm683_vm1, %v672_v62  ;;  %v676_v62 = vld [vmem:[%s21885_s24 + $0x50] sm:$0xff] }
  0x56   :  { %477 = vperm.xlu1 %17629, %v398_v63   ;;  %v402_v63 = vld [vmem:[%s21693_s4 + $0x78] sm:$0xff] }
  0x57   :  { %16021 = vmatmul.mubr.msk.f32.gmra.mrb[6].mxu0 %vm683_vm1, %v673_v56  ;;  %472 = vperm.xlu0 %17628, %v397_v58   ;;  %v677_v56 = vld [vmem:[%s21885_s24 + $0x58] sm:$0xff]  ;;  %v401_v58 = vld [vmem:[%s21693_s4 + $0x70] sm:$0xff] }
  0x58   :  { %16023 = vmatprep.mubr.msk.f32.mxu0 %vm683_vm1, %v674_v59  ;;  %v678_v59 = vld [vmem:[%s21885_s24 + $0x60] sm:$0xff] }
  0x5a   :  { %487 = vperm.xlu1 %17629, %v400_v60   ;;  %v680_v60 = vld [vmem:[%s21885_s24 + $0x70] sm:$0xff] }
  0x5b   :  { %16024 = vmatmul.mubr.msk.f32.gmra.mrb[8].mxu0 %vm683_vm1, %v675_v57  ;;  %482 = vperm.xlu0 %17628, %v399_v61   ;;  %v679_v57 = vld [vmem:[%s21885_s24 + $0x68] sm:$0xff]  ;;  %v681_v61 = vld [vmem:[%s21885_s24 + $0x78] sm:$0xff] }
  0x5c   :  { %16026 = vmatprep.mubr.msk.f32.mxu0 %vm683_vm1, %v676_v62  ;;  %v18798_v62 = vld [vmem:[%s21694_s5] ss:$0 sm:$0xff] }
  0x5e   :  { %497 = vperm.xlu1 %17629, %v402_v63   ;;  %v404_v63 = vld [vmem:[%s21690_s1] sm:$0xff] }
  0x5f   :  { %16027 = vmatmul.mubr.msk.f32.gmra.mrb[10].mxu0 %vm683_vm1, %v677_v56  ;;  %492 = vperm.xlu0 %17628, %v401_v58   ;;  %v538_v58 = vld [vmem:[%s21691_s2] sm:$0xff] }
  0x60   :  { %16029 = vmatprep.mubr.msk.f32.mxu0 %vm683_vm1, %v678_v59 }
  0x63   :  { %16030 = vmatmul.mubr.msk.f32.gmra.mrb[12].mxu0 %vm683_vm1, %v679_v57 }
  0x64   :  { %16032 = vmatprep.mubr.msk.f32.mxu0 %vm683_vm1, %v680_v60 }
  0x67   :  { %16033 = vmatmul.mubr.msk.f32.gmra.mrb[14].mxu0 %vm683_vm1, %v681_v61  ;;  %v406_v61 = vld [vmem:[%s21690_s1 + $0x10] sm:$0xff] }
  0xc1   :  { %v433_v56 = vpop.permute.xlu1 %432  ;;  %v423_v59 = vpop.permute.xlu0 %422 }
  0xc2   :  { %v508_v57 = vmul.f32 %v18798_v62, %v433_v56  ;;  %v506_v60 = vmul.f32 %v18798_v62, %v423_v59  ;;  %v554_v51 = vmul.f32 %v538_v58, %v423_v59  ;;  %v556_v49 = vmul.f32 %v540_v55, %v433_v56  ;;  %v408_v59 = vld [vmem:[%s21690_s1 + $0x20] sm:$0xff] }
  0xc4   :  { %v522_v54 = vmul.f32 %v506_v60, %v404_v63  ;;  %v524_v52 = vmul.f32 %v508_v57, %v406_v61  ;;  %v407_v63 = vld [vmem:[%s21690_s1 + $0x18] sm:$0xff]  ;;  %v542_v57 = vld [vmem:[%s21691_s2 + $0x20] sm:$0xff] }
  0xc5   :  { %v438_v50 = vpop.permute.xlu1 %437  ;;  %v428_v53 = vpop.permute.xlu0 %427 }
  0xc6   :  { %v18814_v48 = vadd.f32 %v554_v51, %v522_v54  ;;  %v509_v47 = vmul.f32 %v18798_v62, %v438_v50  ;;  %v507_v58 = vmul.f32 %v18798_v62, %v428_v53  ;;  %v541_v51 = vld [vmem:[%s21691_s2 + $0x18] sm:$0xff]  ;;  %v555_v55 = vmul.f32 %v539_v43, %v428_v53  ;;  %v409_v43 = vld [vmem:[%s21690_s1 + $0x28] sm:$0xff] }
  0xc7   :  { %v18838_v61 = vadd.f32 %v556_v49, %v524_v52  ;;  %v543_v49 = vld [vmem:[%s21691_s2 + $0x28] sm:$0xff] }
  0xc8   :  { %586 = vadd.xlane.f32.xlu0 %v18814_v48  ;;  %16067 = vmatprep.mubr.f32.mxu1 %v18814_v48  ;;  %v523_v54 = vmul.f32 %v507_v58, %v405_v46  ;;  %v525_v42 = vmul.f32 %v509_v47, %v407_v63  ;;  %v557_v46 = vmul.f32 %v541_v51, %v438_v50  ;;  %v544_v50 = vld [vmem:[%s21691_s2 + $0x30] sm:$0xff]  ;;  %v411_v51 = vld [vmem:[%s21690_s1 + $0x38] sm:$0xff] }
  0xc9   :  { %v448_v56 = vpop.permute.xlu1 %447 }
  0xca   :  { %v443_v60 = vpop.permute.xlu0 %442  ;;  %v511_v45 = vmul.f32 %v18798_v62, %v448_v56  ;;  %v18842_v41 = vadd.f32 %v555_v55, %v523_v54  ;;  %v18852_v63 = vadd.f32 %v557_v46, %v525_v42  ;;  %v412_v46 = vld [vmem:[%s21690_s1 + $0x40] sm:$0xff] }
  0xcb   :  { %v510_v44 = vmul.f32 %v18798_v62, %v443_v60  ;;  %v558_v58 = vmul.f32 %v542_v57, %v443_v60 }
  0xcc   :  { %590 = vadd.xlane.f32.xlu0 %v18838_v61  ;;  %588 = vadd.xlane.f32.xlu1 %v18842_v41  ;;  %v527_v54 = vmul.f32 %v511_v45, %v409_v43  ;;  %v545_v45 = vld [vmem:[%s21691_s2 + $0x38] sm:$0xff] }
  0xcd   :  { %v526_v53 = vmul.f32 %v510_v44, %v408_v59  ;;  %v458_v47 = vpop.permute.xlu1 %457  ;;  %v410_v44 = vld [vmem:[%s21690_s1 + $0x30] sm:$0xff]  ;;  %v559_v59 = vmul.f32 %v543_v49, %v448_v56 }
  0xce   :  { %v453_v52 = vpop.permute.xlu0 %452  ;;  %v513_v40 = vmul.f32 %v18798_v62, %v458_v47 }
  0xcf   :  { %v18854_v55 = vadd.f32 %v558_v58, %v526_v53  ;;  %v512_v42 = vmul.f32 %v18798_v62, %v453_v52  ;;  %v560_v60 = vmul.f32 %v544_v50, %v453_v52  ;;  %v546_v53 = vld [vmem:[%s21691_s2 + $0x40] sm:$0xff]  ;;  %v18878_v58 = vadd.f32 %v559_v59, %v527_v54  ;;  %v413_v50 = vld [vmem:[%s21690_s1 + $0x48] sm:$0xff] }
  0xd0   :  { %592 = vadd.xlane.f32.xlu0 %v18852_v63  ;;  %v529_v49 = vmul.f32 %v513_v40, %v411_v51  ;;  %v547_v54 = vld [vmem:[%s21691_s2 + $0x48] sm:$0xff] }
  0xd1   :  { %v528_v57 = vmul.f32 %v512_v42, %v410_v44  ;;  %594 = vadd.xlane.f32.xlu1 %v18854_v55  ;;  %v468_v43 = vpop.permute.xlu1 %467  ;;  %v561_v42 = vmul.f32 %v545_v45, %v458_v47  ;;  %v414_v47 = vld [vmem:[%s21690_s1 + $0x50] sm:$0xff] }
  0xd2   :  { %v463_v56 = vpop.permute.xlu0 %462  ;;  %v515_v39 = vmul.f32 %v18798_v62, %v468_v43  ;;  %v548_v45 = vld [vmem:[%s21691_s2 + $0x50] sm:$0xff] }
  0xd3   :  { %v514_v44 = vmul.f32 %v18798_v62, %v463_v56  ;;  %v18882_v52 = vadd.f32 %v560_v60, %v528_v57  ;;  %v562_v35 = vmul.f32 %v546_v53, %v463_v56  ;;  %v18892_v59 = vadd.f32 %v561_v42, %v529_v49 }
  0xd4   :  { %596 = vadd.xlane.f32.xlu0 %v18878_v58  ;;  %v531_v57 = vmul.f32 %v515_v39, %v413_v50  ;;  %v563_v56 = vmul.f32 %v547_v54, %v468_v43  ;;  %v550_v50 = vld [vmem:[%s21691_s2 + $0x60] sm:$0xff] }
  0xd5   :  { %v530_v38 = vmul.f32 %v514_v44, %v412_v46  ;;  %598 = vadd.xlane.f32.xlu1 %v18882_v52  ;;  %v478_v40 = vpop.permute.xlu1 %477  ;;  %v415_v46 = vld [vmem:[%s21690_s1 + $0x58] sm:$0xff]  ;;  %v416_v44 = vld [vmem:[%s21690_s1 + $0x60] sm:$0xff] }
  0xd6   :  { %v473_v51 = vpop.permute.xlu0 %472  ;;  %v517_v34 = vmul.f32 %v18798_v62, %v478_v40  ;;  %v18918_v42 = vadd.f32 %v563_v56, %v531_v57  ;;  %v551_v57 = vld [vmem:[%s21691_s2 + $0x68] sm:$0xff] }
  0xd7   :  { %v18894_v60 = vadd.f32 %v562_v35, %v530_v38  ;;  %v516_v53 = vmul.f32 %v18798_v62, %v473_v51  ;;  %v549_v35 = vld [vmem:[%s21691_s2 + $0x58] sm:$0xff]  ;;  %v564_v39 = vmul.f32 %v548_v45, %v473_v51  ;;  %v417_v45 = vld [vmem:[%s21690_s1 + $0x68] sm:$0xff] }
  0xd8   :  { %600 = vadd.xlane.f32.xlu0 %v18892_v59  ;;  %v533_v54 = vmul.f32 %v517_v34, %v415_v46 }
  0xd9   :  { %v532_v38 = vmul.f32 %v516_v53, %v414_v47  ;;  %602 = vadd.xlane.f32.xlu1 %v18894_v60  ;;  %v488_v49 = vpop.permute.xlu1 %487  ;;  %v565_v53 = vmul.f32 %v549_v35, %v478_v40  ;;  %v418_v40 = vld [vmem:[%s21690_s1 + $0x70] sm:$0xff] }
  0xda   :  { %v483_v43 = vpop.permute.xlu0 %482  ;;  %v519_v37 = vmul.f32 %v18798_v62, %v488_v49  ;;  %v552_v35 = vld [vmem:[%s21691_s2 + $0x70] sm:$0xff] }
  0xdb   :  { %v518_v47 = vmul.f32 %v18798_v62, %v483_v43  ;;  %v18922_v51 = vadd.f32 %v564_v39, %v532_v38  ;;  %v566_v33 = vmul.f32 %v550_v50, %v483_v43  ;;  %v18932_v56 = vadd.f32 %v565_v53, %v533_v54 }
  0xdc   :  { %604 = vadd.xlane.f32.xlu0 %v18918_v42  ;;  %v535_v38 = vmul.f32 %v519_v37, %v417_v45  ;;  %v567_v43 = vmul.f32 %v551_v57, %v488_v49  ;;  %v1640_v49 = vld [vmem:[%s21695_s6] sm:$0xff]  ;;  %v1643_v57 = vld [vmem:[%s21695_s6 + $0x18] sm:$0xff] }
  0xdd   :  { %v534_v36 = vmul.f32 %v518_v47, %v416_v44  ;;  %606 = vadd.xlane.f32.xlu1 %v18922_v51  ;;  %v498_v34 = vpop.permute.xlu1 %497  ;;  %v419_v44 = vld [vmem:[%s21690_s1 + $0x78] sm:$0xff] }
  0xde   :  { %v493_v46 = vpop.permute.xlu0 %492  ;;  %v521_v32 = vmul.f32 %v18798_v62, %v498_v34  ;;  %v18952_v54 = vadd.f32 %v567_v43, %v535_v38  ;;  %v1644_v38 = vld [vmem:[%s21695_s6 + $0x20] sm:$0xff]  ;;  %v1651_v43 = vld [vmem:[%s21695_s6 + $0x58] sm:$0xff] }
  0xdf   :  { %v18934_v39 = vadd.f32 %v566_v33, %v534_v36  ;;  %v520_v50 = vmul.f32 %v18798_v62, %v493_v46  ;;  %v553_v33 = vld [vmem:[%s21691_s2 + $0x78] sm:$0xff]  ;;  %v568_v37 = vmul.f32 %v552_v35, %v493_v46  ;;  %v1645_v46 = vld [vmem:[%s21695_s6 + $0x28] sm:$0xff]  ;;  %v1646_v35 = vld [vmem:[%s21695_s6 + $0x30] sm:$0xff] }
  0xe0   :  { %608 = vadd.xlane.f32.xlu0 %v18932_v56  ;;  %v537_v47 = vmul.f32 %v521_v32, %v419_v44  ;;  %v569_v53 = vmul.f32 %v553_v33, %v498_v34  ;;  %v1642_v32 = vld [vmem:[%s21695_s6 + $0x10] sm:$0xff]  ;;  %v1641_v34 = vld [vmem:[%s21695_s6 + $0x8] sm:$0xff] }
  0xe1   :  { %v536_v36 = vmul.f32 %v520_v50, %v418_v40  ;;  %610 = vadd.xlane.f32.xlu1 %v18934_v39  ;;  %v1647_v40 = vld [vmem:[%s21695_s6 + $0x38] sm:$0xff]  ;;  %v1649_v44 = vld [vmem:[%s21695_s6 + $0x48] sm:$0xff]  ;;  %v1648_v50 = vld [vmem:[%s21695_s6 + $0x40] sm:$0xff] }
  0xe2   :  { %v18958_v62 = vadd.f32 %v569_v53, %v537_v47  ;;  %v1650_v33 = vld [vmem:[%s21695_s6 + $0x50] sm:$0xff]  ;;  %v1655_v47 = vld [vmem:[%s21695_s6 + $0x78] sm:$0xff] }
  0xe3   :  { %v18954_v45 = vadd.f32 %v568_v37, %v536_v36  ;;  %v1653_v36 = vld [vmem:[%s21695_s6 + $0x68] sm:$0xff]  ;;  %v1652_v37 = vld [vmem:[%s21695_s6 + $0x60] sm:$0xff]  ;;  %v1654_v53 = vld [vmem:[%s21695_s6 + $0x70] sm:$0xff] }
  0xe4   :  { %612 = vadd.xlane.f32.xlu0 %v18952_v54 }
  0xe5   :  { %614 = vadd.xlane.f32.xlu1 %v18954_v45 }
  0xe8   :  { %616 = vadd.xlane.f32.xlu0 %v18958_v62 }
  0xf6   :  { %1658 = vperm.xlu1 %17629, %v1640_v49  }
  0xfa   :  { %1668 = vperm.xlu1 %17629, %v1642_v32  }
  0xfe   :  { %1673 = vperm.xlu1 %17629, %v1643_v57   ;;  %1663 = vperm.xlu0 %17628, %v1641_v34  }
 0x102   :  { %1683 = vperm.xlu1 %17629, %v1645_v46   ;;  %1678 = vperm.xlu0 %17628, %v1644_v38  }
 0x106   :  { %1693 = vperm.xlu1 %17629, %v1647_v40   ;;  %1688 = vperm.xlu0 %17628, %v1646_v35   ;;  %v1097_v35 = vld [vmem:[%s21698_s9] sm:$0xff] }
 0x10a   :  { %1703 = vperm.xlu1 %17629, %v1649_v44   ;;  %1698 = vperm.xlu0 %17628, %v1648_v50   ;;  %v1098_v44 = vld [vmem:[%s21698_s9 + $0x8] sm:$0xff]  ;;  %v1099_v50 = vld [vmem:[%s21698_s9 + $0x10] sm:$0xff] }
 0x10e   :  { %1713 = vperm.xlu1 %17629, %v1651_v43   ;;  %1708 = vperm.xlu0 %17628, %v1650_v33   ;;  %v17259_v33 = vpack.c.bf16 %v1098_v44, %v1097_v35 }
 0x110   :  { %17260 = vmatprep.subr.bf16.mxu0 %v17259_v33 }
 0x111   :  { %17262 = vmatpush3.bf16.msra.mxu0 %v17259_v33 }
 0x112   :  { %1723 = vperm.xlu1 %17629, %v1653_v36   ;;  %1718 = vperm.xlu0 %17628, %v1652_v37   ;;  %v1100_v36 = vld [vmem:[%s21698_s9 + $0x18] sm:$0xff] }
 0x113   :  { %v17263_v37 = vpack.c.bf16 %v1100_v36, %v1099_v50 }
 0x115   :  { %17264 = vmatprep.subr.bf16.mxu0 %v17263_v37 }
 0x116   :  { %1733 = vperm.xlu1 %17629, %v1655_v47   ;;  %1728 = vperm.xlu0 %17628, %v1654_v53  }
 0x117   :  { %17266 = vmatpush3.bf16.msra.mxu0 %v17263_v37 }
 0x11e   :  { %v16013_v49 = vpop.f32.mrb[0].mxu0 }
 0x11f   :  { %v802_v32 = vpop.f32.mrb[1].mxu0 }
 0x122   :  { %v16016_v57 = vpop.f32.mrb[2].mxu0 }
 0x123   :  { %v812_v34 = vpop.f32.mrb[3].mxu0 }
 0x126   :  { %v19009_v46 = vpop.f32.mrb[4].mxu0 }
 0x127   :  { %v19011_v38 = vpop.f32.mrb[5].mxu0 }
 0x12a   :  { %v19013_v40 = vpop.f32.mrb[6].mxu0 }
 0x12b   :  { %v19024_v43 = vpop.f32.mrb[7].mxu0 }
 0x12e   :  { %v19029_v47 = vpop.f32.mrb[8].mxu0 }
 0x12f   :  { %v19031_v53 = vpop.f32.mrb[9].mxu0 }
 0x132   :  { %v19033_v31 = vpop.f32.mrb[10].mxu0 }
 0x133   :  { %v19035_v30 = vpop.f32.mrb[11].mxu0 }
 0x136   :  { %v19037_v27 = vpop.f32.mrb[12].mxu0 }
 0x137   :  { %v19039_v35 = vpop.f32.mrb[13].mxu0 }
 0x13a   :  { %v19041_v44 = vpop.f32.mrb[14].mxu0 }
 0x13b   :  { %v19043_v26 = vpop.f32.mrb[15].mxu0 }
 0x155   :  { %v587_v50 = vpop.xlane.xlu0 %586 }
 0x156   :  { %17630 = vrsqrt.f32 %v587_v50  ;;  %vm618_vm2 = vcmp.gt.f32.partialorder %v587_v50, 0.0 }
 0x159   :  { %v591_v36 = vpop.xlane.xlu0 %590  ;;  %v589_v33 = vpop.xlane.xlu1 %588 }
 0x15a   :  { %17632 = vrsqrt.f32 %v591_v36  ;;  %vm619_vm3 = vcmp.gt.f32.partialorder %v589_v33, 0.0  ;;  %vm620_vm4 = vcmp.gt.f32.partialorder %v591_v36, 0.0 }
 0x15b   :  { %17634 = vrsqrt.f32 %v589_v33 }
 0x15d   :  { %v593_v29 = vpop.xlane.xlu0 %592 }
 0x15e   :  { %v595_v28 = vpop.xlane.xlu1 %594  ;;  %17636 = vrsqrt.f32 %v593_v29  ;;  %vm621_vm5 = vcmp.gt.f32.partialorder %v593_v29, 0.0 }
 0x15f   :  { %17638 = vrsqrt.f32 %v595_v28  ;;  %vm622_vm6 = vcmp.gt.f32.partialorder %v595_v28, 0.0 }
 0x160   :  { %v17631_v37 = vpop.eup %17630 }
 0x161   :  { %v597_v25 = vpop.xlane.xlu0 %596  ;;  %v19045_v22 = vsel %vm618_vm2, %v17631_v37, 0.0  ;;  %vm1101_vm2 = vcmask 261120  }
 0x162   :  { %v599_v24 = vpop.xlane.xlu1 %598  ;;  %17640 = vrsqrt.f32 %v597_v25  ;;  %v881_v15 = vmul.f32 %v802_v32, %v19045_v22  ;;  %vm623_vm7 = vcmp.gt.f32.partialorder %v597_v25, 0.0 }
 0x163   :  { %17642 = vrsqrt.f32 %v599_v24  ;;  %vm624_vm8 = vcmp.gt.f32.partialorder %v599_v24, 0.0 }
 0x164   :  { %v17633_v23 = vpop.eup %17632 }
 0x165   :  { %v17635_v19 = vpop.eup %17634  ;;  %v601_v18 = vpop.xlane.xlu0 %600  ;;  %v19049_v17 = vsel %vm620_vm4, %v17633_v23, 0.0 }
 0x166   :  { %v19047_v21 = vsel %vm619_vm3, %v17635_v19, 0.0  ;;  %v603_v20 = vpop.xlane.xlu1 %602  ;;  %17644 = vrsqrt.f32 %v601_v18  ;;  %v883_v36 = vmul.f32 %v812_v34, %v19049_v17  ;;  %vm625_vm9 = vcmp.gt.f32.partialorder %v601_v18, 0.0 }
 0x167   :  { %v882_v16 = vmul.f32 %v16013_v49, %v19047_v21  ;;  %17646 = vrsqrt.f32 %v603_v20  ;;  %vm626_vm10 = vcmp.gt.f32.partialorder %v603_v20, 0.0 }
 0x168   :  { %v17637_v50 = vpop.eup %17636 }
 0x169   :  { %v17639_v14 = vpop.eup %17638  ;;  %v19053_v37 = vsel %vm621_vm5, %v17637_v50, 0.0  ;;  %v605_v11 = vpop.xlane.xlu0 %604  ;;  %v17227_v33 = vpack.c.bf16 %v882_v16, %v881_v15 }
 0x16a   :  { %v884_v19 = vmul.f32 %v16016_v57, %v19053_v37  ;;  %v607_v10 = vpop.xlane.xlu1 %606  ;;  %17648 = vrsqrt.f32 %v605_v11  ;;  %v19057_v23 = vsel %vm622_vm6, %v17639_v14, 0.0  ;;  %vm627_vm11 = vcmp.gt.f32.partialorder %v605_v11, 0.0 }
 0x16b   :  { %17650 = vrsqrt.f32 %v607_v10  ;;  %17228 = vmatprep.subr.bf16.mxu1 %v17227_v33  ;;  %v885_v16 = vmul.f32 %v19011_v38, %v19057_v23  ;;  %vm628_vm12 = vcmp.gt.f32.partialorder %v607_v10, 0.0 }
 0x16c   :  { %v17641_v49 = vpop.eup %17640  ;;  %v17231_v32 = vpack.c.bf16 %v884_v19, %v883_v36  ;;  %17230 = vmatpush3.bf16.msra.mxu1 %v17227_v33 }
 0x16d   :  { %v17643_v29 = vpop.eup %17642  ;;  %v19059_v50 = vsel %vm623_vm7, %v17641_v49, 0.0  ;;  %v609_v13 = vpop.xlane.xlu0 %608 }
 0x16e   :  { %v886_v15 = vmul.f32 %v19009_v46, %v19059_v50  ;;  %v611_v28 = vpop.xlane.xlu1 %610  ;;  %17652 = vrsqrt.f32 %v609_v13  ;;  %17232 = vmatprep.subr.bf16.mxu1 %v17231_v32  ;;  %v19065_v14 = vsel %vm624_vm8, %v17643_v29, 0.0  ;;  %vm629_vm13 = vcmp.gt.f32.partialorder %v609_v13, 0.0 }
 0x16f   :  { %17654 = vrsqrt.f32 %v611_v28  ;;  %v887_v38 = vmul.f32 %v19024_v43, %v19065_v14  ;;  %vm630_vm14 = vcmp.gt.f32.partialorder %v611_v28, 0.0 }
 0x170   :  { %v17645_v25 = vpop.eup %17644  ;;  %v17235_v57 = vpack.c.bf16 %v886_v15, %v885_v16  ;;  %17234 = vmatpush3.bf16.msra.mxu1 %v17231_v32 }
 0x171   :  { %v17647_v34 = vpop.eup %17646  ;;  %v19067_v33 = vsel %vm625_vm9, %v17645_v25, 0.0  ;;  %v613_v24 = vpop.xlane.xlu0 %612 }
 0x172   :  { %v888_v46 = vmul.f32 %v19013_v40, %v19067_v33  ;;  %v615_v19 = vpop.xlane.xlu1 %614  ;;  %17656 = vrsqrt.f32 %v613_v24  ;;  %17236 = vmatprep.subr.bf16.mxu1 %v17235_v57  ;;  %v19073_v36 = vsel %vm626_vm10, %v17647_v34, 0.0  ;;  %vm631_vm15 = vcmp.gt.f32.partialorder %v613_v24, 0.0 }
 0x173   :  { %17658 = vrsqrt.f32 %v615_v19  ;;  %v889_v43 = vmul.f32 %v19031_v53, %v19073_v36  ;;  %vm632_vm0 = vcmp.gt.f32.partialorder %v615_v19, 0.0 }
 0x174   :  { %v17649_v18 = vpop.eup %17648  ;;  %v17239_v49 = vpack.c.bf16 %v888_v46, %v887_v38  ;;  %17238 = vmatpush3.bf16.msra.mxu1 %v17235_v57 }
 0x175   :  { %v17651_v32 = vpop.eup %17650  ;;  %v19075_v29 = vsel %vm627_vm11, %v17649_v18, 0.0  ;;  %v617_v20 = vpop.xlane.xlu0 %616 }
 0x176   :  { %v890_v40 = vmul.f32 %v19029_v47, %v19075_v29  ;;  %17660 = vrsqrt.f32 %v617_v20  ;;  %17240 = vmatprep.subr.bf16.mxu1 %v17239_v49  ;;  %v19081_v15 = vsel %vm628_vm12, %v17651_v32, 0.0  ;;  %vm633_vm1 = vcmp.gt.f32.partialorder %v617_v20, 0.0 }
 0x177   :  { %v891_v47 = vmul.f32 %v19035_v30, %v19081_v15 }
 0x178   :  { %v17653_v16 = vpop.eup %17652  ;;  %v17243_v11 = vpack.c.bf16 %v890_v40, %v889_v43  ;;  %17242 = vmatpush3.bf16.msra.mxu1 %v17239_v49 }
 0x179   :  { %v17655_v25 = vpop.eup %17654  ;;  %v19083_v57 = vsel %vm629_vm13, %v17653_v16, 0.0 }
 0x17a   :  { %v892_v10 = vmul.f32 %v19033_v31, %v19083_v57  ;;  %17244 = vmatprep.subr.bf16.mxu1 %v17243_v11  ;;  %v19089_v53 = vsel %vm630_vm14, %v17655_v25, 0.0 }
 0x17b   :  { %v893_v31 = vmul.f32 %v19039_v35, %v19089_v53  ;;  %v19124_v35 = vld [vmem:[%s21697_s8] ss:$0 sm:$0xff] }
 0x17c   :  { %v17657_v34 = vpop.eup %17656  ;;  %v17247_v46 = vpack.c.bf16 %v892_v10, %v891_v47  ;;  %17246 = vmatpush3.bf16.msra.mxu1 %v17243_v11 }
 0x17d   :  { %v17659_v13 = vpop.eup %17658  ;;  %v19091_v38 = vsel %vm631_vm15, %v17657_v34, 0.0 }
 0x17e   :  { %v894_v28 = vmul.f32 %v19037_v27, %v19091_v38  ;;  %17248 = vmatprep.subr.bf16.mxu1 %v17247_v46  ;;  %v19097_v18 = vsel %vm632_vm0, %v17659_v13, 0.0 }
 0x17f   :  { %v895_v19 = vmul.f32 %v19043_v26, %v19097_v18 }
 0x180   :  { %v17661_v30 = vpop.eup %17660  ;;  %v17251_v49 = vpack.c.bf16 %v894_v28, %v893_v31  ;;  %17250 = vmatpush3.bf16.msra.mxu1 %v17247_v46 }
 0x181   :  { %v19099_v24 = vsel %vm633_vm1, %v17661_v30, 0.0 }
 0x182   :  { %v896_v32 = vmul.f32 %v19041_v44, %v19099_v24  ;;  %17252 = vmatprep.subr.bf16.mxu1 %v17251_v49 }
 0x184   :  { %v17255_v27 = vpack.c.bf16 %v896_v32, %v895_v19  ;;  %17254 = vmatpush3.bf16.msra.mxu1 %v17251_v49 }
 0x186   :  { %17256 = vmatprep.subr.bf16.mxu1 %v17255_v27 }
 0x188   :  { %17258 = vmatpush3.bf16.msra.mxu1 %v17255_v27 }
 0x18b   :  { %16068 = vmatmul.mubr.f32.vlgmr.msra.gmra.mrb[0].mxu1 %v18842_v41 }
 0x18c   :  { %16070 = vmatprep.mubr.f32.mxu1 %v18838_v61 }
 0x18f   :  { %16071 = vmatmul.mubr.f32.gmra.mrb[2].mxu1 %v18852_v63 }
 0x190   :  { %16073 = vmatprep.mubr.f32.mxu1 %v18854_v55 }
 0x193   :  { %16074 = vmatmul.mubr.f32.gmra.mrb[4].mxu1 %v18878_v58 }
 0x194   :  { %16076 = vmatprep.mubr.f32.mxu1 %v18882_v52 }
 0x197   :  { %16077 = vmatmul.mubr.f32.gmra.mrb[6].mxu1 %v18892_v59 }
 0x198   :  { %16079 = vmatprep.mubr.f32.mxu1 %v18894_v60 }
 0x19b   :  { %16080 = vmatmul.mubr.f32.gmra.mrb[8].mxu1 %v18918_v42 }
 0x19c   :  { %16082 = vmatprep.mubr.f32.mxu1 %v18922_v51 }
 0x19f   :  { %16083 = vmatmul.mubr.f32.gmra.mrb[10].mxu1 %v18932_v56 }
 0x1a0   :  { %16085 = vmatprep.mubr.f32.mxu1 %v18934_v39 }
 0x1a3   :  { %16086 = vmatmul.mubr.f32.gmra.mrb[12].mxu1 %v18952_v54 }
 0x1a4   :  { %16088 = vmatprep.mubr.f32.mxu1 %v18954_v45 }
 0x1a7   :  { %16089 = vmatmul.mubr.f32.gmra.mrb[14].mxu1 %v18958_v62 }
 0x1a8   :  { %16155 = vmatprep.mubr.f32.mxu1 %v18814_v48 }
 0x25e   :  { %v16069_v26 = vpop.f32.mrb[0].mxu1 }
 0x25f   :  { %v1043_v44 = vmul.f32 %v16069_v26, %v19047_v21  ;;  %v963_v20 = vpop.f32.mrb[1].mxu1 }
 0x260   :  { %v1042_v40 = vmul.f32 %v963_v20, %v19045_v22 }
 0x261   :  { %v1066_v43 = vadd.f32 %v19124_v35, %v1043_v44 }
 0x262   :  { %v1065_v16 = vadd.f32 %v19124_v35, %v1042_v40  ;;  %v16072_v11 = vpop.f32.mrb[2].mxu1 }
 0x263   :  { %v1045_v25 = vmul.f32 %v16072_v11, %v19053_v37  ;;  %v973_v10 = vpop.f32.mrb[3].mxu1  ;;  %v1082_v34 = vmax.f32 %v1066_v43, 0.0 }
 0x264   :  { %v1081_v48 = vmax.f32 %v1065_v16, 0.0  ;;  %v1044_v47 = vmul.f32 %v973_v10, %v19049_v17 }
 0x265   :  { %v1068_v46 = vadd.f32 %v19124_v35, %v1045_v25 }
 0x266   :  { %v1067_v13 = vadd.f32 %v19124_v35, %v1044_v47  ;;  %v16075_v28 = vpop.f32.mrb[4].mxu1  ;;  %16099 = vmatprep.mubr.msk.f32.mxu0 %vm1101_vm2, %v1081_v48 }
 0x267   :  { %v1047_v31 = vmul.f32 %v16075_v28, %v19059_v50  ;;  %v983_v30 = vpop.f32.mrb[5].mxu1  ;;  %16100 = vmatmul.mubr.msk.f32.vlgmr.msra.gmra.mrb[16].mxu0 %vm1101_vm2, %v1082_v34  ;;  %v1084_v19 = vmax.f32 %v1068_v46, 0.0 }
 0x268   :  { %v1083_v49 = vmax.f32 %v1067_v13, 0.0  ;;  %v1046_v32 = vmul.f32 %v983_v30, %v19057_v23 }
 0x269   :  { %v1070_v27 = vadd.f32 %v19124_v35, %v1047_v31 }
 0x26a   :  { %v1069_v26 = vadd.f32 %v19124_v35, %v1046_v32  ;;  %v16078_v44 = vpop.f32.mrb[6].mxu1  ;;  %16102 = vmatprep.mubr.msk.f32.mxu0 %vm1101_vm2, %v1083_v49 }
 0x26b   :  { %v1049_v20 = vmul.f32 %v16078_v44, %v19067_v33  ;;  %v993_v40 = vpop.f32.mrb[7].mxu1  ;;  %16103 = vmatmul.mubr.msk.f32.gmra.mrb[18].mxu0 %vm1101_vm2, %v1084_v19  ;;  %v1086_v11 = vmax.f32 %v1070_v27, 0.0 }
 0x26c   :  { %v1085_v43 = vmax.f32 %v1069_v26, 0.0  ;;  %v1048_v16 = vmul.f32 %v993_v40, %v19065_v14 }
 0x26d   :  { %v1072_v25 = vadd.f32 %v19124_v35, %v1049_v20 }
 0x26e   :  { %v1071_v10 = vadd.f32 %v19124_v35, %v1048_v16  ;;  %v16081_v48 = vpop.f32.mrb[8].mxu1  ;;  %16105 = vmatprep.mubr.msk.f32.mxu0 %vm1101_vm2, %v1085_v43 }
 0x26f   :  { %v1051_v47 = vmul.f32 %v16081_v48, %v19075_v29  ;;  %v1003_v34 = vpop.f32.mrb[9].mxu1  ;;  %16106 = vmatmul.mubr.msk.f32.gmra.mrb[20].mxu0 %vm1101_vm2, %v1086_v11  ;;  %v1088_v28 = vmax.f32 %v1072_v25, 0.0 }
 0x270   :  { %v1087_v46 = vmax.f32 %v1071_v10, 0.0  ;;  %v1050_v13 = vmul.f32 %v1003_v34, %v19073_v36 }
 0x271   :  { %v1074_v31 = vadd.f32 %v19124_v35, %v1051_v47 }
 0x272   :  { %v1073_v30 = vadd.f32 %v19124_v35, %v1050_v13  ;;  %v16084_v49 = vpop.f32.mrb[10].mxu1  ;;  %16108 = vmatprep.mubr.msk.f32.mxu0 %vm1101_vm2, %v1087_v46 }
 0x273   :  { %v1053_v32 = vmul.f32 %v16084_v49, %v19083_v57  ;;  %v1013_v19 = vpop.f32.mrb[11].mxu1  ;;  %16109 = vmatmul.mubr.msk.f32.gmra.mrb[22].mxu0 %vm1101_vm2, %v1088_v28  ;;  %v1090_v44 = vmax.f32 %v1074_v31, 0.0 }
 0x274   :  { %v1089_v27 = vmax.f32 %v1073_v30, 0.0  ;;  %v1052_v26 = vmul.f32 %v1013_v19, %v19081_v15 }
 0x275   :  { %v1076_v20 = vadd.f32 %v19124_v35, %v1053_v32 }
 0x276   :  { %v1075_v40 = vadd.f32 %v19124_v35, %v1052_v26  ;;  %v16087_v43 = vpop.f32.mrb[12].mxu1  ;;  %16111 = vmatprep.mubr.msk.f32.mxu0 %vm1101_vm2, %v1089_v27 }
 0x277   :  { %v1055_v16 = vmul.f32 %v16087_v43, %v19091_v38  ;;  %v1023_v11 = vpop.f32.mrb[13].mxu1  ;;  %16112 = vmatmul.mubr.msk.f32.gmra.mrb[24].mxu0 %vm1101_vm2, %v1090_v44  ;;  %v1092_v48 = vmax.f32 %v1076_v20, 0.0 }
 0x278   :  { %v1091_v25 = vmax.f32 %v1075_v40, 0.0  ;;  %v1054_v10 = vmul.f32 %v1023_v11, %v19089_v53 }
 0x279   :  { %v1078_v47 = vadd.f32 %v19124_v35, %v1055_v16 }
 0x27a   :  { %v1077_v34 = vadd.f32 %v19124_v35, %v1054_v10  ;;  %v16090_v46 = vpop.f32.mrb[14].mxu1  ;;  %16114 = vmatprep.mubr.msk.f32.mxu0 %vm1101_vm2, %v1091_v25 }
 0x27b   :  { %v1057_v13 = vmul.f32 %v16090_v46, %v19099_v24  ;;  %v1033_v28 = vpop.f32.mrb[15].mxu1  ;;  %16115 = vmatmul.mubr.msk.f32.gmra.mrb[26].mxu0 %vm1101_vm2, %v1092_v48  ;;  %v1094_v49 = vmax.f32 %v1078_v47, 0.0 }
 0x27c   :  { %v1093_v31 = vmax.f32 %v1077_v34, 0.0  ;;  %v1056_v30 = vmul.f32 %v1033_v28, %v19097_v18 }
 0x27d   :  { %v1080_v32 = vadd.f32 %v19124_v35, %v1057_v13 }
 0x27e   :  { %v1079_v19 = vadd.f32 %v19124_v35, %v1056_v30  ;;  %16117 = vmatprep.mubr.msk.f32.mxu0 %vm1101_vm2, %v1093_v31 }
 0x27f   :  { %16118 = vmatmul.mubr.msk.f32.gmra.mrb[28].mxu0 %vm1101_vm2, %v1094_v49  ;;  %v1096_v26 = vmax.f32 %v1080_v32, 0.0 }
 0x280   :  { %v1095_v27 = vmax.f32 %v1079_v19, 0.0 }
 0x282   :  { %16120 = vmatprep.mubr.msk.f32.mxu0 %vm1101_vm2, %v1095_v27 }
 0x283   :  { %16121 = vmatmul.mubr.msk.f32.gmra.mrb[30].mxu0 %vm1101_vm2, %v1096_v26 }
 0x33a   :  { %v16101_v44 = vpop.f32.mrb[16].mxu0 }
 0x33b   :  { %v1296_v20 = vmul.f32 %v16101_v44, %v19047_v21  ;;  %v1216_v40 = vpop.f32.mrb[17].mxu0 }
 0x33c   :  { %v1295_v43 = vmul.f32 %v1216_v40, %v19045_v22 }
 0x33e   :  { %v17267_v16 = vpack.c.bf16 %v1296_v20, %v1295_v43  ;;  %v16104_v11 = vpop.f32.mrb[18].mxu0 }
 0x33f   :  { %v1298_v35 = vmul.f32 %v16104_v11, %v19053_v37  ;;  %v1226_v25 = vpop.f32.mrb[19].mxu0 }
 0x340   :  { %v1297_v10 = vmul.f32 %v1226_v25, %v19049_v17  ;;  %17268 = vmatprep.subr.bf16.mxu1 %v17267_v16 }
 0x341   :  { %17270 = vmatpush3.bf16.msra.mxu1 %v17267_v16 }
 0x342   :  { %v17271_v48 = vpack.c.bf16 %v1298_v35, %v1297_v10  ;;  %v16107_v47 = vpop.f32.mrb[20].mxu0 }
 0x343   :  { %v1300_v34 = vmul.f32 %v16107_v47, %v19059_v50  ;;  %v1236_v46 = vpop.f32.mrb[21].mxu0 }
 0x344   :  { %v1299_v13 = vmul.f32 %v1236_v46, %v19057_v23  ;;  %17272 = vmatprep.subr.bf16.mxu1 %v17271_v48 }
 0x345   :  { %17274 = vmatpush3.bf16.msra.mxu1 %v17271_v48 }
 0x346   :  { %v17275_v28 = vpack.c.bf16 %v1300_v34, %v1299_v13  ;;  %v16110_v31 = vpop.f32.mrb[22].mxu0 }
 0x347   :  { %v1302_v30 = vmul.f32 %v16110_v31, %v19067_v33  ;;  %v1246_v49 = vpop.f32.mrb[23].mxu0 }
 0x348   :  { %v1301_v32 = vmul.f32 %v1246_v49, %v19065_v14  ;;  %17276 = vmatprep.subr.bf16.mxu1 %v17275_v28 }
 0x349   :  { %17278 = vmatpush3.bf16.msra.mxu1 %v17275_v28 }
 0x34a   :  { %v17279_v19 = vpack.c.bf16 %v1302_v30, %v1301_v32  ;;  %v16113_v27 = vpop.f32.mrb[24].mxu0 }
 0x34b   :  { %v1304_v26 = vmul.f32 %v16113_v27, %v19075_v29  ;;  %v1256_v44 = vpop.f32.mrb[25].mxu0 }
 0x34c   :  { %v1303_v20 = vmul.f32 %v1256_v44, %v19073_v36  ;;  %17280 = vmatprep.subr.bf16.mxu1 %v17279_v19 }
 0x34d   :  { %17282 = vmatpush3.bf16.msra.mxu1 %v17279_v19 }
 0x34e   :  { %v17283_v40 = vpack.c.bf16 %v1304_v26, %v1303_v20  ;;  %v16116_v43 = vpop.f32.mrb[26].mxu0 }
 0x34f   :  { %v1306_v16 = vmul.f32 %v16116_v43, %v19083_v57  ;;  %v1266_v11 = vpop.f32.mrb[27].mxu0 }
 0x350   :  { %v1305_v35 = vmul.f32 %v1266_v11, %v19081_v15  ;;  %17284 = vmatprep.subr.bf16.mxu1 %v17283_v40 }
 0x351   :  { %17286 = vmatpush3.bf16.msra.mxu1 %v17283_v40 }
 0x352   :  { %v17287_v25 = vpack.c.bf16 %v1306_v16, %v1305_v35  ;;  %v16119_v10 = vpop.f32.mrb[28].mxu0 }
 0x353   :  { %v1308_v48 = vmul.f32 %v16119_v10, %v19091_v38  ;;  %v1276_v47 = vpop.f32.mrb[29].mxu0 }
 0x354   :  { %v1307_v34 = vmul.f32 %v1276_v47, %v19089_v53  ;;  %17288 = vmatprep.subr.bf16.mxu1 %v17287_v25  ;;  %v1477_v47 = vld [vmem:[%s21692_s3 + $0x28] sm:$0xff] }
 0x355   :  { %17290 = vmatpush3.bf16.msra.mxu1 %v17287_v25 }
 0x356   :  { %v17291_v46 = vpack.c.bf16 %v1308_v48, %v1307_v34  ;;  %v16122_v13 = vpop.f32.mrb[30].mxu0  ;;  %v1478_v34 = vld [vmem:[%s21692_s3 + $0x30] sm:$0xff] }
 0x357   :  { %v1310_v28 = vmul.f32 %v16122_v13, %v19099_v24  ;;  %v1286_v31 = vpop.f32.mrb[31].mxu0  ;;  %v1480_v13 = vld [vmem:[%s21692_s3 + $0x40] sm:$0xff] }
 0x358   :  { %v1309_v30 = vmul.f32 %v1286_v31, %v19097_v18  ;;  %17292 = vmatprep.subr.bf16.mxu1 %v17291_v46  ;;  %v1482_v31 = vld [vmem:[%s21692_s3 + $0x50] sm:$0xff] }
 0x359   :  { %17294 = vmatpush3.bf16.msra.mxu1 %v17291_v46  ;;  %v1479_v46 = vld [vmem:[%s21692_s3 + $0x38] sm:$0xff] }
 0x35a   :  { %v17295_v49 = vpack.c.bf16 %v1310_v28, %v1309_v30  ;;  %v1481_v28 = vld [vmem:[%s21692_s3 + $0x48] sm:$0xff]  ;;  %v1483_v30 = vld [vmem:[%s21692_s3 + $0x58] sm:$0xff] }
 0x35c   :  { %17296 = vmatprep.subr.bf16.mxu1 %v17295_v49 }
 0x35d   :  { %17298 = vmatpush3.bf16.msra.mxu1 %v17295_v49  ;;  %v1484_v49 = vld [vmem:[%s21692_s3 + $0x60] sm:$0xff] }
 0x360   :  { %16156 = vmatmul.mubr.f32.vlgmr.msra.gmra.mrb[16].mxu1 %v18842_v41  ;;  %v1472_v41 = vld [vmem:[%s21692_s3] sm:$0xff] }
 0x361   :  { %16158 = vmatprep.mubr.f32.mxu1 %v18838_v61  ;;  %16211 = vmatprep.mubr.f32.mxu0 %v1472_v41  ;;  %v1485_v41 = vld [vmem:[%s21692_s3 + $0x68] sm:$0xff] }
 0x364   :  { %16159 = vmatmul.mubr.f32.gmra.mrb[18].mxu1 %v18852_v63 }
 0x365   :  { %16161 = vmatprep.mubr.f32.mxu1 %v18854_v55 }
 0x368   :  { %16162 = vmatmul.mubr.f32.gmra.mrb[20].mxu1 %v18878_v58 }
 0x369   :  { %16164 = vmatprep.mubr.f32.mxu1 %v18882_v52 }
 0x36c   :  { %16165 = vmatmul.mubr.f32.gmra.mrb[22].mxu1 %v18892_v59 }
 0x36d   :  { %16167 = vmatprep.mubr.f32.mxu1 %v18894_v60 }
 0x370   :  { %16168 = vmatmul.mubr.f32.gmra.mrb[24].mxu1 %v18918_v42 }
 0x371   :  { %16170 = vmatprep.mubr.f32.mxu1 %v18922_v51 }
 0x374   :  { %16171 = vmatmul.mubr.f32.gmra.mrb[26].mxu1 %v18932_v56 }
 0x375   :  { %16173 = vmatprep.mubr.f32.mxu1 %v18934_v39 }
 0x378   :  { %16174 = vmatmul.mubr.f32.gmra.mrb[28].mxu1 %v18952_v54 }
 0x379   :  { %16176 = vmatprep.mubr.f32.mxu1 %v18954_v45 }
 0x37c   :  { %16177 = vmatmul.mubr.f32.gmra.mrb[30].mxu1 %v18958_v62 }
 0x433   :  { %v16157_v61 = vpop.f32.mrb[16].mxu1 }
 0x434   :  { %v1457_v63 = vmul.f32 %v16157_v61, %v19047_v21  ;;  %v1377_v55 = vpop.f32.mrb[17].mxu1  ;;  %v1486_v61 = vld [vmem:[%s21692_s3 + $0x70] sm:$0xff] }
 0x435   :  { %v1456_v58 = vmul.f32 %v1377_v55, %v19045_v22  ;;  %v1659_v55 = vpop.permute.xlu1 %1658 }
 0x437   :  { %v17299_v52 = vpack.c.bf16 %v1457_v63, %v1456_v58  ;;  %v16160_v59 = vpop.f32.mrb[18].mxu1  ;;  %v1487_v63 = vld [vmem:[%s21692_s3 + $0x78] sm:$0xff] }
 0x438   :  { %v1459_v60 = vmul.f32 %v16160_v59, %v19053_v37  ;;  %v1387_v42 = vpop.f32.mrb[19].mxu1  ;;  %v1664_v59 = vpop.permute.xlu0 %1663 }
 0x439   :  { %v1458_v51 = vmul.f32 %v1387_v42, %v19049_v17  ;;  %17300 = vmatprep.subr.bf16.mxu0 %v17299_v52  ;;  %v1669_v58 = vpop.permute.xlu1 %1668 }
 0x43a   :  { %17302 = vmatpush3.bf16.msra.mxu0 %v17299_v52 }
 0x43b   :  { %v17303_v56 = vpack.c.bf16 %v1459_v60, %v1458_v51  ;;  %v16163_v39 = vpop.f32.mrb[20].mxu1  ;;  %v15194_v60 = vld [vmem:[%s21699_s10] ss:$0 sm:$0xff] }
 0x43c   :  { %v1461_v54 = vmul.f32 %v16163_v39, %v19059_v50  ;;  %v1397_v45 = vpop.f32.mrb[21].mxu1 }
 0x43d   :  { %v1460_v62 = vmul.f32 %v1397_v45, %v19057_v23  ;;  %17304 = vmatprep.subr.bf16.mxu0 %v17303_v56  ;;  %v1674_v52 = vpop.permute.xlu1 %1673 }
 0x43e   :  { %17306 = vmatpush3.bf16.msra.mxu0 %v17303_v56  ;;  %v1679_v56 = vpop.permute.xlu0 %1678 }
 0x43f   :  { %v17307_v21 = vpack.c.bf16 %v1461_v54, %v1460_v62  ;;  %v16166_v22 = vpop.f32.mrb[22].mxu1 }
 0x440   :  { %v1463_v32 = vmul.f32 %v16166_v22, %v19067_v33  ;;  %v1407_v19 = vpop.f32.mrb[23].mxu1 }
 0x441   :  { %v1462_v37 = vmul.f32 %v1407_v19, %v19065_v14  ;;  %17308 = vmatprep.subr.bf16.mxu0 %v17307_v21  ;;  %v1684_v42 = vpop.permute.xlu1 %1683 }
 0x442   :  { %17310 = vmatpush3.bf16.msra.mxu0 %v17307_v21 }
 0x443   :  { %v17311_v17 = vpack.c.bf16 %v1463_v32, %v1462_v37  ;;  %v16169_v27 = vpop.f32.mrb[24].mxu1 }
 0x444   :  { %v1465_v26 = vmul.f32 %v16169_v27, %v19075_v29  ;;  %v1417_v44 = vpop.f32.mrb[25].mxu1  ;;  %v1689_v27 = vpop.permute.xlu0 %1688 }
 0x445   :  { %v1464_v50 = vmul.f32 %v1417_v44, %v19073_v36  ;;  %17312 = vmatprep.subr.bf16.mxu0 %v17311_v17  ;;  %v1694_v37 = vpop.permute.xlu1 %1693 }
 0x446   :  { %17314 = vmatpush3.bf16.msra.mxu0 %v17311_v17 }
 0x447   :  { %v17315_v23 = vpack.c.bf16 %v1465_v26, %v1464_v50  ;;  %v16172_v20 = vpop.f32.mrb[26].mxu1 }
 0x448   :  { %v1467_v40 = vmul.f32 %v16172_v20, %v19083_v57  ;;  %v1427_v43 = vpop.f32.mrb[27].mxu1 }
 0x449   :  { %v1466_v33 = vmul.f32 %v1427_v43, %v19081_v15  ;;  %17316 = vmatprep.subr.bf16.mxu0 %v17315_v23 }
 0x44a   :  { %17318 = vmatpush3.bf16.msra.mxu0 %v17315_v23 }
 0x44b   :  { %v17319_v14 = vpack.c.bf16 %v1467_v40, %v1466_v33  ;;  %v16175_v16 = vpop.f32.mrb[28].mxu1  ;;  %v1704_v33 = vpop.permute.xlu1 %1703 }
 0x44c   :  { %v1469_v11 = vmul.f32 %v16175_v16, %v19091_v38  ;;  %v1437_v35 = vpop.f32.mrb[29].mxu1  ;;  %v1473_v38 = vld [vmem:[%s21692_s3 + $0x8] sm:$0xff] }
 0x44d   :  { %v1468_v29 = vmul.f32 %v1437_v35, %v19089_v53  ;;  %17320 = vmatprep.subr.bf16.mxu0 %v17319_v14  ;;  %v1474_v53 = vld [vmem:[%s21692_s3 + $0x10] sm:$0xff] }
 0x44e   :  { %17322 = vmatpush3.bf16.msra.mxu0 %v17319_v14 }
 0x44f   :  { %v17323_v36 = vpack.c.bf16 %v1469_v11, %v1468_v29  ;;  %v16178_v25 = vpop.f32.mrb[30].mxu1  ;;  %v1699_v11 = vpop.permute.xlu0 %1698 }
 0x450   :  { %v1471_v10 = vmul.f32 %v16178_v25, %v19099_v24  ;;  %v1447_v48 = vpop.f32.mrb[31].mxu1  ;;  %v1475_v24 = vld [vmem:[%s21692_s3 + $0x18] sm:$0xff] }
 0x451   :  { %v1470_v57 = vmul.f32 %v1447_v48, %v19097_v18  ;;  %17324 = vmatprep.subr.bf16.mxu0 %v17323_v36  ;;  %v1476_v18 = vld [vmem:[%s21692_s3 + $0x20] sm:$0xff] }
 0x452   :  { %17326 = vmatpush3.bf16.msra.mxu0 %v17323_v36 }
 0x453   :  { %v17327_v15 = vpack.c.bf16 %v1471_v10, %v1470_v57 }
 0x455   :  { %17328 = vmatprep.subr.bf16.mxu0 %v17327_v15 }
 0x456   :  { %17330 = vmatpush3.bf16.msra.mxu0 %v17327_v15 }
 0x459   :  { %16212 = vmatmul.mubr.f32.vlgmr.msra.gmra.mrb[32].mxu0 %v1473_v38  ;;  %v1714_v38 = vpop.permute.xlu1 %1713 }
 0x45a   :  { %16214 = vmatprep.mubr.f32.mxu0 %v1474_v53 }
 0x45d   :  { %16215 = vmatmul.mubr.f32.gmra.mrb[34].mxu0 %v1475_v24  ;;  %v1709_v24 = vpop.permute.xlu0 %1708 }
 0x45e   :  { %16217 = vmatprep.mubr.f32.mxu0 %v1476_v18 }
 0x461   :  { %16218 = vmatmul.mubr.f32.gmra.mrb[36].mxu0 %v1477_v47 }
 0x462   :  { %16220 = vmatprep.mubr.f32.mxu0 %v1478_v34 }
 0x465   :  { %16221 = vmatmul.mubr.f32.gmra.mrb[38].mxu0 %v1479_v46 }
 0x466   :  { %16223 = vmatprep.mubr.f32.mxu0 %v1480_v13 }
 0x469   :  { %16224 = vmatmul.mubr.f32.gmra.mrb[40].mxu0 %v1481_v28 }
 0x46a   :  { %16226 = vmatprep.mubr.f32.mxu0 %v1482_v31 }
 0x46d   :  { %16227 = vmatmul.mubr.f32.gmra.mrb[42].mxu0 %v1483_v30  ;;  %v1724_v30 = vpop.permute.xlu1 %1723 }
 0x46e   :  { %16229 = vmatprep.mubr.f32.mxu0 %v1484_v49 }
 0x471   :  { %16230 = vmatmul.mubr.f32.gmra.mrb[44].mxu0 %v1485_v41 }
 0x472   :  { %16232 = vmatprep.mubr.f32.mxu0 %v1486_v61  ;;  %v1719_v61 = vpop.permute.xlu0 %1718 }
 0x475   :  { %16233 = vmatmul.mubr.f32.gmra.mrb[46].mxu0 %v1487_v63 }
 0x52c   :  { %v16213_v51 = vpop.f32.mrb[32].mxu0 }
 0x52d   :  { %v1567_v39 = vadd.f32 %v16213_v51, %v15194_v60  ;;  %v1561_v54 = vpop.f32.mrb[33].mxu0 }
 0x52e   :  { %v1562_v45 = vadd.f32 %v15194_v60, %v1561_v54 }
 0x52f   :  { %v19272_v62 = vmul.f32 %v1664_v59, %v1567_v39  ;;  %v1734_v39 = vpop.permute.xlu1 %1733 }
 0x530   :  { %v19274_v21 = vmul.f32 %v1659_v55, %v1562_v45  ;;  %v16216_v22 = vpop.f32.mrb[34].mxu0  ;;  %v1729_v45 = vpop.permute.xlu0 %1728 }
 0x531   :  { %v1577_v32 = vadd.f32 %v16216_v22, %v15194_v60  ;;  %v1571_v19 = vpop.f32.mrb[35].mxu0 }
 0x532   :  { %v1572_v17 = vadd.f32 %v15194_v60, %v1571_v19  ;;  %v17332_v19 = vpack.c.bf16 %v18048_v1, %v18043_v0 }
 0x533   :  { %v19276_v26 = vmul.f32 %v1674_v52, %v1577_v32 }
 0x534   :  { %v19278_v44 = vmul.f32 %v1669_v58, %v1572_v17  ;;  %v16219_v50 = vpop.f32.mrb[36].mxu0 }
 0x535   :  { %v1587_v23 = vadd.f32 %v16219_v50, %v15194_v60  ;;  %v1581_v20 = vpop.f32.mrb[37].mxu0 }
 0x536   :  { %v1582_v40 = vadd.f32 %v15194_v60, %v1581_v20 }
 0x537   :  { %v19280_v43 = vmul.f32 %v1684_v42, %v1587_v23 }
 0x538   :  { %v19282_v14 = vmul.f32 %v1679_v56, %v1582_v40  ;;  %v16222_v16 = vpop.f32.mrb[38].mxu0 }
 0x539   :  { %v1597_v35 = vadd.f32 %v16222_v16, %v15194_v60  ;;  %v1591_v29 = vpop.f32.mrb[39].mxu0 }
 0x53a   :  { %v1592_v36 = vadd.f32 %v15194_v60, %v1591_v29 }
 0x53b   :  { %v19284_v25 = vmul.f32 %v1694_v37, %v1597_v35  ;;  %v17338_v37 = vpack.c.bf16 %v18068_v5, %v18063_v4 }
 0x53c   :  { %v19286_v10 = vmul.f32 %v1689_v27, %v1592_v36  ;;  %v16225_v48 = vpop.f32.mrb[40].mxu0 }
 0x53d   :  { %v1607_v57 = vadd.f32 %v16225_v48, %v15194_v60  ;;  %v1601_v15 = vpop.f32.mrb[41].mxu0 }
 0x53e   :  { %v1602_v53 = vadd.f32 %v15194_v60, %v1601_v15 }
 0x53f   :  { %v19288_v18 = vmul.f32 %v1704_v33, %v1607_v57 }
 0x540   :  { %v19290_v47 = vmul.f32 %v1699_v11, %v1602_v53  ;;  %v16228_v34 = vpop.f32.mrb[42].mxu0 }
 0x541   :  { %v1617_v46 = vadd.f32 %v16228_v34, %v15194_v60  ;;  %v1611_v13 = vpop.f32.mrb[43].mxu0 }
 0x542   :  { %v1612_v28 = vadd.f32 %v15194_v60, %v1611_v13 }
 0x543   :  { %v19292_v31 = vmul.f32 %v1714_v38, %v1617_v46 }
 0x544   :  { %v19294_v49 = vmul.f32 %v1709_v24, %v1612_v28  ;;  %v16231_v41 = vpop.f32.mrb[44].mxu0 }
 0x545   :  { %v1627_v63 = vadd.f32 %v16231_v41, %v15194_v60  ;;  %v1621_v55 = vpop.f32.mrb[45].mxu0 }
 0x546   :  { %v1622_v58 = vadd.f32 %v15194_v60, %v1621_v55 }
 0x547   :  { %v19296_v52 = vmul.f32 %v1724_v30, %v1627_v63 }
 0x548   :  { %v19298_v59 = vmul.f32 %v1719_v61, %v1622_v58  ;;  %v16234_v42 = vpop.f32.mrb[46].mxu0 }
 0x549   :  { %v1637_v51 = vadd.f32 %v16234_v42, %v15194_v60  ;;  %v1631_v56 = vpop.f32.mrb[47].mxu0 }
 0x54a   :  { %v1632_v54 = vadd.f32 %v15194_v60, %v1631_v56 }
 0x54b   :  { %v19300_v22 = vmul.f32 %v1734_v39, %v1637_v51 }
 0x54c   :  { %v19302_v32 = vmul.f32 %v1729_v45, %v1632_v54 }
 0x54d   :  { %17940 = dma.done.wait [#allocation4], 8192 }
 0x54e   :  { %17941 = vsyncadd [#allocation4], 4294959104  ;;  %v21707_v17 = vmov 0.0|0.0   ;;  %v17335_v60 = vpack.c.bf16 %v18058_v3, %v18053_v2  ;;  %v17341_v27 = vpack.c.bf16 %v18078_v7, %v18073_v6  ;;  %vm17948_vm3 = vmmov 0   ;;  %v21886_v2 = vld [vmem:[#allocation14_spill] sm:$0xff]  ;;  %v21887_v4 = vld [vmem:[#allocation12_spill] sm:$0xff] }
 0x54f   :  { %17331 = vmatprep.subr.bf16.mxu1 %v21707_v17  ;;  %17337 = vmatprep.subr.bf16.mxu0 %v21707_v17  ;;  %v21709_v0 = vmov 0.0   ;;  %v17344_v1 = vpack.c.bf16 %v18088_v9, %v18083_v8  ;;  %v17350_v3 = vpack.c.bf16 %v21886_v2, %v18103_v12  ;;  %v21888_v5 = vld [vmem:[#allocation13_spill] sm:$0xff]  ;;  %v21889_v7 = vld [vmem:[#allocation15_spill] sm:$0xff]  ;;  %v21890_v8 = vld [vmem:[#allocation16_spill] sm:$0xff]  ;;  %s17950_s19 = smov 96   ;;  %vm4387_vm4 = vcmask 64512  }
 0x550   :  { %17333 = vmatpush3.bf16.msra.mxu1 %v17332_v19  ;;  %17339 = vmatpush3.bf16.msra.mxu0 %v17338_v37  ;;  %v17347_v6 = vpack.c.bf16 %v21888_v5, %v21887_v4  ;;  %v17353_v9 = vpack.c.bf16 %v21890_v8, %v21889_v7  ;;  %v21891_v12 = vld [vmem:[#allocation17_spill] sm:$0xff]  ;;  %v21894_v23 = vld [vmem:[#allocation22_spill] sm:$0xff]  ;;  %v21895_v40 = vld [vmem:[#allocation19_spill] sm:$0xff] }
 0x551   :  { %17334 = vmatprep.subr.bf16.mxu1 %v21707_v17  ;;  %17340 = vmatprep.subr.bf16.mxu0 %v21707_v17  ;;  %v21893_v50 = vld [vmem:[#allocation21_spill] sm:$0xff]  ;;  %v21896_v33 = vld [vmem:[#allocation20_spill] sm:$0xff]  ;;  %v21897_v11 = vld [vmem:[#allocation23_spill] sm:$0xff] }
 0x552   :  { %16243 = vmatprep.mubr.msk.f32.mxu1 %vm17948_vm3, %v21709_v0  ;;  %16254 = vmatprep.mubr.msk.f32.mxu0 %vm17948_vm3, %v21709_v0  ;;  %v17362_v20 = vpack.c.bf16 %v21894_v23, %v21893_v50  ;;  %v17359_v16 = vpack.c.bf16 %v21896_v33, %v21895_v40  ;;  %v21898_v35 = vld [vmem:[#allocation24_spill] sm:$0xff]  ;;  %v21901_v48 = vld [vmem:[#allocation29_spill] sm:$0xff]  ;;  %v21902_v57 = vld [vmem:[#allocation30_spill] sm:$0xff] }
 0x553   :  { %v17365_v29 = vpack.c.bf16 %v21898_v35, %v21897_v11  ;;  %v17374_v15 = vpack.c.bf16 %v21902_v57, %v21901_v48  ;;  %v21903_v38 = vld [vmem:[#allocation27_spill] sm:$0xff]  ;;  %v21904_v53 = vld [vmem:[#allocation28_spill] sm:$0xff]  ;;  %v21909_v30 = vld [vmem:[#allocation37_spill] sm:$0xff] }
 0x554   :  { %17336 = vmatpush3.bf16.msra.mxu1 %v17335_v60  ;;  %17342 = vmatpush3.bf16.msra.mxu0 %v17341_v27  ;;  %v17371_v24 = vpack.c.bf16 %v21904_v53, %v21903_v38  ;;  %v21905_v34 = vld [vmem:[#allocation31_spill] sm:$0xff]  ;;  %v21906_v46 = vld [vmem:[#allocation32_spill] sm:$0xff]  ;;  %v21910_v41 = vld [vmem:[#allocation38_spill] sm:$0xff] }
 0x555   :  { %17343 = vmatprep.subr.bf16.mxu1 %v21707_v17  ;;  %17349 = vmatprep.subr.bf16.mxu0 %v21707_v17  ;;  %v17377_v13 = vpack.c.bf16 %v21906_v46, %v21905_v34  ;;  %v17386_v61 = vpack.c.bf16 %v21910_v41, %v21909_v30  ;;  %v21911_v63 = vld [vmem:[#allocation35_spill] sm:$0xff]  ;;  %v21912_v55 = vld [vmem:[#allocation36_spill] sm:$0xff]  ;;  %v21917_v54 = vld [vmem:[#allocation45_spill] sm:$0xff] }
 0x556   :  { %v17383_v58 = vpack.c.bf16 %v21912_v55, %v21911_v63  ;;  %v21913_v42 = vld [vmem:[#allocation39_spill] sm:$0xff]  ;;  %v21914_v51 = vld [vmem:[#allocation40_spill] sm:$0xff]  ;;  %v21918_v45 = vld [vmem:[#allocation46_spill] sm:$0xff] }
 0x557   :  { %16244 = vmatmul.mubr.msk.f32.vlgmr.msra.gmra.mrb[32].mxu1 %vm1101_vm2, %v19274_v21  ;;  %16255 = vmatmul.mubr.msk.f32.vlgmr.msra.gmra.mrb[48].mxu0 %vm1101_vm2, %v19272_v62  ;;  %v21892_v62 = vld [vmem:[#allocation18_spill] sm:$0xff]  ;;  %v17389_v56 = vpack.c.bf16 %v21914_v51, %v21913_v42  ;;  %v17398_v19 = vpack.c.bf16 %v21918_v45, %v21917_v54  ;;  %v21919_v37 = vld [vmem:[#allocation43_spill] sm:$0xff]  ;;  %v21920_v60 = vld [vmem:[#allocation44_spill] sm:$0xff] }
 0x558   :  { %17345 = vmatpush3.bf16.msra.mxu1 %v17344_v1  ;;  %17351 = vmatpush3.bf16.msra.mxu0 %v17350_v3  ;;  %v17356_v21 = vpack.c.bf16 %v21892_v62, %v21891_v12  ;;  %v17395_v27 = vpack.c.bf16 %v21920_v60, %v21919_v37  ;;  %v21921_v1 = vld [vmem:[#allocation47_spill] sm:$0xff]  ;;  %v21922_v2 = vld [vmem:[#allocation48_spill] sm:$0xff]  ;;  %v21925_v5 = vld [vmem:[#allocation53_spill] sm:$0xff] }
 0x559   :  { %17346 = vmatprep.subr.bf16.mxu1 %v21707_v17  ;;  %17352 = vmatprep.subr.bf16.mxu0 %v21707_v17  ;;  %v17401_v3 = vpack.c.bf16 %v21922_v2, %v21921_v1  ;;  %v21927_v8 = vld [vmem:[#allocation51_spill] sm:$0xff]  ;;  %v21934_v40 = vld [vmem:[#allocation62_spill] sm:$0xff]  ;;  %v21936_v11 = vld [vmem:[#allocation60_spill] sm:$0xff] }
 0x55a   :  { %16265 = vmatprep.mubr.msk.f32.mxu1 %vm17948_vm3, %v21709_v0  ;;  %16276 = vmatprep.mubr.msk.f32.mxu0 %vm17948_vm3, %v21709_v0  ;;  %v21929_v62 = vld [vmem:[#allocation55_spill] sm:$0xff]  ;;  %v15197_v38 = vld [vmem:[%s21700_s11 + $0x2] ss:$0 sm:$0xff]  ;;  %v15200_v30 = vld [vmem:[%s21700_s11 + $0x5] ss:$0 sm:$0xff] }
 0x55b   :  { %v15201_v51 = vld [vmem:[%s21700_s11 + $0x6] ss:$0 sm:$0xff]  ;;  %v15203_v37 = vld [vmem:[%s21700_s11 + $0x8] ss:$0 sm:$0xff]  ;;  %v15204_v60 = vld [vmem:[%s21700_s11 + $0x9] ss:$0 sm:$0xff] }
 0x55c   :  { %17348 = vmatpush3.bf16.msra.mxu1 %v17347_v6  ;;  %17354 = vmatpush3.bf16.msra.mxu0 %v17353_v9  ;;  %v21926_v6 = vld [vmem:[#allocation54_spill] sm:$0xff]  ;;  %v21928_v9 = vld [vmem:[#allocation52_spill] sm:$0xff] }
 0x55d   :  { %17355 = vmatprep.subr.bf16.mxu1 %v21707_v17  ;;  %17361 = vmatprep.subr.bf16.mxu0 %v21707_v17  ;;  %v17410_v7 = vpack.c.bf16 %v21926_v6, %v21925_v5  ;;  %v17407_v12 = vpack.c.bf16 %v21928_v9, %v21927_v8  ;;  %v15206_v5 = vld [vmem:[%s21700_s11 + $0xb] ss:$0 sm:$0xff] }
 0x55f   :  { %16266 = vmatmul.mubr.msk.f32.vlgmr.msra.gmra.mrb[34].mxu1 %vm1101_vm2, %v19278_v44  ;;  %16277 = vmatmul.mubr.msk.f32.vlgmr.msra.gmra.mrb[50].mxu0 %vm1101_vm2, %v19276_v26  ;;  %v21899_v26 = vld [vmem:[#allocation25_spill] sm:$0xff]  ;;  %v21900_v44 = vld [vmem:[#allocation26_spill] sm:$0xff] }
 0x560   :  { %17357 = vmatpush3.bf16.msra.mxu1 %v17356_v21  ;;  %17363 = vmatpush3.bf16.msra.mxu0 %v17362_v20  ;;  %v17368_v36 = vpack.c.bf16 %v21900_v44, %v21899_v26  ;;  %v21930_v21 = vld [vmem:[#allocation56_spill] sm:$0xff]  ;;  %v21933_v20 = vld [vmem:[#allocation61_spill] sm:$0xff] }
 0x561   :  { %17358 = vmatprep.subr.bf16.mxu1 %v21707_v17  ;;  %17364 = vmatprep.subr.bf16.mxu0 %v21707_v17  ;;  %v17413_v50 = vpack.c.bf16 %v21930_v21, %v21929_v62  ;;  %v17422_v33 = vpack.c.bf16 %v21934_v40, %v21933_v20  ;;  %v21938_v26 = vld [vmem:[#allocation64_spill] sm:$0xff]  ;;  %v15207_v21 = vld [vmem:[%s21700_s11 + $0xc] ss:$0 sm:$0xff] }
 0x562   :  { %16287 = vmatprep.mubr.msk.f32.mxu1 %vm17948_vm3, %v21709_v0  ;;  %16298 = vmatprep.mubr.msk.f32.mxu0 %vm17948_vm3, %v21709_v0 }
 0x564   :  { %17360 = vmatpush3.bf16.msra.mxu1 %v17359_v16  ;;  %17366 = vmatpush3.bf16.msra.mxu0 %v17365_v29  ;;  %v21935_v16 = vld [vmem:[#allocation59_spill] sm:$0xff] }
 0x565   :  { %17367 = vmatprep.subr.bf16.mxu1 %v21707_v17  ;;  %17373 = vmatprep.subr.bf16.mxu0 %v21707_v17  ;;  %v17419_v35 = vpack.c.bf16 %v21936_v11, %v21935_v16  ;;  %v21937_v29 = vld [vmem:[#allocation63_spill] sm:$0xff]  ;;  %v15209_v16 = vld [vmem:[%s21700_s11 + $0xe] ss:$0 sm:$0xff]  ;;  %v15210_v11 = vld [vmem:[%s21700_s11 + $0xf] ss:$0 sm:$0xff] }
 0x566   :  { %v17425_v44 = vpack.c.bf16 %v21938_v26, %v21937_v29 }
 0x567   :  { %16288 = vmatmul.mubr.msk.f32.vlgmr.msra.gmra.mrb[36].mxu1 %vm1101_vm2, %v19282_v14  ;;  %16299 = vmatmul.mubr.msk.f32.vlgmr.msra.gmra.mrb[52].mxu0 %vm1101_vm2, %v19280_v43  ;;  %v21907_v43 = vld [vmem:[#allocation33_spill] sm:$0xff]  ;;  %v21908_v14 = vld [vmem:[#allocation34_spill] sm:$0xff] }
 0x568   :  { %17369 = vmatpush3.bf16.msra.mxu1 %v17368_v36  ;;  %17375 = vmatpush3.bf16.msra.mxu0 %v17374_v15  ;;  %v17380_v28 = vpack.c.bf16 %v21908_v14, %v21907_v43  ;;  %v15198_v43 = vld [vmem:[%s21700_s11 + $0x3] ss:$0 sm:$0xff] }
 0x569   :  { %17370 = vmatprep.subr.bf16.mxu1 %v21707_v17  ;;  %17376 = vmatprep.subr.bf16.mxu0 %v21707_v17 }
 0x56a   :  { %16309 = vmatprep.mubr.msk.f32.mxu1 %vm17948_vm3, %v21709_v0  ;;  %16320 = vmatprep.mubr.msk.f32.mxu0 %vm17948_vm3, %v21709_v0 }
 0x56c   :  { %17372 = vmatpush3.bf16.msra.mxu1 %v17371_v24  ;;  %17378 = vmatpush3.bf16.msra.mxu0 %v17377_v13 }
 0x56d   :  { %17379 = vmatprep.subr.bf16.mxu1 %v21707_v17  ;;  %17385 = vmatprep.subr.bf16.mxu0 %v21707_v17 }
 0x56f   :  { %16310 = vmatmul.mubr.msk.f32.vlgmr.msra.gmra.mrb[38].mxu1 %vm1101_vm2, %v19286_v10  ;;  %16321 = vmatmul.mubr.msk.f32.vlgmr.msra.gmra.mrb[54].mxu0 %vm1101_vm2, %v19284_v25  ;;  %v21915_v25 = vld [vmem:[#allocation41_spill] sm:$0xff]  ;;  %v21916_v10 = vld [vmem:[#allocation42_spill] sm:$0xff] }
 0x570   :  { %17381 = vmatpush3.bf16.msra.mxu1 %v17380_v28  ;;  %17387 = vmatpush3.bf16.msra.mxu0 %v17386_v61  ;;  %v17392_v39 = vpack.c.bf16 %v21916_v10, %v21915_v25  ;;  %v15199_v28 = vld [vmem:[%s21700_s11 + $0x4] ss:$0 sm:$0xff] }
 0x571   :  { %17382 = vmatprep.subr.bf16.mxu1 %v21707_v17  ;;  %17388 = vmatprep.subr.bf16.mxu0 %v21707_v17 }
 0x572   :  { %16331 = vmatprep.mubr.msk.f32.mxu1 %vm17948_vm3, %v21709_v0  ;;  %16342 = vmatprep.mubr.msk.f32.mxu0 %vm17948_vm3, %v21709_v0 }
 0x574   :  { %17384 = vmatpush3.bf16.msra.mxu1 %v17383_v58  ;;  %17390 = vmatpush3.bf16.msra.mxu0 %v17389_v56  ;;  %v15202_v56 = vld [vmem:[%s21700_s11 + $0x7] ss:$0 sm:$0xff] }
 0x575   :  { %17391 = vmatprep.subr.bf16.mxu1 %v21707_v17  ;;  %17397 = vmatprep.subr.bf16.mxu0 %v21707_v17 }
 0x577   :  { %16332 = vmatmul.mubr.msk.f32.vlgmr.msra.gmra.mrb[40].mxu1 %vm1101_vm2, %v19290_v47  ;;  %16343 = vmatmul.mubr.msk.f32.vlgmr.msra.gmra.mrb[56].mxu0 %vm1101_vm2, %v19288_v18  ;;  %v21923_v18 = vld [vmem:[#allocation49_spill] sm:$0xff]  ;;  %v21924_v47 = vld [vmem:[#allocation50_spill] sm:$0xff] }
 0x578   :  { %17393 = vmatpush3.bf16.msra.mxu1 %v17392_v39  ;;  %17399 = vmatpush3.bf16.msra.mxu0 %v17398_v19  ;;  %v17404_v4 = vpack.c.bf16 %v21924_v47, %v21923_v18 }
 0x579   :  { %17394 = vmatprep.subr.bf16.mxu1 %v21707_v17  ;;  %17400 = vmatprep.subr.bf16.mxu0 %v21707_v17 }
 0x57a   :  { %16353 = vmatprep.mubr.msk.f32.mxu1 %vm17948_vm3, %v21709_v0  ;;  %16364 = vmatprep.mubr.msk.f32.mxu0 %vm17948_vm3, %v21709_v0 }
 0x57c   :  { %17396 = vmatpush3.bf16.msra.mxu1 %v17395_v27  ;;  %17402 = vmatpush3.bf16.msra.mxu0 %v17401_v3 }
 0x57d   :  { %17403 = vmatprep.subr.bf16.mxu1 %v21707_v17  ;;  %17409 = vmatprep.subr.bf16.mxu0 %v21707_v17 }
 0x57f   :  { %16354 = vmatmul.mubr.msk.f32.vlgmr.msra.gmra.mrb[42].mxu1 %vm1101_vm2, %v19294_v49  ;;  %16365 = vmatmul.mubr.msk.f32.vlgmr.msra.gmra.mrb[58].mxu0 %vm1101_vm2, %v19292_v31  ;;  %v21931_v31 = vld [vmem:[#allocation57_spill] sm:$0xff]  ;;  %v21932_v49 = vld [vmem:[#allocation58_spill] sm:$0xff] }
 0x580   :  { %17405 = vmatpush3.bf16.msra.mxu1 %v17404_v4  ;;  %17411 = vmatpush3.bf16.msra.mxu0 %v17410_v7  ;;  %v17416_v23 = vpack.c.bf16 %v21932_v49, %v21931_v31  ;;  %v15205_v4 = vld [vmem:[%s21700_s11 + $0xa] ss:$0 sm:$0xff] }
 0x581   :  { %17406 = vmatprep.subr.bf16.mxu1 %v21707_v17  ;;  %17412 = vmatprep.subr.bf16.mxu0 %v21707_v17 }
 0x582   :  { %16375 = vmatprep.mubr.msk.f32.mxu1 %vm17948_vm3, %v21709_v0  ;;  %16386 = vmatprep.mubr.msk.f32.mxu0 %vm17948_vm3, %v21709_v0 }
 0x584   :  { %17408 = vmatpush3.bf16.msra.mxu1 %v17407_v12  ;;  %17414 = vmatpush3.bf16.msra.mxu0 %v17413_v50  ;;  %v15208_v50 = vld [vmem:[%s21700_s11 + $0xd] ss:$0 sm:$0xff] }
 0x585   :  { %17415 = vmatprep.subr.bf16.mxu1 %v21707_v17  ;;  %17421 = vmatprep.subr.bf16.mxu0 %v21707_v17 }
 0x587   :  { %16376 = vmatmul.mubr.msk.f32.vlgmr.msra.gmra.mrb[44].mxu1 %vm1101_vm2, %v19298_v59  ;;  %16387 = vmatmul.mubr.msk.f32.vlgmr.msra.gmra.mrb[60].mxu0 %vm1101_vm2, %v19296_v52  ;;  %v15195_v52 = vld [vmem:[%s21700_s11] ss:$0 sm:$0xff] }
 0x588   :  { %17417 = vmatpush3.bf16.msra.mxu1 %v17416_v23  ;;  %17423 = vmatpush3.bf16.msra.mxu0 %v17422_v33 }
 0x589   :  { %17418 = vmatprep.subr.bf16.mxu1 %v21707_v17  ;;  %17424 = vmatprep.subr.bf16.mxu0 %v21707_v17 }
 0x58a   :  { %16397 = vmatprep.mubr.msk.f32.mxu1 %vm17948_vm3, %v21709_v0  ;;  %16408 = vmatprep.mubr.msk.f32.mxu0 %vm17948_vm3, %v21709_v0 }
 0x58c   :  { %17420 = vmatpush3.bf16.msra.mxu1 %v17419_v35  ;;  %17426 = vmatpush3.bf16.msra.mxu0 %v17425_v44 }
 0x58d   :  { %16411 = vmatprep.subr.mxu1 %v21709_v0  ;;  %16416 = vmatprep.subr.mxu0 %v21709_v0 }
 0x58f   :  { %16398 = vmatmul.mubr.msk.f32.vlgmr.msra.gmra.mrb[46].mxu1 %vm1101_vm2, %v19302_v32  ;;  %16409 = vmatmul.mubr.msk.f32.vlgmr.msra.gmra.mrb[62].mxu0 %vm1101_vm2, %v19300_v22  ;;  %v15196_v22 = vld [vmem:[%s21700_s11 + $0x1] ss:$0 sm:$0xff]  ;;  %s17951_s11 = smov 64  }
 0x590   :  { %16413 = vmatprep.mubr.msk.f32.mxu1 %vm17948_vm3, %v21709_v0  ;;  %16418 = vmatprep.mubr.msk.f32.mxu0 %vm17948_vm3, %v21709_v0 }
 0x62a   :  { %v2001_v59 = vpop.f32.mrb[32].mxu1  ;;  %v2074_v36 = vpop.f32.mrb[48].mxu0 }
 0x62b   :  { %v19473_v48 = vadd.f32 %v15195_v52, %v2001_v59  ;;  %v16256_v57 = vpop.f32.mrb[49].mxu0  ;;  %v16245_v15 = vpop.f32.mrb[33].mxu1  ;;  %v19480_v32 = vadd.f32 %v15196_v22, %v2074_v36  ;;  %v19585_v36 = vld [vmem:[%s21702_s13 + $0x1] ss:$0 sm:$0xff] }
 0x62c   :  { %v19592_v57 = vld [vmem:[%s21702_s13] ss:$0 sm:$0xff] }
 0x62d   :  { %21939 = vst [vmem:[#allocation14_spill] sm:$0xff] %v19473_v48  ;;  %3124 = vrot.lane.b32.xlu0 %v19473_v48, %s17950_s19  ;;  %v3107_v22 = vmul.f32 %v19592_v57, %v19473_v48 }
 0x631   :  { %3202 = vrot.lane.b32.xlu0 %v19480_v32, %s17950_s19 }
 0x632   :  { %v2147_v53 = vpop.f32.mrb[34].mxu1  ;;  %v2220_v24 = vpop.f32.mrb[50].mxu0 }
 0x633   :  { %v19487_v34 = vadd.f32 %v15197_v38, %v2147_v53  ;;  %v16278_v46 = vpop.f32.mrb[51].mxu0  ;;  %v16267_v13 = vpop.f32.mrb[35].mxu1  ;;  %v19494_v14 = vadd.f32 %v15198_v43, %v2220_v24  ;;  %v3108_v53 = vmul.f32 %v19592_v57, %v19480_v32 }
 0x635   :  { %3280 = vrot.lane.b32.xlu1 %v19487_v34, %s17950_s19  ;;  %v3109_v46 = vmul.f32 %v19592_v57, %v19487_v34  ;;  %v3110_v43 = vmul.f32 %v19592_v57, %v19494_v14 }
 0x639   :  { %3358 = vrot.lane.b32.xlu1 %v19494_v14, %s17950_s19 }
 0x63a   :  { %v2293_v41 = vpop.f32.mrb[36].mxu1  ;;  %v2366_v61 = vpop.f32.mrb[52].mxu0 }
 0x63b   :  { %v19504_v63 = vadd.f32 %v15199_v28, %v2293_v41  ;;  %v19506_v55 = vadd.f32 %v15200_v30, %v2366_v61  ;;  %v16300_v58 = vpop.f32.mrb[53].mxu0  ;;  %v16289_v42 = vpop.f32.mrb[37].mxu1 }
 0x63d   :  { %3514 = vrot.lane.b32.xlu1 %v19506_v55, %s17950_s19  ;;  %3436 = vrot.lane.b32.xlu0 %v19504_v63, %s17950_s19  ;;  %v3111_v41 = vmul.f32 %v19592_v57, %v19504_v63  ;;  %v3112_v61 = vmul.f32 %v19592_v57, %v19506_v55 }
 0x642   :  { %v2439_v25 = vpop.f32.mrb[38].mxu1  ;;  %v2512_v10 = vpop.f32.mrb[54].mxu0 }
 0x643   :  { %v19518_v39 = vadd.f32 %v15201_v51, %v2439_v25  ;;  %v19520_v54 = vadd.f32 %v15202_v56, %v2512_v10  ;;  %v16322_v45 = vpop.f32.mrb[55].mxu0  ;;  %v16311_v19 = vpop.f32.mrb[39].mxu1 }
 0x645   :  { %3670 = vrot.lane.b32.xlu1 %v19520_v54, %s17950_s19  ;;  %3592 = vrot.lane.b32.xlu0 %v19518_v39, %s17950_s19  ;;  %v3113_v51 = vmul.f32 %v19592_v57, %v19518_v39  ;;  %v3114_v56 = vmul.f32 %v19592_v57, %v19520_v54 }
 0x64a   :  { %v2585_v27 = vpop.f32.mrb[40].mxu1  ;;  %v2658_v1 = vpop.f32.mrb[56].mxu0 }
 0x64b   :  { %v19532_v2 = vadd.f32 %v15203_v37, %v2585_v27  ;;  %v19534_v3 = vadd.f32 %v15204_v60, %v2658_v1  ;;  %v16344_v18 = vpop.f32.mrb[57].mxu0  ;;  %v16333_v47 = vpop.f32.mrb[41].mxu1 }
 0x64d   :  { %21940 = vst [vmem:[#allocation12_spill] sm:$0xff] %v19534_v3  ;;  %3826 = vrot.lane.b32.xlu1 %v19534_v3, %s17950_s19  ;;  %3748 = vrot.lane.b32.xlu0 %v19532_v2, %s17950_s19  ;;  %v3115_v45 = vmul.f32 %v19592_v57, %v19532_v2  ;;  %v3116_v19 = vmul.f32 %v19592_v57, %v19534_v3 }
 0x652   :  { %v2731_v6 = vpop.f32.mrb[42].mxu1  ;;  %v2804_v7 = vpop.f32.mrb[58].mxu0 }
 0x653   :  { %v19546_v8 = vadd.f32 %v15205_v4, %v2731_v6  ;;  %v19548_v9 = vadd.f32 %v15206_v5, %v2804_v7  ;;  %v16366_v12 = vpop.f32.mrb[59].mxu0  ;;  %v16355_v62 = vpop.f32.mrb[43].mxu1 }
 0x655   :  { %21941 = vst [vmem:[#allocation13_spill] sm:$0xff] %v19546_v8  ;;  %21942 = vst [vmem:[#allocation15_spill] sm:$0xff] %v19548_v9  ;;  %3982 = vrot.lane.b32.xlu1 %v19548_v9, %s17950_s19  ;;  %3904 = vrot.lane.b32.xlu0 %v19546_v8, %s17950_s19  ;;  %v3117_v27 = vmul.f32 %v19592_v57, %v19546_v8  ;;  %v3118_v1 = vmul.f32 %v19592_v57, %v19548_v9 }
 0x65a   :  { %v2877_v31 = vpop.f32.mrb[44].mxu1  ;;  %v2950_v49 = vpop.f32.mrb[60].mxu0 }
 0x65b   :  { %v19560_v23 = vadd.f32 %v15207_v21, %v2877_v31  ;;  %v19562_v20 = vadd.f32 %v15208_v50, %v2950_v49  ;;  %v16388_v40 = vpop.f32.mrb[61].mxu0  ;;  %v16377_v33 = vpop.f32.mrb[45].mxu1  ;;  %v4591_v49 = vmul.f32 %v19585_v36, %v19473_v48 }
 0x65c   :  { %v4592_v40 = vmul.f32 %v19585_v36, %v19480_v32 }
 0x65d   :  { %21943 = vst [vmem:[#allocation16_spill] sm:$0xff] %v19560_v23  ;;  %21944 = vst [vmem:[#allocation17_spill] sm:$0xff] %v19562_v20  ;;  %4138 = vrot.lane.b32.xlu1 %v19562_v20, %s17950_s19  ;;  %4060 = vrot.lane.b32.xlu0 %v19560_v23, %s17950_s19  ;;  %v3119_v4 = vmul.f32 %v19592_v57, %v19560_v23  ;;  %v3120_v5 = vmul.f32 %v19592_v57, %v19562_v20 }
 0x662   :  { %v3023_v35 = vpop.f32.mrb[46].mxu1  ;;  %v3096_v29 = vpop.f32.mrb[62].mxu0 }
 0x663   :  { %v19574_v26 = vadd.f32 %v15209_v16, %v3023_v35  ;;  %v19576_v44 = vadd.f32 %v15210_v11, %v3096_v29  ;;  %v16410_v52 = vpop.f32.mrb[63].mxu0  ;;  %v16399_v59 = vpop.f32.mrb[47].mxu1  ;;  %v4593_v11 = vmul.f32 %v19585_v36, %v19487_v34  ;;  %v4594_v35 = vmul.f32 %v19585_v36, %v19494_v14 }
 0x664   :  { %v4595_v59 = vmul.f32 %v19585_v36, %v19504_v63 }
 0x665   :  { %21945 = vst [vmem:[#allocation18_spill] sm:$0xff] %v19574_v26  ;;  %21946 = vst [vmem:[#allocation21_spill] sm:$0xff] %v19576_v44  ;;  %4294 = vrot.lane.b32.xlu1 %v19576_v44, %s17950_s19  ;;  %4216 = vrot.lane.b32.xlu0 %v19574_v26, %s17950_s19  ;;  %v3121_v12 = vmul.f32 %v19592_v57, %v19574_v26  ;;  %v3122_v62 = vmul.f32 %v19592_v57, %v19576_v44 }
 0x669   :  { %5967 = vrot.lane.b32.xlu1 %v19585_v36, %s17951_s11 }
 0x66d   :  { %4564 = vrot.lane.b32.xlu1 %v19592_v57, %s17951_s11  ;;  %v4596_v57 = vmul.f32 %v19585_v36, %v19506_v55 }
 0x69f   :  { %v19596_v15 = vpop.permute.xlu0 %3124 }
 0x6a0   :  { %21947 = vst [vmem:[#allocation22_spill] sm:$0xff] %v19596_v15  ;;  %16412 = vmatpush3.xpose.msk.msra.mxu1 %vm1101_vm2, %v19596_v15 }
 0x6a1   :  { %16421 = vmatprep.subr.mxu1 %v21709_v0 }
 0x6a3   :  { %v19603_v38 = vpop.permute.xlu0 %3202  ;;  %16414 = vmatmul.mubr.msk.f32.vlgmr.msra.gmra.mrb[48].mxu1 %vm1101_vm2, %v3107_v22 }
 0x6a4   :  { %21948 = vst [vmem:[#allocation19_spill] sm:$0xff] %v19603_v38  ;;  %16417 = vmatpush3.xpose.msk.msra.mxu0 %vm1101_vm2, %v19603_v38  ;;  %16423 = vmatprep.mubr.msk.f32.mxu1 %vm17948_vm3, %v21709_v0 }
 0x6a5   :  { %16426 = vmatprep.subr.mxu0 %v21709_v0 }
 0x6a7   :  { %v19613_v24 = vpop.permute.xlu1 %3280  ;;  %16419 = vmatmul.mubr.msk.f32.vlgmr.msra.gmra.mrb[64].mxu0 %vm1101_vm2, %v3108_v53 }
 0x6a8   :  { %21949 = vst [vmem:[#allocation20_spill] sm:$0xff] %v19613_v24  ;;  %16422 = vmatpush3.xpose.msk.msra.mxu1 %vm1101_vm2, %v19613_v24  ;;  %16428 = vmatprep.mubr.msk.f32.mxu0 %vm17948_vm3, %v21709_v0 }
 0x6a9   :  { %16431 = vmatprep.subr.mxu1 %v21709_v0 }
 0x6ab   :  { %v19623_v13 = vpop.permute.xlu1 %3358  ;;  %16424 = vmatmul.mubr.msk.f32.vlgmr.msra.gmra.mrb[50].mxu1 %vm1101_vm2, %v3109_v46  ;;  %v4597_v46 = vmul.f32 %v19585_v36, %v19518_v39 }
 0x6ac   :  { %21950 = vst [vmem:[#allocation23_spill] sm:$0xff] %v19623_v13  ;;  %16427 = vmatpush3.xpose.msk.msra.mxu0 %vm1101_vm2, %v19623_v13  ;;  %16433 = vmatprep.mubr.msk.f32.mxu1 %vm17948_vm3, %v21709_v0 }
 0x6ad   :  { %16436 = vmatprep.subr.mxu0 %v21709_v0 }
 0x6af   :  { %v19633_v28 = vpop.permute.xlu1 %3514  ;;  %16429 = vmatmul.mubr.msk.f32.vlgmr.msra.gmra.mrb[66].mxu0 %vm1101_vm2, %v3110_v43  ;;  %v19636_v30 = vpop.permute.xlu0 %3436  ;;  %v4598_v43 = vmul.f32 %v19585_v36, %v19520_v54 }
 0x6b0   :  { %21951 = vst [vmem:[#allocation24_spill] sm:$0xff] %v19633_v28  ;;  %21952 = vst [vmem:[#allocation25_spill] sm:$0xff] %v19636_v30  ;;  %16432 = vmatpush3.xpose.msk.msra.mxu1 %vm1101_vm2, %v19636_v30  ;;  %16437 = vmatpush3.xpose.msk.msra.mxu0 %vm1101_vm2, %v19633_v28 }
 0x6b1   :  { %16438 = vmatprep.mubr.msk.f32.mxu0 %vm17948_vm3, %v21709_v0  ;;  %16446 = vmatprep.subr.mxu0 %v21709_v0 }
 0x6b2   :  { %16441 = vmatprep.subr.mxu1 %v21709_v0 }
 0x6b3   :  { %16434 = vmatmul.mubr.msk.f32.vlgmr.msra.gmra.mrb[52].mxu1 %vm1101_vm2, %v3111_v41  ;;  %16439 = vmatmul.mubr.msk.f32.vlgmr.msra.gmra.mrb[68].mxu0 %vm1101_vm2, %v3112_v61 }
 0x6b4   :  { %16443 = vmatprep.mubr.msk.f32.mxu1 %vm17948_vm3, %v21709_v0  ;;  %16448 = vmatprep.mubr.msk.f32.mxu0 %vm17948_vm3, %v21709_v0 }
 0x6b7   :  { %v19656_v58 = vpop.permute.xlu1 %3670  ;;  %v19658_v42 = vpop.permute.xlu0 %3592 }
 0x6b8   :  { %21953 = vst [vmem:[#allocation26_spill] sm:$0xff] %v19656_v58  ;;  %21954 = vst [vmem:[#allocation29_spill] sm:$0xff] %v19658_v42  ;;  %16442 = vmatpush3.xpose.msk.msra.mxu1 %vm1101_vm2, %v19658_v42  ;;  %16447 = vmatpush3.xpose.msk.msra.mxu0 %vm1101_vm2, %v19656_v58 }
 0x6b9   :  { %16456 = vmatprep.subr.mxu0 %v21709_v0  ;;  %16451 = vmatprep.subr.mxu1 %v21709_v0 }
 0x6bb   :  { %16444 = vmatmul.mubr.msk.f32.vlgmr.msra.gmra.mrb[54].mxu1 %vm1101_vm2, %v3113_v51  ;;  %16449 = vmatmul.mubr.msk.f32.vlgmr.msra.gmra.mrb[70].mxu0 %vm1101_vm2, %v3114_v56  ;;  %v4599_v51 = vmul.f32 %v19585_v36, %v19532_v2  ;;  %v4600_v56 = vmul.f32 %v19585_v36, %v19534_v3 }
 0x6bc   :  { %16453 = vmatprep.mubr.msk.f32.mxu1 %vm17948_vm3, %v21709_v0  ;;  %16458 = vmatprep.mubr.msk.f32.mxu0 %vm17948_vm3, %v21709_v0 }
 0x6bf   :  { %v19676_v25 = vpop.permute.xlu1 %3826  ;;  %v19678_v10 = vpop.permute.xlu0 %3748 }
 0x6c0   :  { %21955 = vst [vmem:[#allocation30_spill] sm:$0xff] %v19676_v25  ;;  %21956 = vst [vmem:[#allocation27_spill] sm:$0xff] %v19678_v10  ;;  %16452 = vmatpush3.xpose.msk.msra.mxu1 %vm1101_vm2, %v19678_v10  ;;  %16457 = vmatpush3.xpose.msk.msra.mxu0 %vm1101_vm2, %v19676_v25 }
 0x6c1   :  { %16466 = vmatprep.subr.mxu0 %v21709_v0  ;;  %16461 = vmatprep.subr.mxu1 %v21709_v0 }
 0x6c3   :  { %16454 = vmatmul.mubr.msk.f32.vlgmr.msra.gmra.mrb[56].mxu1 %vm1101_vm2, %v3115_v45  ;;  %16459 = vmatmul.mubr.msk.f32.vlgmr.msra.gmra.mrb[72].mxu0 %vm1101_vm2, %v3116_v19 }
 0x6c4   :  { %16463 = vmatprep.mubr.msk.f32.mxu1 %vm17948_vm3, %v21709_v0  ;;  %16468 = vmatprep.mubr.msk.f32.mxu0 %vm17948_vm3, %v21709_v0 }
 0x6c7   :  { %v19696_v37 = vpop.permute.xlu1 %3982  ;;  %v19698_v60 = vpop.permute.xlu0 %3904 }
 0x6c8   :  { %21957 = vst [vmem:[#allocation28_spill] sm:$0xff] %v19696_v37  ;;  %21958 = vst [vmem:[#allocation31_spill] sm:$0xff] %v19698_v60  ;;  %16462 = vmatpush3.xpose.msk.msra.mxu1 %vm1101_vm2, %v19698_v60  ;;  %16467 = vmatpush3.xpose.msk.msra.mxu0 %vm1101_vm2, %v19696_v37 }
 0x6c9   :  { %16476 = vmatprep.subr.mxu0 %v21709_v0  ;;  %16471 = vmatprep.subr.mxu1 %v21709_v0 }
 0x6cb   :  { %16464 = vmatmul.mubr.msk.f32.vlgmr.msra.gmra.mrb[58].mxu1 %vm1101_vm2, %v3117_v27  ;;  %16469 = vmatmul.mubr.msk.f32.vlgmr.msra.gmra.mrb[74].mxu0 %vm1101_vm2, %v3118_v1  ;;  %v4601_v27 = vmul.f32 %v19585_v36, %v19546_v8  ;;  %v4602_v1 = vmul.f32 %v19585_v36, %v19548_v9 }
 0x6cc   :  { %16473 = vmatprep.mubr.msk.f32.mxu1 %vm17948_vm3, %v21709_v0  ;;  %16478 = vmatprep.mubr.msk.f32.mxu0 %vm17948_vm3, %v21709_v0 }
 0x6cf   :  { %v19716_v18 = vpop.permute.xlu1 %4138  ;;  %v19718_v47 = vpop.permute.xlu0 %4060 }
 0x6d0   :  { %21959 = vst [vmem:[#allocation32_spill] sm:$0xff] %v19716_v18  ;;  %21960 = vst [vmem:[#allocation33_spill] sm:$0xff] %v19718_v47  ;;  %16472 = vmatpush3.xpose.msk.msra.mxu1 %vm1101_vm2, %v19718_v47  ;;  %16477 = vmatpush3.xpose.msk.msra.mxu0 %vm1101_vm2, %v19716_v18 }
 0x6d1   :  { %16486 = vmatprep.subr.mxu0 %v21709_v0  ;;  %16481 = vmatprep.subr.mxu1 %v21709_v0 }
 0x6d3   :  { %16474 = vmatmul.mubr.msk.f32.vlgmr.msra.gmra.mrb[60].mxu1 %vm1101_vm2, %v3119_v4  ;;  %16479 = vmatmul.mubr.msk.f32.vlgmr.msra.gmra.mrb[76].mxu0 %vm1101_vm2, %v3120_v5 }
 0x6d4   :  { %16483 = vmatprep.mubr.msk.f32.mxu1 %vm17948_vm3, %v21709_v0  ;;  %16488 = vmatprep.mubr.msk.f32.mxu0 %vm17948_vm3, %v21709_v0 }
 0x6d7   :  { %v19736_v6 = vpop.permute.xlu1 %4294  ;;  %v19738_v7 = vpop.permute.xlu0 %4216 }
 0x6d8   :  { %21961 = vst [vmem:[#allocation34_spill] sm:$0xff] %v19736_v6  ;;  %21962 = vst [vmem:[#allocation37_spill] sm:$0xff] %v19738_v7  ;;  %16482 = vmatpush3.xpose.msk.msra.mxu1 %vm1101_vm2, %v19738_v7  ;;  %16487 = vmatpush3.xpose.msk.msra.mxu0 %vm1101_vm2, %v19736_v6 }
 0x6d9   :  { %16491 = vmatprep.subr.mxu1 %v21709_v0  ;;  %16496 = vmatprep.subr.mxu0 %v21709_v0 }
 0x6db   :  { %v19750_v21 = vpop.permute.xlu1 %5967  ;;  %16484 = vmatmul.mubr.msk.f32.vlgmr.msra.gmra.mrb[62].mxu1 %vm1101_vm2, %v3121_v12  ;;  %16489 = vmatmul.mubr.msk.f32.vlgmr.msra.gmra.mrb[78].mxu0 %vm1101_vm2, %v3122_v62  ;;  %v4603_v12 = vmul.f32 %v19585_v36, %v19560_v23  ;;  %v4604_v62 = vmul.f32 %v19585_v36, %v19562_v20 }
 0x6dc   :  { %16492 = vmatpush3.xpose.msk.msra.mxu1 %vm1101_vm2, %v19596_v15  ;;  %16497 = vmatpush3.xpose.msk.msra.mxu0 %vm1101_vm2, %v19603_v38  ;;  %v5971_v50 = vmul.f32 %v19750_v21, %v19480_v32  ;;  %v5970_v31 = vmul.f32 %v19750_v21, %v19473_v48  ;;  %v5973_v33 = vmul.f32 %v19750_v21, %v19494_v14 }
 0x6dd   :  { %16498 = vmatprep.mubr.msk.f32.mxu0 %vm17948_vm3, %v21709_v0  ;;  %16493 = vmatprep.mubr.msk.f32.mxu1 %vm17948_vm3, %v21709_v0  ;;  %v5972_v16 = vmul.f32 %v19750_v21, %v19487_v34  ;;  %v5975_v29 = vmul.f32 %v19750_v21, %v19506_v55  ;;  %v5974_v52 = vmul.f32 %v19750_v21, %v19504_v63 }
 0x6de   :  { %6064 = vrot.lane.b32.xlu1 %v5971_v50, %s17951_s11  ;;  %5987 = vrot.lane.b32.xlu0 %v5970_v31, %s17951_s11  ;;  %v5977_v22 = vmul.f32 %v19750_v21, %v19520_v54  ;;  %v5976_v53 = vmul.f32 %v19750_v21, %v19518_v39  ;;  %v5979_v41 = vmul.f32 %v19750_v21, %v19534_v3 }
 0x6df   :  { %16494 = vmatmul.mubr.msk.f32.vlgmr.msra.gmra.mrb[64].mxu1 %vm1101_vm2, %v4591_v49  ;;  %16499 = vmatmul.mubr.msk.f32.vlgmr.msra.gmra.mrb[80].mxu0 %vm1101_vm2, %v4592_v40  ;;  %v5978_v61 = vmul.f32 %v19750_v21, %v19532_v2  ;;  %v5981_v45 = vmul.f32 %v19750_v21, %v19548_v9  ;;  %v5980_v19 = vmul.f32 %v19750_v21, %v19546_v8 }
 0x6e0   :  { %16501 = vmatprep.subr.mxu1 %v21709_v0  ;;  %16506 = vmatprep.subr.mxu0 %v21709_v0  ;;  %v5983_v4 = vmul.f32 %v19750_v21, %v19562_v20  ;;  %v5982_v5 = vmul.f32 %v19750_v21, %v19560_v23  ;;  %v5985_v50 = vmul.f32 %v19750_v21, %v19576_v44 }
 0x6e1   :  { %16502 = vmatpush3.xpose.msk.msra.mxu1 %vm1101_vm2, %v19613_v24  ;;  %16507 = vmatpush3.xpose.msk.msra.mxu0 %vm1101_vm2, %v19623_v13  ;;  %v5984_v31 = vmul.f32 %v19750_v21, %v19574_v26  ;;  %v4605_v49 = vmul.f32 %v19585_v36, %v19574_v26  ;;  %v4606_v40 = vmul.f32 %v19585_v36, %v19576_v44  ;;  %v19934_v36 = vpop.permute.xlu1 %4564 }
 0x6e2   :  { %6218 = vrot.lane.b32.xlu1 %v5973_v33, %s17951_s11  ;;  %16508 = vmatprep.mubr.msk.f32.mxu0 %vm17948_vm3, %v21709_v0 }
 0x6e3   :  { %6141 = vrot.lane.b32.xlu0 %v5972_v16, %s17951_s11  ;;  %16503 = vmatprep.mubr.msk.f32.mxu1 %vm17948_vm3, %v21709_v0 }
 0x6e4   :  { %16504 = vmatmul.mubr.msk.f32.vlgmr.msra.gmra.mrb[66].mxu1 %vm1101_vm2, %v4593_v11  ;;  %16509 = vmatmul.mubr.msk.f32.vlgmr.msra.gmra.mrb[82].mxu0 %vm1101_vm2, %v4594_v35 }
 0x6e5   :  { %16511 = vmatprep.subr.mxu1 %v21709_v0  ;;  %16516 = vmatprep.subr.mxu0 %v21709_v0 }
 0x6e6   :  { %16512 = vmatpush3.xpose.msk.msra.mxu1 %vm1101_vm2, %v19636_v30  ;;  %16517 = vmatpush3.xpose.msk.msra.mxu0 %vm1101_vm2, %v19633_v28 }
 0x6e7   :  { %6372 = vrot.lane.b32.xlu1 %v5975_v29, %s17951_s11  ;;  %16518 = vmatprep.mubr.msk.f32.mxu0 %vm17948_vm3, %v21709_v0 }
 0x6e8   :  { %6295 = vrot.lane.b32.xlu0 %v5974_v52, %s17951_s11  ;;  %16513 = vmatprep.mubr.msk.f32.mxu1 %vm17948_vm3, %v21709_v0 }
 0x6e9   :  { %16514 = vmatmul.mubr.msk.f32.vlgmr.msra.gmra.mrb[68].mxu1 %vm1101_vm2, %v4595_v59  ;;  %16519 = vmatmul.mubr.msk.f32.vlgmr.msra.gmra.mrb[84].mxu0 %vm1101_vm2, %v4596_v57 }
 0x6ea   :  { %16521 = vmatprep.subr.mxu1 %v21709_v0  ;;  %16526 = vmatprep.subr.mxu0 %v21709_v0 }
 0x6eb   :  { %16522 = vmatpush3.xpose.msk.msra.mxu1 %vm1101_vm2, %v19658_v42  ;;  %16527 = vmatpush3.xpose.msk.msra.mxu0 %vm1101_vm2, %v19656_v58 }
 0x6ec   :  { %6526 = vrot.lane.b32.xlu1 %v5977_v22, %s17951_s11  ;;  %16528 = vmatprep.mubr.msk.f32.mxu0 %vm17948_vm3, %v21709_v0 }
 0x6ed   :  { %6449 = vrot.lane.b32.xlu0 %v5976_v53, %s17951_s11  ;;  %16523 = vmatprep.mubr.msk.f32.mxu1 %vm17948_vm3, %v21709_v0 }
 0x6ee   :  { %16524 = vmatmul.mubr.msk.f32.vlgmr.msra.gmra.mrb[70].mxu1 %vm1101_vm2, %v4597_v46  ;;  %16529 = vmatmul.mubr.msk.f32.vlgmr.msra.gmra.mrb[86].mxu0 %vm1101_vm2, %v4598_v43 }
 0x6ef   :  { %16531 = vmatprep.subr.mxu1 %v21709_v0  ;;  %16536 = vmatprep.subr.mxu0 %v21709_v0 }
 0x6f0   :  { %16532 = vmatpush3.xpose.msk.msra.mxu1 %vm1101_vm2, %v19678_v10  ;;  %16537 = vmatpush3.xpose.msk.msra.mxu0 %vm1101_vm2, %v19676_v25 }
 0x6f1   :  { %6680 = vrot.lane.b32.xlu1 %v5979_v41, %s17951_s11  ;;  %16538 = vmatprep.mubr.msk.f32.mxu0 %vm17948_vm3, %v21709_v0 }
 0x6f2   :  { %6603 = vrot.lane.b32.xlu0 %v5978_v61, %s17951_s11  ;;  %16533 = vmatprep.mubr.msk.f32.mxu1 %vm17948_vm3, %v21709_v0 }
 0x6f3   :  { %16534 = vmatmul.mubr.msk.f32.vlgmr.msra.gmra.mrb[72].mxu1 %vm1101_vm2, %v4599_v51  ;;  %16539 = vmatmul.mubr.msk.f32.vlgmr.msra.gmra.mrb[88].mxu0 %vm1101_vm2, %v4600_v56 }
 0x6f4   :  { %16541 = vmatprep.subr.mxu1 %v21709_v0  ;;  %16546 = vmatprep.subr.mxu0 %v21709_v0 }
 0x6f5   :  { %16542 = vmatpush3.xpose.msk.msra.mxu1 %vm1101_vm2, %v19698_v60  ;;  %16547 = vmatpush3.xpose.msk.msra.mxu0 %vm1101_vm2, %v19696_v37 }
 0x6f6   :  { %6834 = vrot.lane.b32.xlu1 %v5981_v45, %s17951_s11  ;;  %16548 = vmatprep.mubr.msk.f32.mxu0 %vm17948_vm3, %v21709_v0 }
 0x6f7   :  { %6757 = vrot.lane.b32.xlu0 %v5980_v19, %s17951_s11  ;;  %16543 = vmatprep.mubr.msk.f32.mxu1 %vm17948_vm3, %v21709_v0 }
 0x6f8   :  { %16544 = vmatmul.mubr.msk.f32.vlgmr.msra.gmra.mrb[74].mxu1 %vm1101_vm2, %v4601_v27  ;;  %16549 = vmatmul.mubr.msk.f32.vlgmr.msra.gmra.mrb[90].mxu0 %vm1101_vm2, %v4602_v1 }
 0x6f9   :  { %16551 = vmatprep.subr.mxu1 %v21709_v0  ;;  %16556 = vmatprep.subr.mxu0 %v21709_v0 }
 0x6fa   :  { %16552 = vmatpush3.xpose.msk.msra.mxu1 %vm1101_vm2, %v19718_v47  ;;  %16557 = vmatpush3.xpose.msk.msra.mxu0 %vm1101_vm2, %v19716_v18 }
 0x6fb   :  { %6988 = vrot.lane.b32.xlu1 %v5983_v4, %s17951_s11  ;;  %16558 = vmatprep.mubr.msk.f32.mxu0 %vm17948_vm3, %v21709_v0 }
 0x6fc   :  { %6911 = vrot.lane.b32.xlu0 %v5982_v5, %s17951_s11  ;;  %16553 = vmatprep.mubr.msk.f32.mxu1 %vm17948_vm3, %v21709_v0 }
 0x6fd   :  { %16554 = vmatmul.mubr.msk.f32.vlgmr.msra.gmra.mrb[76].mxu1 %vm1101_vm2, %v4603_v12  ;;  %16559 = vmatmul.mubr.msk.f32.vlgmr.msra.gmra.mrb[92].mxu0 %vm1101_vm2, %v4604_v62 }
 0x6fe   :  { %16561 = vmatprep.subr.mxu1 %v21709_v0  ;;  %16566 = vmatprep.subr.mxu0 %v21709_v0 }
 0x6ff   :  { %16562 = vmatpush3.xpose.msk.msra.mxu1 %vm1101_vm2, %v19738_v7  ;;  %16567 = vmatpush3.xpose.msk.msra.mxu0 %vm1101_vm2, %v19736_v6 }
 0x700   :  { %7142 = vrot.lane.b32.xlu1 %v5985_v50, %s17951_s11  ;;  %16568 = vmatprep.mubr.msk.f32.mxu0 %vm17948_vm3, %v21709_v0 }
 0x701   :  { %7065 = vrot.lane.b32.xlu0 %v5984_v31, %s17951_s11  ;;  %16563 = vmatprep.mubr.msk.f32.mxu1 %vm17948_vm3, %v21709_v0 }
 0x702   :  { %16564 = vmatmul.mubr.msk.f32.vlgmr.msra.gmra.mrb[78].mxu1 %vm1101_vm2, %v4605_v49  ;;  %16569 = vmatmul.mubr.msk.f32.vlgmr.msra.gmra.mrb[94].mxu0 %vm1101_vm2, %v4606_v40 }
 0x703   :  { %16576 = vmatprep.subr.mxu0 %v21709_v0  ;;  %16571 = vmatprep.subr.mxu1 %v21709_v0 }
 0x704   :  { %16578 = vmatprep.mubr.msk.f32.mxu0 %vm17948_vm3, %v21709_v0  ;;  %16573 = vmatprep.mubr.msk.f32.mxu1 %vm17948_vm3, %v21709_v0 }
 0x750   :  { %v6065_v21 = vpop.permute.xlu1 %6064  ;;  %v5988_v33 = vpop.permute.xlu0 %5987 }
 0x751   :  { %16572 = vmatpush3.msra.mxu1 %v5988_v33  ;;  %16577 = vmatpush3.msra.mxu0 %v6065_v21 }
 0x752   :  { %16586 = vmatprep.subr.mxu0 %v21709_v0  ;;  %16581 = vmatprep.subr.mxu1 %v21709_v0 }
 0x776   :  { %v3197_v16 = vpop.f32.mrb[48].mxu1 }
 0x777   :  { %v19938_v11 = vmul.f32 0.35355338, %v3197_v16  ;;  %v16415_v35 = vpop.f32.mrb[49].mxu1 }
 0x779   :  { %v4388_v29 = vsel %vm4387_vm4, %v19938_v11, -inf }
 0x77a   :  { %v3275_v52 = vpop.f32.mrb[64].mxu0  ;;  %4389 = vmax.xlane.f32.xlu1 %v4388_v29 }
 0x77b   :  { %v19942_v59 = vmul.f32 0.35355338, %v3275_v52  ;;  %v16420_v57 = vpop.f32.mrb[65].mxu0 }
 0x77d   :  { %v4391_v22 = vsel %vm4387_vm4, %v19942_v59, -inf }
 0x77e   :  { %4392 = vmax.xlane.f32.xlu0 %v4391_v22  ;;  %v3353_v53 = vpop.f32.mrb[50].mxu1 }
 0x77f   :  { %v19946_v46 = vmul.f32 0.35355338, %v3353_v53  ;;  %v16425_v43 = vpop.f32.mrb[51].mxu1 }
 0x781   :  { %v4394_v41 = vsel %vm4387_vm4, %v19946_v46, -inf }
 0x782   :  { %v3431_v61 = vpop.f32.mrb[66].mxu0  ;;  %4395 = vmax.xlane.f32.xlu1 %v4394_v41 }
 0x783   :  { %v19950_v51 = vmul.f32 0.35355338, %v3431_v61  ;;  %v16430_v56 = vpop.f32.mrb[67].mxu0 }
 0x785   :  { %v4397_v45 = vsel %vm4387_vm4, %v19950_v51, -inf }
 0x786   :  { %v3587_v19 = vpop.f32.mrb[68].mxu0  ;;  %4398 = vmax.xlane.f32.xlu0 %v4397_v45  ;;  %v3509_v27 = vpop.f32.mrb[52].mxu1 }
 0x787   :  { %v19954_v1 = vmul.f32 0.35355338, %v3587_v19  ;;  %v19956_v4 = vmul.f32 0.35355338, %v3509_v27  ;;  %v16435_v5 = vpop.f32.mrb[53].mxu1  ;;  %v16440_v12 = vpop.f32.mrb[69].mxu0 }
 0x789   :  { %v4403_v62 = vsel %vm4387_vm4, %v19954_v1, -inf  ;;  %v4400_v50 = vsel %vm4387_vm4, %v19956_v4, -inf }
 0x78a   :  { %4404 = vmax.xlane.f32.xlu0 %v4403_v62  ;;  %4401 = vmax.xlane.f32.xlu1 %v4400_v50 }
 0x78e   :  { %v3665_v31 = vpop.f32.mrb[54].mxu1  ;;  %v3743_v49 = vpop.f32.mrb[70].mxu0 }
 0x78f   :  { %v19962_v40 = vmul.f32 0.35355338, %v3665_v31  ;;  %v19964_v21 = vmul.f32 0.35355338, %v3743_v49  ;;  %v16445_v33 = vpop.f32.mrb[55].mxu1  ;;  %v16450_v16 = vpop.f32.mrb[71].mxu0 }
 0x791   :  { %v4409_v35 = vsel %vm4387_vm4, %v19964_v21, -inf  ;;  %v4406_v29 = vsel %vm4387_vm4, %v19962_v40, -inf }
 0x792   :  { %4410 = vmax.xlane.f32.xlu0 %v4409_v35  ;;  %4407 = vmax.xlane.f32.xlu1 %v4406_v29 }
 0x796   :  { %v3821_v52 = vpop.f32.mrb[56].mxu1  ;;  %v3899_v57 = vpop.f32.mrb[72].mxu0 }
 0x797   :  { %v19970_v22 = vmul.f32 0.35355338, %v3821_v52  ;;  %v19972_v53 = vmul.f32 0.35355338, %v3899_v57  ;;  %v16455_v43 = vpop.f32.mrb[57].mxu1  ;;  %v16460_v41 = vpop.f32.mrb[73].mxu0 }
 0x799   :  { %v4415_v61 = vsel %vm4387_vm4, %v19972_v53, -inf  ;;  %v4412_v56 = vsel %vm4387_vm4, %v19970_v22, -inf }
 0x79a   :  { %4416 = vmax.xlane.f32.xlu0 %v4415_v61  ;;  %4413 = vmax.xlane.f32.xlu1 %v4412_v56 }
 0x79e   :  { %v3977_v45 = vpop.f32.mrb[58].mxu1  ;;  %v4055_v19 = vpop.f32.mrb[74].mxu0 }
 0x79f   :  { %v19978_v27 = vmul.f32 0.35355338, %v3977_v45  ;;  %v19980_v5 = vmul.f32 0.35355338, %v4055_v19  ;;  %v16465_v12 = vpop.f32.mrb[59].mxu1  ;;  %v16470_v62 = vpop.f32.mrb[75].mxu0 }
 0x7a1   :  { %v4421_v50 = vsel %vm4387_vm4, %v19980_v5, -inf  ;;  %v4418_v31 = vsel %vm4387_vm4, %v19978_v27, -inf }
 0x7a2   :  { %4422 = vmax.xlane.f32.xlu0 %v4421_v50  ;;  %4419 = vmax.xlane.f32.xlu1 %v4418_v31 }
 0x7a6   :  { %v4133_v49 = vpop.f32.mrb[60].mxu1  ;;  %v4211_v33 = vpop.f32.mrb[76].mxu0 }
 0x7a7   :  { %v19986_v16 = vmul.f32 0.35355338, %v4133_v49  ;;  %v16475_v35 = vpop.f32.mrb[61].mxu1  ;;  %v16480_v29 = vpop.f32.mrb[77].mxu0  ;;  %v19988_v52 = vmul.f32 0.35355338, %v4211_v33 }
 0x7a9   :  { %v4424_v57 = vsel %vm4387_vm4, %v19986_v16, -inf  ;;  %v4427_v43 = vsel %vm4387_vm4, %v19988_v52, -inf }
 0x7aa   :  { %4425 = vmax.xlane.f32.xlu0 %v4424_v57 }
 0x7ae   :  { %v4367_v41 = vpop.f32.mrb[78].mxu0  ;;  %4428 = vmax.xlane.f32.xlu0 %v4427_v43  ;;  %v4289_v61 = vpop.f32.mrb[62].mxu1 }
 0x7af   :  { %v19994_v56 = vmul.f32 0.35355338, %v4289_v61  ;;  %v16485_v45 = vpop.f32.mrb[63].mxu1  ;;  %v16490_v19 = vpop.f32.mrb[79].mxu0  ;;  %v19996_v12 = vmul.f32 0.35355338, %v4367_v41 }
 0x7b1   :  { %v4430_v62 = vsel %vm4387_vm4, %v19994_v56, -inf  ;;  %v4433_v43 = vsel %vm4387_vm4, %v19996_v12, -inf }
 0x7b2   :  { %v4749_v50 = vpop.f32.mrb[80].mxu0  ;;  %4431 = vmax.xlane.f32.xlu0 %v4430_v62  ;;  %v4676_v31 = vpop.f32.mrb[64].mxu1 }
 0x7b3   :  { %v20000_v49 = vmul.f32 0.35355338, %v4749_v50  ;;  %v16495_v33 = vpop.f32.mrb[65].mxu1  ;;  %v16500_v35 = vpop.f32.mrb[81].mxu0  ;;  %v20002_v29 = vmul.f32 0.35355338, %v4676_v31 }
 0x7b5   :  { %v5794_v57 = vsel %vm4387_vm4, %v20000_v49, -inf  ;;  %v5791_v50 = vsel %vm4387_vm4, %v20002_v29, -inf }
 0x7b6   :  { %5795 = vmax.xlane.f32.xlu1 %v5794_v57  ;;  %4434 = vmax.xlane.f32.xlu0 %v4433_v43 }
 0x7b7   :  { %v4895_v41 = vpop.f32.mrb[82].mxu0  ;;  %v4822_v61 = vpop.f32.mrb[66].mxu1 }
 0x7b8   :  { %v16505_v45 = vpop.f32.mrb[67].mxu1  ;;  %v16510_v19 = vpop.f32.mrb[83].mxu0  ;;  %v20008_v62 = vmul.f32 0.35355338, %v4822_v61  ;;  %v20012_v31 = vmul.f32 0.35355338, %v4895_v41 }
 0x7ba   :  { %5792 = vmax.xlane.f32.xlu0 %v5791_v50  ;;  %v5797_v57 = vsel %vm4387_vm4, %v20008_v62, -inf  ;;  %v5800_v41 = vsel %vm4387_vm4, %v20012_v31, -inf }
 0x7bc   :  { %v5041_v33 = vpop.f32.mrb[84].mxu0  ;;  %v4968_v35 = vpop.f32.mrb[68].mxu1 }
 0x7bd   :  { %v20014_v17 = vmul.f32 0.35355338, %v4968_v35  ;;  %v16515_v0 = vpop.f32.mrb[69].mxu1  ;;  %v16520_v6 = vpop.f32.mrb[85].mxu0  ;;  %v20020_v61 = vmul.f32 0.35355338, %v5041_v33 }
 0x7be   :  { %5798 = vmax.xlane.f32.xlu0 %v5797_v57 }
 0x7bf   :  { %v5803_v43 = vsel %vm4387_vm4, %v20014_v17, -inf  ;;  %v5806_v33 = vsel %vm4387_vm4, %v20020_v61, -inf }
 0x7c0   :  { %5804 = vmax.xlane.f32.xlu1 %v5803_v43 }
 0x7c1   :  { %v5187_v45 = vpop.f32.mrb[86].mxu0  ;;  %v5114_v19 = vpop.f32.mrb[70].mxu1 }
 0x7c2   :  { %v20024_v50 = vmul.f32 0.35355338, %v5114_v19  ;;  %v16525_v35 = vpop.f32.mrb[71].mxu1  ;;  %v16530_v0 = vpop.f32.mrb[87].mxu0  ;;  %5801 = vmax.xlane.f32.xlu0 %v5800_v41  ;;  %v20028_v57 = vmul.f32 0.35355338, %v5187_v45 }
 0x7c4   :  { %v5809_v6 = vsel %vm4387_vm4, %v20024_v50, -inf  ;;  %v5812_v45 = vsel %vm4387_vm4, %v20028_v57, -inf }
 0x7c5   :  { %5810 = vmax.xlane.f32.xlu1 %v5809_v6 }
 0x7c6   :  { %v5333_v43 = vpop.f32.mrb[88].mxu0  ;;  %v5260_v7 = vpop.f32.mrb[72].mxu1  ;;  %5807 = vmax.xlane.f32.xlu0 %v5806_v33 }
 0x7c7   :  { %v20032_v18 = vmul.f32 0.35355338, %v5260_v7  ;;  %v16535_v47 = vpop.f32.mrb[73].mxu1  ;;  %v16540_v19 = vpop.f32.mrb[89].mxu0  ;;  %v20034_v37 = vmul.f32 0.35355338, %v5333_v43 }
 0x7c9   :  { %v5815_v41 = vsel %vm4387_vm4, %v20032_v18, -inf  ;;  %v5818_v47 = vsel %vm4387_vm4, %v20034_v37, -inf }
 0x7ca   :  { %5816 = vmax.xlane.f32.xlu1 %v5815_v41  ;;  %5813 = vmax.xlane.f32.xlu0 %v5812_v45 }
 0x7cb   :  { %v5479_v35 = vpop.f32.mrb[90].mxu0  ;;  %v5406_v0 = vpop.f32.mrb[74].mxu1 }
 0x7cc   :  { %v20040_v6 = vmul.f32 0.35355338, %v5479_v35  ;;  %v20042_v60 = vmul.f32 0.35355338, %v5406_v0  ;;  %v16545_v7 = vpop.f32.mrb[75].mxu1  ;;  %v16550_v33 = vpop.f32.mrb[91].mxu0 }
 0x7ce   :  { %v5821_v43 = vsel %vm4387_vm4, %v20042_v60, -inf  ;;  %5819 = vmax.xlane.f32.xlu0 %v5818_v47  ;;  %v5824_v41 = vsel %vm4387_vm4, %v20040_v6, -inf }
 0x7cf   :  { %5822 = vmax.xlane.f32.xlu1 %v5821_v43 }
 0x7d0   :  { %v5625_v19 = vpop.f32.mrb[92].mxu0  ;;  %v5552_v25 = vpop.f32.mrb[76].mxu1 }
 0x7d1   :  { %v20050_v45 = vmul.f32 0.35355338, %v5625_v19  ;;  %v20052_v35 = vmul.f32 0.35355338, %v5552_v25  ;;  %v16555_v0 = vpop.f32.mrb[77].mxu1  ;;  %v16560_v7 = vpop.f32.mrb[93].mxu0 }
 0x7d2   :  { %5825 = vmax.xlane.f32.xlu0 %v5824_v41  ;;  %v20066_v0 = vpop.permute.xlu1 %6218  ;;  %v20068_v7 = vpop.permute.xlu0 %6141 }
 0x7d3   :  { %v5827_v33 = vsel %vm4387_vm4, %v20052_v35, -inf  ;;  %v5830_v47 = vsel %vm4387_vm4, %v20050_v45, -inf }
 0x7d4   :  { %5828 = vmax.xlane.f32.xlu1 %v5827_v33 }
 0x7d5   :  { %v5771_v10 = vpop.f32.mrb[94].mxu0  ;;  %v5698_v58 = vpop.f32.mrb[78].mxu1 }
 0x7d6   :  { %v20058_v43 = vmul.f32 0.35355338, %v5771_v10  ;;  %v20060_v42 = vmul.f32 0.35355338, %v5698_v58  ;;  %v16565_v19 = vpop.f32.mrb[79].mxu1  ;;  %v16570_v28 = vpop.f32.mrb[95].mxu0  ;;  %5831 = vmax.xlane.f32.xlu0 %v5830_v47 }
 0x7d7   :  { %v20070_v33 = vpop.permute.xlu1 %6372  ;;  %v20072_v10 = vpop.permute.xlu0 %6295  ;;  %v4567_v28 = vmul.f32 %v19934_v36, %v19473_v48 }
 0x7d8   :  { %v5833_v25 = vsel %vm4387_vm4, %v20060_v42, -inf  ;;  %v5836_v41 = vsel %vm4387_vm4, %v20058_v43, -inf  ;;  %21963 = vst [vmem:[#allocation38_spill] sm:$0xff] %v20070_v33  ;;  %21964 = vst [vmem:[#allocation35_spill] sm:$0xff] %v20072_v10 }
 0x7d9   :  { %5834 = vmax.xlane.f32.xlu1 %v5833_v25 }
 0x7da   :  { %5837 = vmax.xlane.f32.xlu0 %v5836_v41 }
 0x7db   :  { %v20074_v58 = vpop.permute.xlu1 %6526  ;;  %v20078_v47 = vpop.permute.xlu0 %6449 }
 0x7dc   :  { %21965 = vst [vmem:[#allocation36_spill] sm:$0xff] %v20074_v58  ;;  %21966 = vst [vmem:[#allocation39_spill] sm:$0xff] %v20078_v47 }
 0x7df   :  { %v20081_v19 = vpop.permute.xlu1 %6680  ;;  %v20083_v25 = vpop.permute.xlu0 %6603 }
 0x7e0   :  { %21967 = vst [vmem:[#allocation40_spill] sm:$0xff] %v20081_v19  ;;  %21968 = vst [vmem:[#allocation41_spill] sm:$0xff] %v20083_v25 }
 0x7e3   :  { %v20085_v41 = vpop.permute.xlu1 %6834  ;;  %v20087_v30 = vpop.permute.xlu0 %6757 }
 0x7e4   :  { %21969 = vst [vmem:[#allocation42_spill] sm:$0xff] %v20085_v41  ;;  %21970 = vst [vmem:[#allocation45_spill] sm:$0xff] %v20087_v30 }
 0x7e7   :  { %v20089_v13 = vpop.permute.xlu1 %6988  ;;  %v20091_v24 = vpop.permute.xlu0 %6911 }
 0x7e8   :  { %21971 = vst [vmem:[#allocation46_spill] sm:$0xff] %v20089_v13  ;;  %21972 = vst [vmem:[#allocation43_spill] sm:$0xff] %v20091_v24 }
 0x7eb   :  { %v20093_v38 = vpop.permute.xlu1 %7142  ;;  %v20095_v15 = vpop.permute.xlu0 %7065 }
 0x7ec   :  { %21973 = vst [vmem:[#allocation44_spill] sm:$0xff] %v20093_v38  ;;  %21974 = vst [vmem:[#allocation47_spill] sm:$0xff] %v20095_v15 }
 0x7f0   :  { %7219 = vrot.lane.b32.xlu0 %v4567_v28, %s17951_s11 }
 0x807   :  { %v4390_v48 = vpop.xlane.xlu1 %4389 }
 0x808   :  { %v4436_v58 = vsub.f32 %v19938_v11, %v4390_v48 }
 0x80a   :  { %v4452_v28 = vmul.f32 1.442695, %v4436_v58 }
 0x80b   :  { %v4393_v47 = vpop.xlane.xlu0 %4392 }
 0x80c   :  { %17662 = vpow2.f32 %v4452_v28  ;;  %v4437_v19 = vsub.f32 %v19942_v59, %v4393_v47 }
 0x80e   :  { %v4454_v25 = vmul.f32 1.442695, %v4437_v19 }
 0x80f   :  { %v4396_v41 = vpop.xlane.xlu1 %4395 }
 0x810   :  { %17664 = vpow2.f32 %v4454_v25  ;;  %v4438_v30 = vsub.f32 %v19946_v46, %v4396_v41 }
 0x812   :  { %v4456_v13 = vmul.f32 1.442695, %v4438_v30 }
 0x813   :  { %v4399_v33 = vpop.xlane.xlu0 %4398 }
 0x814   :  { %17666 = vpow2.f32 %v4456_v13  ;;  %v4439_v38 = vsub.f32 %v19950_v51, %v4399_v33 }
 0x816   :  { %v20101_v24 = vpop.eup %17662  ;;  %v4458_v15 = vmul.f32 1.442695, %v4439_v38 }
 0x817   :  { %v4405_v10 = vpop.xlane.xlu0 %4404  ;;  %v4402_v48 = vpop.xlane.xlu1 %4401  ;;  %v4484_v11 = vsel %vm4387_vm4, %v20101_v24, 0.0 }
 0x818   :  { %17668 = vpow2.f32 %v4458_v15  ;;  %v4441_v59 = vsub.f32 %v19954_v1, %v4405_v10  ;;  %v4440_v58 = vsub.f32 %v19956_v4, %v4402_v48  ;;  %4485 = vadd.xlane.f32.xlu1 %v4484_v11 }
 0x81a   :  { %v20107_v46 = vpop.eup %17664  ;;  %v4462_v30 = vmul.f32 1.442695, %v4441_v59  ;;  %v4460_v13 = vmul.f32 1.442695, %v4440_v58 }
 0x81b   :  { %v4487_v51 = vsel %vm4387_vm4, %v20107_v46, 0.0 }
 0x81c   :  { %17670 = vpow2.f32 %v4462_v30  ;;  %4488 = vadd.xlane.f32.xlu0 %v4487_v51 }
 0x81d   :  { %17672 = vpow2.f32 %v4460_v13 }
 0x81e   :  { %v20111_v38 = vpop.eup %17666 }
 0x81f   :  { %v4411_v33 = vpop.xlane.xlu0 %4410  ;;  %v4408_v47 = vpop.xlane.xlu1 %4407  ;;  %v4490_v15 = vsel %vm4387_vm4, %v20111_v38, 0.0 }
 0x820   :  { %v4443_v1 = vsub.f32 %v19964_v21, %v4411_v33  ;;  %v4442_v4 = vsub.f32 %v19962_v40, %v4408_v47  ;;  %4491 = vadd.xlane.f32.xlu1 %v4490_v15 }
 0x822   :  { %v20117_v10 = vpop.eup %17668  ;;  %v4466_v19 = vmul.f32 1.442695, %v4443_v1  ;;  %v4464_v25 = vmul.f32 1.442695, %v4442_v4 }
 0x823   :  { %v4493_v41 = vsel %vm4387_vm4, %v20117_v10, 0.0 }
 0x824   :  { %17674 = vpow2.f32 %v4466_v19  ;;  %4494 = vadd.xlane.f32.xlu0 %v4493_v41 }
 0x825   :  { %17676 = vpow2.f32 %v4464_v25 }
 0x826   :  { %v20121_v28 = vpop.eup %17670 }
 0x827   :  { %v20123_v48 = vpop.eup %17672  ;;  %v4417_v11 = vpop.xlane.xlu0 %4416  ;;  %v4499_v40 = vsel %vm4387_vm4, %v20121_v28, 0.0 }
 0x828   :  { %v4414_v59 = vpop.xlane.xlu1 %4413  ;;  %v4445_v21 = vsub.f32 %v19972_v53, %v4417_v11  ;;  %4500 = vadd.xlane.f32.xlu0 %v4499_v40  ;;  %v4496_v30 = vsel %vm4387_vm4, %v20123_v48, 0.0 }
 0x829   :  { %v4444_v58 = vsub.f32 %v19970_v22, %v4414_v59  ;;  %4497 = vadd.xlane.f32.xlu1 %v4496_v30 }
 0x82a   :  { %v4470_v13 = vmul.f32 1.442695, %v4445_v21 }
 0x82b   :  { %v4468_v51 = vmul.f32 1.442695, %v4444_v58 }
 0x82c   :  { %17678 = vpow2.f32 %v4470_v13 }
 0x82d   :  { %17680 = vpow2.f32 %v4468_v51 }
 0x82e   :  { %v20131_v33 = vpop.eup %17674 }
 0x82f   :  { %v20133_v47 = vpop.eup %17676  ;;  %v4423_v15 = vpop.xlane.xlu0 %4422  ;;  %v4505_v53 = vsel %vm4387_vm4, %v20131_v33, 0.0 }
 0x830   :  { %v4420_v1 = vpop.xlane.xlu1 %4419  ;;  %v4447_v22 = vsub.f32 %v19980_v5, %v4423_v15  ;;  %4506 = vadd.xlane.f32.xlu0 %v4505_v53  ;;  %v4502_v19 = vsel %vm4387_vm4, %v20133_v47, 0.0 }
 0x831   :  { %v4446_v4 = vsub.f32 %v19978_v27, %v4420_v1  ;;  %4503 = vadd.xlane.f32.xlu1 %v4502_v19 }
 0x832   :  { %v4474_v25 = vmul.f32 1.442695, %v4447_v22 }
 0x833   :  { %v4472_v41 = vmul.f32 1.442695, %v4446_v4 }
 0x834   :  { %17682 = vpow2.f32 %v4474_v25 }
 0x835   :  { %17684 = vpow2.f32 %v4472_v41 }
 0x836   :  { %v20141_v11 = vpop.eup %17678 }
 0x837   :  { %v20143_v59 = vpop.eup %17680  ;;  %v4426_v40 = vpop.xlane.xlu0 %4425  ;;  %v4511_v21 = vsel %vm4387_vm4, %v20141_v11, 0.0 }
 0x838   :  { %v4448_v5 = vsub.f32 %v19986_v16, %v4426_v40  ;;  %4512 = vadd.xlane.f32.xlu0 %v4511_v21  ;;  %v4508_v27 = vsel %vm4387_vm4, %v20143_v59, 0.0 }
 0x839   :  { %4509 = vadd.xlane.f32.xlu1 %v4508_v27 }
 0x83a   :  { %v4476_v58 = vmul.f32 1.442695, %v4448_v5 }
 0x83b   :  { %v4429_v30 = vpop.xlane.xlu0 %4428 }
 0x83c   :  { %17686 = vpow2.f32 %v4476_v58  ;;  %v4449_v13 = vsub.f32 %v19988_v52, %v4429_v30 }
 0x83e   :  { %v20151_v51 = vpop.eup %17682  ;;  %v4478_v15 = vmul.f32 1.442695, %v4449_v13 }
 0x83f   :  { %v20153_v1 = vpop.eup %17684  ;;  %v20155_v53 = vpop.xlane.xlu0 %4431  ;;  %v4517_v16 = vsel %vm4387_vm4, %v20151_v51, 0.0 }
 0x840   :  { %17688 = vpow2.f32 %v4478_v15  ;;  %4518 = vadd.xlane.f32.xlu0 %v4517_v16  ;;  %v4514_v22 = vsel %vm4387_vm4, %v20153_v1, 0.0 }
 0x841   :  { %4515 = vadd.xlane.f32.xlu1 %v4514_v22 }
 0x843   :  { %v5796_v4 = vpop.xlane.xlu1 %5795  ;;  %v4435_v19 = vpop.xlane.xlu0 %4434 }
 0x844   :  { %v5840_v52 = vsub.f32 %v20000_v49, %v5796_v4  ;;  %v4451_v40 = vsub.f32 %v19996_v12, %v4435_v19 }
 0x846   :  { %v20162_v25 = vpop.eup %17686  ;;  %v5857_v41 = vmul.f32 1.442695, %v5840_v52  ;;  %v4482_v30 = vmul.f32 1.442695, %v4451_v40 }
 0x847   :  { %21975 = vst [vmem:[#allocation48_spill] sm:$0xff] %v20162_v25  ;;  %v5793_v21 = vpop.xlane.xlu0 %5792  ;;  %v4520_v5 = vsel %vm4387_vm4, %v20162_v25, 0.0 }
 0x848   :  { %17690 = vpow2.f32 %v5857_v41  ;;  %v5839_v27 = vsub.f32 %v20002_v29, %v5793_v21  ;;  %4521 = vadd.xlane.f32.xlu1 %v4520_v5 }
 0x84a   :  { %v20168_v58 = vpop.eup %17688  ;;  %v5855_v13 = vmul.f32 1.442695, %v5839_v27 }
 0x84b   :  { %21976 = vst [vmem:[#allocation49_spill] sm:$0xff] %v20168_v58  ;;  %v5799_v15 = vpop.xlane.xlu0 %5798  ;;  %v4523_v49 = vsel %vm4387_vm4, %v20168_v58, 0.0  ;;  %v21980_v58 = vmov 0.0  }
 0x84c   :  { %17692 = vpow2.f32 %v5855_v13  ;;  %v5841_v16 = vsub.f32 %v20008_v62, %v5799_v15  ;;  %4524 = vadd.xlane.f32.xlu0 %v4523_v49 }
 0x84d   :  { %17694 = vpow2.f32 %v4482_v30  ;;  %v5805_v22 = vpop.xlane.xlu1 %5804 }
 0x84e   :  { %v5859_v12 = vmul.f32 1.442695, %v5841_v16  ;;  %v5843_v52 = vsub.f32 %v20014_v17, %v5805_v22 }
 0x84f   :  { %v5802_v4 = vpop.xlane.xlu0 %5801 }
 0x850   :  { %v5842_v19 = vsub.f32 %v20012_v31, %v5802_v4  ;;  %17696 = vpow2.f32 %v5859_v12  ;;  %v5863_v62 = vmul.f32 1.442695, %v5843_v52 }
 0x852   :  { %v20174_v29 = vpop.eup %17690  ;;  %v5861_v41 = vmul.f32 1.442695, %v5842_v19  ;;  %v5811_v30 = vpop.xlane.xlu1 %5810 }
 0x853   :  { %v5808_v40 = vpop.xlane.xlu0 %5807  ;;  %v5890_v21 = vsel %vm4387_vm4, %v20174_v29, 0.0  ;;  %v5845_v17 = vsub.f32 %v20024_v50, %v5811_v30 }
 0x854   :  { %5891 = vadd.xlane.f32.xlu1 %v5890_v21  ;;  %17698 = vpow2.f32 %v5861_v41  ;;  %v5844_v27 = vsub.f32 %v20020_v61, %v5808_v40 }
 0x855   :  { %17700 = vpow2.f32 %v5863_v62  ;;  %v5867_v61 = vmul.f32 1.442695, %v5845_v17 }
 0x856   :  { %v20179_v5 = vpop.eup %17692  ;;  %v5865_v49 = vmul.f32 1.442695, %v5844_v27  ;;  %v4568_v27 = vmul.f32 %v19934_v36, %v19480_v32 }
 0x857   :  { %v5814_v13 = vpop.xlane.xlu0 %5813  ;;  %v5887_v31 = vsel %vm4387_vm4, %v20179_v5, 0.0  ;;  %v20184_v15 = vpop.eup %17694 }
 0x858   :  { %21977 = vst [vmem:[#allocation50_spill] sm:$0xff] %v20184_v15  ;;  %5888 = vadd.xlane.f32.xlu0 %v5887_v31  ;;  %v4529_v16 = vsel %vm4387_vm4, %v20184_v15, 0.0  ;;  %17702 = vpow2.f32 %v5865_v49  ;;  %v5846_v4 = vsub.f32 %v20028_v57, %v5814_v13  ;;  %v5817_v19 = vpop.xlane.xlu1 %5816 }
 0x859   :  { %17704 = vpow2.f32 %v5867_v61  ;;  %v5847_v50 = vsub.f32 %v20032_v18, %v5817_v19 }
 0x85a   :  { %v20189_v12 = vpop.eup %17696  ;;  %v5869_v40 = vmul.f32 1.442695, %v5846_v4 }
 0x85b   :  { %v5820_v22 = vpop.xlane.xlu0 %5819  ;;  %v5893_v52 = vsel %vm4387_vm4, %v20189_v12, 0.0  ;;  %v5871_v13 = vmul.f32 1.442695, %v5847_v50 }
 0x85c   :  { %4530 = vadd.xlane.f32.xlu0 %v4529_v16  ;;  %v5823_v57 = vpop.xlane.xlu1 %5822  ;;  %17706 = vpow2.f32 %v5869_v40  ;;  %v5848_v31 = vsub.f32 %v20034_v37, %v5820_v22 }
 0x85d   :  { %17708 = vpow2.f32 %v5871_v13  ;;  %v5849_v16 = vsub.f32 %v20042_v60, %v5823_v57  ;;  %v4450_v57 = vsub.f32 %v19994_v56, %v20155_v53 }
 0x85e   :  { %v20194_v41 = vpop.eup %17698  ;;  %v5873_v61 = vmul.f32 1.442695, %v5848_v31 }
 0x85f   :  { %v5826_v21 = vpop.xlane.xlu0 %5825  ;;  %v5896_v62 = vsel %vm4387_vm4, %v20194_v41, 0.0  ;;  %v20201_v30 = vpop.eup %17700  ;;  %v5875_v50 = vmul.f32 1.442695, %v5849_v16 }
 0x860   :  { %5894 = vadd.xlane.f32.xlu0 %v5893_v52  ;;  %v5899_v18 = vsel %vm4387_vm4, %v20201_v30, 0.0  ;;  %17710 = vpow2.f32 %v5873_v61  ;;  %v5850_v16 = vsub.f32 %v20040_v6, %v5826_v21 }
 0x861   :  { %v5829_v4 = vpop.xlane.xlu1 %5828  ;;  %17712 = vpow2.f32 %v5875_v50 }
 0x862   :  { %v20207_v17 = vpop.eup %17702  ;;  %v5851_v37 = vsub.f32 %v20052_v35, %v5829_v4  ;;  %v5877_v56 = vmul.f32 1.442695, %v5850_v16 }
 0x863   :  { %v5832_v49 = vpop.xlane.xlu0 %5831  ;;  %v5902_v19 = vsel %vm4387_vm4, %v20207_v17, 0.0  ;;  %v20212_v52 = vpop.eup %17704 }
 0x864   :  { %5897 = vadd.xlane.f32.xlu0 %v5896_v62  ;;  %v5905_v40 = vsel %vm4387_vm4, %v20212_v52, 0.0  ;;  %v5879_v60 = vmul.f32 1.442695, %v5851_v37 }
 0x865   :  { %7296 = vrot.lane.b32.xlu1 %v4568_v27, %s17951_s11 }
 0x866   :  { %v20217_v62 = vpop.eup %17706  ;;  %17714 = vpow2.f32 %v5879_v60  ;;  %v5835_v50 = vpop.xlane.xlu1 %5834 }
 0x867   :  { %v5838_v22 = vpop.xlane.xlu0 %5837  ;;  %v5908_v13 = vsel %vm4387_vm4, %v20217_v62, 0.0  ;;  %v20224_v31 = vpop.eup %17708  ;;  %v5853_v6 = vsub.f32 %v20060_v42, %v5835_v50  ;;  %v4570_v50 = vmul.f32 %v19934_v36, %v19494_v14 }
 0x868   :  { %5900 = vadd.xlane.f32.xlu0 %v5899_v18  ;;  %v5854_v27 = vsub.f32 %v20058_v43, %v5838_v22  ;;  %v4480_v18 = vmul.f32 1.442695, %v4450_v57  ;;  %v5911_v61 = vsel %vm4387_vm4, %v20224_v31, 0.0  ;;  %v5852_v43 = vsub.f32 %v20050_v45, %v5832_v49 }
 0x86a   :  { %v5885_v35 = vmul.f32 1.442695, %v5854_v27  ;;  %v20229_v4 = vpop.eup %17710  ;;  %v5881_v21 = vmul.f32 1.442695, %v5852_v43  ;;  %v4572_v43 = vmul.f32 %v19934_v36, %v19506_v55 }
 0x86b   :  { %v5914_v53 = vsel %vm4387_vm4, %v20229_v4, 0.0 }
 0x86c   :  { %5903 = vadd.xlane.f32.xlu0 %v5902_v19  ;;  %17716 = vpow2.f32 %v5885_v35  ;;  %v20234_v19 = vpop.eup %17712 }
 0x86d   :  { %17718 = vpow2.f32 %v4480_v18  ;;  %v5917_v37 = vsel %vm4387_vm4, %v20234_v19, 0.0 }
 0x86e   :  { %17720 = vpow2.f32 %v5877_v56  ;;  %v4569_v56 = vmul.f32 %v19934_v36, %v19487_v34 }
 0x86f   :  { %17722 = vpow2.f32 %v5881_v21  ;;  %v4571_v21 = vmul.f32 %v19934_v36, %v19504_v63 }
 0x870   :  { %5906 = vadd.xlane.f32.xlu0 %v5905_v40  ;;  %v20239_v22 = vpop.eup %17714  ;;  %v5883_v40 = vmul.f32 1.442695, %v5853_v6  ;;  %v4576_v6 = vmul.f32 %v19934_v36, %v19534_v3 }
 0x871   :  { %v5923_v45 = vsel %vm4387_vm4, %v20239_v22, 0.0 }
 0x872   :  { %17724 = vpow2.f32 %v5883_v40  ;;  %v4573_v40 = vmul.f32 %v19934_v36, %v19518_v39 }
 0x874   :  { %5909 = vadd.xlane.f32.xlu0 %v5908_v13 }
 0x876   :  { %v20243_v49 = vpop.eup %17716 }
 0x877   :  { %v20245_v60 = vpop.eup %17718  ;;  %v5932_v42 = vsel %vm4387_vm4, %v20243_v49, 0.0 }
 0x878   :  { %5912 = vadd.xlane.f32.xlu0 %v5911_v61  ;;  %21978 = vst [vmem:[#allocation53_spill] sm:$0xff] %v20245_v60  ;;  %v4526_v27 = vsel %vm4387_vm4, %v20245_v60, 0.0  ;;  %v20251_v57 = vpop.eup %17720 }
 0x879   :  { %v5920_v13 = vsel %vm4387_vm4, %v20251_v57, 0.0  ;;  %v20255_v35 = vpop.eup %17722 }
 0x87a   :  { %v5926_v18 = vsel %vm4387_vm4, %v20255_v35, 0.0 }
 0x87c   :  { %5915 = vadd.xlane.f32.xlu0 %v5914_v53  ;;  %v20259_v16 = vpop.eup %17724  ;;  %v4574_v53 = vmul.f32 %v19934_v36, %v19520_v54 }
 0x87d   :  { %v5929_v61 = vsel %vm4387_vm4, %v20259_v16, 0.0 }
 0x880   :  { %5918 = vadd.xlane.f32.xlu0 %v5917_v37  ;;  %v4578_v37 = vmul.f32 %v19934_v36, %v19548_v9 }
 0x884   :  { %5924 = vadd.xlane.f32.xlu0 %v5923_v45  ;;  %v4580_v45 = vmul.f32 %v19934_v36, %v19562_v20 }
 0x888   :  { %5933 = vadd.xlane.f32.xlu0 %v5932_v42  ;;  %v4575_v42 = vmul.f32 %v19934_v36, %v19532_v2 }
 0x889   :  { %4527 = vadd.xlane.f32.xlu1 %v4526_v27  ;;  %v4582_v27 = vmul.f32 %v19934_v36, %v19576_v44 }
 0x88d   :  { %5921 = vadd.xlane.f32.xlu1 %v5920_v13  ;;  %v4577_v13 = vmul.f32 %v19934_v36, %v19546_v8 }
 0x891   :  { %5927 = vadd.xlane.f32.xlu1 %v5926_v18  ;;  %v4579_v18 = vmul.f32 %v19934_v36, %v19560_v23 }
 0x895   :  { %5930 = vadd.xlane.f32.xlu1 %v5929_v61  ;;  %v20304_v61 = vld [vmem:[%s21702_s13 + $0x2] ss:$0 sm:$0xff] }
 0x896   :  { %21979 = vst [vmem:[#allocation54_spill] sm:$0xff] %v20304_v61 }
 0x89e   :  { %7373 = vrot.lane.b32.xlu0 %v4569_v56, %s17951_s11  ;;  %v4581_v56 = vmul.f32 %v19934_v36, %v19574_v26 }
 0x8a2   :  { %7604 = vrot.lane.b32.xlu0 %v4572_v43, %s17951_s11  ;;  %v20312_v43 = vpop.permute.xlu0 %7219 }
 0x8a6   :  { %7758 = vrot.lane.b32.xlu0 %v4574_v53, %s17951_s11  ;;  %7450 = vrot.lane.b32.xlu1 %v4570_v50, %s17951_s11  ;;  %v20314_v53 = vpop.xlane.xlu1 %4485 }
 0x8a9   :  { %v20316_v50 = vpop.xlane.xlu0 %4488 }
 0x8aa   :  { %7912 = vrot.lane.b32.xlu0 %v4576_v6, %s17951_s11  ;;  %7527 = vrot.lane.b32.xlu1 %v4571_v21, %s17951_s11 }
 0x8ad   :  { %v20318_v6 = vpop.xlane.xlu1 %4491 }
 0x8ae   :  { %8066 = vrot.lane.b32.xlu0 %v4578_v37, %s17951_s11  ;;  %7681 = vrot.lane.b32.xlu1 %v4573_v40, %s17951_s11 }
 0x8b1   :  { %v20320_v21 = vpop.xlane.xlu0 %4494 }
 0x8b2   :  { %8220 = vrot.lane.b32.xlu0 %v4580_v45, %s17951_s11  ;;  %7835 = vrot.lane.b32.xlu1 %v4575_v42, %s17951_s11 }
 0x8b5   :  { %v20324_v40 = vpop.xlane.xlu0 %4500 }
 0x8b6   :  { %8374 = vrot.lane.b32.xlu0 %v4582_v27, %s17951_s11  ;;  %7989 = vrot.lane.b32.xlu1 %v4577_v13, %s17951_s11  ;;  %v20322_v37 = vpop.xlane.xlu1 %4497 }
 0x8ba   :  { %8143 = vrot.lane.b32.xlu1 %v4579_v18, %s17951_s11  ;;  %9834 = vrot.lane.b32.xlu0 %v20304_v61, %s17951_s11 }
 0x8bd   :  { %v20328_v42 = vpop.xlane.xlu0 %4506 }
 0x8be   :  { %8297 = vrot.lane.b32.xlu1 %v4581_v56, %s17951_s11  ;;  %v20326_v45 = vpop.xlane.xlu1 %4503 }
 0x8c5   :  { %v20332_v27 = vpop.xlane.xlu0 %4512 }
 0x8c6   :  { %v20330_v36 = vpop.xlane.xlu1 %4509 }
 0x8cd   :  { %v20336_v18 = vpop.xlane.xlu0 %4518 }
 0x8ce   :  { %v20334_v13 = vpop.xlane.xlu1 %4515 }
 0x8d5   :  { %v20338_v56 = vpop.xlane.xlu1 %4521 }
 0x8d9   :  { %v20340_v44 = vpop.xlane.xlu0 %4524 }
 0x8e1   :  { %v5892_v26 = vpop.xlane.xlu1 %5891 }
 0x8e2   :  { %17726 = vrcp.f32 %v5892_v26 }
 0x8e5   :  { %v5889_v20 = vpop.xlane.xlu0 %5888 }
 0x8e6   :  { %17728 = vrcp.f32 %v5889_v20 }
 0x8e9   :  { %v20342_v23 = vpop.xlane.xlu0 %4530 }
 0x8ec   :  { %v17727_v9 = vpop.eup %17726 }
 0x8ed   :  { %v5895_v61 = vpop.xlane.xlu0 %5894  ;;  %v5952_v15 = vmul.f32 %v17727_v9, %v20174_v29 }
 0x8ee   :  { %17730 = vrcp.f32 %v5895_v61  ;;  %v21982_v61 = vld [vmem:[#allocation38_spill] sm:$0xff] }
 0x8ef   :  { %16579 = vmatmul.mubr.msk.f32.vlgmr.msra.gmra.mrb[96].mxu0 %vm4387_vm4, %v5952_v15 }
 0x8f0   :  { %v17729_v60 = vpop.eup %17728  ;;  %16587 = vmatpush3.msra.mxu0 %v20066_v0  ;;  %16588 = vmatprep.mubr.msk.f32.mxu0 %vm17948_vm3, %v21980_v58 }
 0x8f1   :  { %v5898_v25 = vpop.xlane.xlu0 %5897  ;;  %v5951_v26 = vmul.f32 %v17729_v60, %v20179_v5  ;;  %16596 = vmatprep.subr.mxu0 %v21980_v58 }
 0x8f2   :  { %17732 = vrcp.f32 %v5898_v25  ;;  %v21981_v25 = vld [vmem:[#allocation35_spill] sm:$0xff] }
 0x8f3   :  { %16574 = vmatmul.mubr.msk.f32.vlgmr.msra.gmra.mrb[80].mxu1 %vm4387_vm4, %v5951_v26 }
 0x8f4   :  { %16582 = vmatpush3.msra.mxu1 %v20068_v7  ;;  %16583 = vmatprep.mubr.msk.f32.mxu1 %vm17948_vm3, %v21980_v58 }
 0x8f5   :  { %v5901_v9 = vpop.xlane.xlu0 %5900  ;;  %16591 = vmatprep.subr.mxu1 %v21980_v58 }
 0x8f6   :  { %17734 = vrcp.f32 %v5901_v9  ;;  %v21983_v9 = vld [vmem:[#allocation39_spill] sm:$0xff] }
 0x8f8   :  { %v17731_v20 = vpop.eup %17730 }
 0x8f9   :  { %v5904_v0 = vpop.xlane.xlu0 %5903  ;;  %v5953_v29 = vmul.f32 %v17731_v20, %v20189_v12 }
 0x8fa   :  { %17736 = vrcp.f32 %v5904_v0 }
 0x8fb   :  { %16584 = vmatmul.mubr.msk.f32.vlgmr.msra.gmra.mrb[82].mxu1 %vm4387_vm4, %v5953_v29  ;;  %v21984_v29 = vld [vmem:[#allocation36_spill] sm:$0xff] }
 0x8fc   :  { %v17733_v5 = vpop.eup %17732  ;;  %16592 = vmatpush3.msra.mxu1 %v21981_v25  ;;  %16593 = vmatprep.mubr.msk.f32.mxu1 %vm17948_vm3, %v21980_v58 }
 0x8fd   :  { %v5907_v7 = vpop.xlane.xlu0 %5906  ;;  %v5954_v15 = vmul.f32 %v17733_v5, %v20194_v41  ;;  %16601 = vmatprep.subr.mxu1 %v21980_v58 }
 0x8fe   :  { %17738 = vrcp.f32 %v5907_v7  ;;  %v21985_v7 = vld [vmem:[#allocation41_spill] sm:$0xff] }
 0x8ff   :  { %16589 = vmatmul.mubr.msk.f32.vlgmr.msra.gmra.mrb[98].mxu0 %vm4387_vm4, %v5954_v15 }
 0x900   :  { %v17735_v60 = vpop.eup %17734  ;;  %16597 = vmatpush3.msra.mxu0 %v21982_v61  ;;  %16598 = vmatprep.mubr.msk.f32.mxu0 %vm17948_vm3, %v21980_v58  ;;  %v21986_v61 = vld [vmem:[#allocation40_spill] sm:$0xff] }
 0x901   :  { %v5910_v12 = vpop.xlane.xlu0 %5909  ;;  %v5955_v26 = vmul.f32 %v17735_v60, %v20201_v30  ;;  %16606 = vmatprep.subr.mxu0 %v21980_v58 }
 0x902   :  { %17740 = vrcp.f32 %v5910_v12 }
 0x903   :  { %16594 = vmatmul.mubr.msk.f32.vlgmr.msra.gmra.mrb[84].mxu1 %vm4387_vm4, %v5955_v26 }
 0x904   :  { %v17737_v41 = vpop.eup %17736  ;;  %16602 = vmatpush3.msra.mxu1 %v21983_v9  ;;  %16603 = vmatprep.mubr.msk.f32.mxu1 %vm17948_vm3, %v21980_v58  ;;  %v21987_v9 = vld [vmem:[#allocation45_spill] sm:$0xff] }
 0x905   :  { %v5913_v20 = vpop.xlane.xlu0 %5912  ;;  %v5956_v0 = vmul.f32 %v17737_v41, %v20207_v17  ;;  %16611 = vmatprep.subr.mxu1 %v21980_v58  ;;  %v20393_v41 = vpop.permute.xlu1 %7296 }
 0x906   :  { %17742 = vrcp.f32 %v5913_v20 }
 0x907   :  { %16599 = vmatmul.mubr.msk.f32.vlgmr.msra.gmra.mrb[100].mxu0 %vm4387_vm4, %v5956_v0 }
 0x908   :  { %v17739_v30 = vpop.eup %17738  ;;  %16607 = vmatpush3.msra.mxu0 %v21984_v29  ;;  %16608 = vmatprep.mubr.msk.f32.mxu0 %vm17948_vm3, %v21980_v58  ;;  %v21988_v29 = vld [vmem:[#allocation42_spill] sm:$0xff] }
 0x909   :  { %v5916_v5 = vpop.xlane.xlu0 %5915  ;;  %v5957_v25 = vmul.f32 %v17739_v30, %v20212_v52  ;;  %16616 = vmatprep.subr.mxu0 %v21980_v58 }
 0x90a   :  { %17744 = vrcp.f32 %v5916_v5 }
 0x90b   :  { %16604 = vmatmul.mubr.msk.f32.vlgmr.msra.gmra.mrb[86].mxu1 %vm4387_vm4, %v5957_v25 }
 0x90c   :  { %v17741_v17 = vpop.eup %17740  ;;  %16612 = vmatpush3.msra.mxu1 %v21985_v7  ;;  %16613 = vmatprep.mubr.msk.f32.mxu1 %vm17948_vm3, %v21980_v58  ;;  %v21989_v7 = vld [vmem:[#allocation43_spill] sm:$0xff] }
 0x90d   :  { %v5919_v15 = vpop.xlane.xlu0 %5918  ;;  %v5958_v60 = vmul.f32 %v17741_v17, %v20217_v62  ;;  %16621 = vmatprep.subr.mxu1 %v21980_v58 }
 0x90e   :  { %17746 = vrcp.f32 %v5919_v15 }
 0x90f   :  { %16609 = vmatmul.mubr.msk.f32.vlgmr.msra.gmra.mrb[102].mxu0 %vm4387_vm4, %v5958_v60 }
 0x910   :  { %v17743_v52 = vpop.eup %17742  ;;  %16617 = vmatpush3.msra.mxu0 %v21986_v61  ;;  %16618 = vmatprep.mubr.msk.f32.mxu0 %vm17948_vm3, %v21980_v58 }
 0x911   :  { %v5959_v12 = vmul.f32 %v17743_v52, %v20224_v31  ;;  %v5925_v26 = vpop.xlane.xlu0 %5924  ;;  %16626 = vmatprep.subr.mxu0 %v21980_v58  ;;  %v21990_v52 = vld [vmem:[#allocation47_spill] sm:$0xff] }
 0x912   :  { %17748 = vrcp.f32 %v5925_v26 }
 0x913   :  { %16614 = vmatmul.mubr.msk.f32.vlgmr.msra.gmra.mrb[88].mxu1 %vm4387_vm4, %v5959_v12 }
 0x914   :  { %v17745_v62 = vpop.eup %17744  ;;  %16622 = vmatpush3.msra.mxu1 %v21987_v9  ;;  %16623 = vmatprep.mubr.msk.f32.mxu1 %vm17948_vm3, %v21980_v58 }
 0x915   :  { %v5960_v20 = vmul.f32 %v17745_v62, %v20229_v4  ;;  %v5934_v0 = vpop.xlane.xlu0 %5933  ;;  %16631 = vmatprep.subr.mxu1 %v21980_v58 }
 0x916   :  { %v20401_v31 = vpop.xlane.xlu1 %4527 }
 0x917   :  { %16619 = vmatmul.mubr.msk.f32.vlgmr.msra.gmra.mrb[104].mxu0 %vm4387_vm4, %v5960_v20  ;;  %v21991_v20 = vld [vmem:[#allocation46_spill] sm:$0xff] }
 0x918   :  { %v17747_v30 = vpop.eup %17746  ;;  %16627 = vmatpush3.msra.mxu0 %v21988_v29  ;;  %16628 = vmatprep.mubr.msk.f32.mxu0 %vm17948_vm3, %v21980_v58  ;;  %v21992_v29 = vld [vmem:[#allocation44_spill] sm:$0xff] }
 0x919   :  { %v5961_v5 = vmul.f32 %v17747_v30, %v20234_v19  ;;  %v20408_v25 = vpop.permute.xlu0 %7373  ;;  %16636 = vmatprep.subr.mxu0 %v21980_v58 }
 0x91a   :  { %v5922_v4 = vpop.xlane.xlu1 %5921 }
 0x91b   :  { %17750 = vrcp.f32 %v5922_v4  ;;  %16624 = vmatmul.mubr.msk.f32.vlgmr.msra.gmra.mrb[90].mxu1 %vm4387_vm4, %v5961_v5 }
 0x91c   :  { %v17749_v17 = vpop.eup %17748  ;;  %16632 = vmatpush3.msra.mxu1 %v21989_v7  ;;  %16633 = vmatprep.mubr.msk.f32.mxu1 %vm17948_vm3, %v21980_v58 }
 0x91d   :  { %v5963_v15 = vmul.f32 %v17749_v17, %v20239_v22  ;;  %v20416_v60 = vpop.permute.xlu0 %7604  ;;  %16641 = vmatprep.subr.mxu1 %v21980_v58 }
 0x91e   :  { %v5928_v19 = vpop.xlane.xlu1 %5927 }
 0x91f   :  { %17752 = vrcp.f32 %v5928_v19  ;;  %16634 = vmatmul.mubr.msk.f32.vlgmr.msra.gmra.mrb[92].mxu1 %vm4387_vm4, %v5963_v15 }
 0x920   :  { %16642 = vmatpush3.msra.mxu1 %v21990_v52  ;;  %16643 = vmatprep.mubr.msk.f32.mxu1 %vm17948_vm3, %v21980_v58  ;;  %17754 = vrcp.f32 %v5934_v0 }
 0x921   :  { %v20423_v61 = vpop.permute.xlu0 %7758  ;;  %16651 = vmatprep.subr.mxu1 %v21980_v58 }
 0x922   :  { %v5931_v12 = vpop.xlane.xlu1 %5930 }
 0x923   :  { %17756 = vrcp.f32 %v5931_v12 }
 0x924   :  { %17758 = vrcp.f32 %v20314_v53 }
 0x925   :  { %v17751_v22 = vpop.eup %17750  ;;  %17760 = vrcp.f32 %v20316_v50  ;;  %v20428_v26 = vpop.permute.xlu0 %7912 }
 0x926   :  { %v5962_v62 = vmul.f32 %v17751_v22, %v20251_v57  ;;  %17762 = vrcp.f32 %v20318_v6  ;;  %v7451_v30 = vpop.permute.xlu1 %7450 }
 0x927   :  { %17764 = vrcp.f32 %v20320_v21 }
 0x928   :  { %16629 = vmatmul.mubr.msk.f32.vlgmr.msra.gmra.mrb[106].mxu0 %vm4387_vm4, %v5962_v62  ;;  %17766 = vrcp.f32 %v20324_v40 }
 0x929   :  { %v17753_v9 = vpop.eup %17752  ;;  %16637 = vmatpush3.msra.mxu0 %v21991_v20  ;;  %v20434_v0 = vpop.permute.xlu0 %8066  ;;  %16638 = vmatprep.mubr.msk.f32.mxu0 %vm17948_vm3, %v21980_v58  ;;  %17768 = vrcp.f32 %v20322_v37 }
 0x92a   :  { %16646 = vmatprep.subr.mxu0 %v21980_v58  ;;  %v5964_v53 = vmul.f32 %v17753_v9, %v20255_v35  ;;  %v17755_v50 = vpop.eup %17754  ;;  %17770 = vrcp.f32 %v20328_v42  ;;  %v7528_v40 = vpop.permute.xlu1 %7527 }
 0x92b   :  { %v5966_v21 = vmul.f32 %v17755_v50, %v20243_v49  ;;  %17772 = vrcp.f32 %v20326_v45 }
 0x92c   :  { %16639 = vmatmul.mubr.msk.f32.vlgmr.msra.gmra.mrb[108].mxu0 %vm4387_vm4, %v5964_v53  ;;  %17774 = vrcp.f32 %v20332_v27 }
 0x92d   :  { %v17757_v57 = vpop.eup %17756  ;;  %16647 = vmatpush3.msra.mxu0 %v21992_v29  ;;  %v20443_v6 = vpop.permute.xlu0 %8220  ;;  %16648 = vmatprep.mubr.msk.f32.mxu0 %vm17948_vm3, %v21980_v58  ;;  %17776 = vrcp.f32 %v20330_v36 }
 0x92e   :  { %v17759_v5 = vpop.eup %17758  ;;  %16656 = vmatprep.subr.mxu0 %v21980_v58  ;;  %v5965_v35 = vmul.f32 %v17757_v57, %v20259_v16  ;;  %v7682_v19 = vpop.permute.xlu1 %7681  ;;  %17778 = vrcp.f32 %v20336_v18 }
 0x92f   :  { %v17761_v4 = vpop.eup %17760  ;;  %v4548_v49 = vmul.f32 %v17759_v5, %v20101_v24  ;;  %17780 = vrcp.f32 %v20334_v13 }
 0x930   :  { %16644 = vmatmul.mubr.msk.f32.vlgmr.msra.gmra.mrb[94].mxu1 %vm4387_vm4, %v5965_v35  ;;  %16649 = vmatmul.mubr.msk.f32.vlgmr.msra.gmra.mrb[110].mxu0 %vm4387_vm4, %v5966_v21  ;;  %v4549_v16 = vmul.f32 %v17761_v4, %v20107_v46  ;;  %v17763_v37 = vpop.eup %17762  ;;  %v21993_v46 = vld [vmem:[#allocation14_spill] sm:$0xff]  ;;  %17782 = vrcp.f32 %v20338_v56  ;;  %v21996_v21 = vld [vmem:[#allocation53_spill] sm:$0xff] }
 0x931   :  { %16652 = vmatpush3.msra.mxu1 %v20312_v43  ;;  %16657 = vmatpush3.msra.mxu0 %v20393_v41  ;;  %v20456_v17 = vpop.permute.xlu0 %8374  ;;  %v17765_v43 = vpop.eup %17764  ;;  %v4550_v41 = vmul.f32 %v17763_v37, %v20111_v38  ;;  %17784 = vrcp.f32 %v20340_v44  ;;  %v21997_v4 = vld [vmem:[#allocation50_spill] sm:$0xff] }
 0x932   :  { %16653 = vmatprep.mubr.msk.f32.mxu1 %vm17948_vm3, %v21980_v58  ;;  %16658 = vmatprep.mubr.msk.f32.mxu0 %vm17948_vm3, %v21980_v58  ;;  %v17767_v7 = vpop.eup %17766  ;;  %v7836_v12 = vpop.permute.xlu1 %7835  ;;  %17786 = vrcp.f32 %v20401_v31  ;;  %v22000_v37 = vld [vmem:[#allocation54_spill] sm:$0xff] }
 0x933   :  { %16661 = vmatprep.subr.mxu1 %v21980_v58  ;;  %16666 = vmatprep.subr.mxu0 %v21980_v58  ;;  %v17769_v15 = vpop.eup %17768  ;;  %v4553_v27 = vmul.f32 %v17767_v7, %v20121_v28  ;;  %17788 = vrcp.f32 %v20342_v23  ;;  %v22003_v7 = vld [vmem:[#allocation25_spill] sm:$0xff] }
 0x934   :  { %16654 = vmatmul.mubr.msk.f32.vlgmr.msra.gmra.mrb[80].mxu1 %vm4387_vm4, %v4548_v49  ;;  %16659 = vmatmul.mubr.msk.f32.vlgmr.msra.gmra.mrb[96].mxu0 %vm4387_vm4, %v4549_v16  ;;  %v4552_v36 = vmul.f32 %v17769_v15, %v20123_v48  ;;  %v21999_v16 = vld [vmem:[#allocation19_spill] sm:$0xff]  ;;  %v22004_v15 = vld [vmem:[#allocation24_spill] sm:$0xff] }
 0x935   :  { %16662 = vmatpush3.msra.mxu1 %v20408_v25  ;;  %16667 = vmatpush3.msra.mxu0 %v7451_v30  ;;  %v20471_v24 = vpop.permute.xlu0 %9834  ;;  %v4551_v25 = vmul.f32 %v17765_v43, %v20117_v10  ;;  %v21995_v30 = vld [vmem:[#allocation49_spill] sm:$0xff]  ;;  %v8459_v43 = vmul.f32 %v22000_v37, %v19480_v32 }
 0x936   :  { %16663 = vmatprep.mubr.msk.f32.mxu1 %vm17948_vm3, %v21980_v58  ;;  %16668 = vmatprep.mubr.msk.f32.mxu0 %vm17948_vm3, %v21980_v58  ;;  %v9837_v42 = vmul.f32 %v20471_v24, %v21993_v46  ;;  %v9838_v45 = vmul.f32 %v20471_v24, %v19480_v32  ;;  %v9839_v38 = vmul.f32 %v20471_v24, %v19487_v34 }
 0x937   :  { %16671 = vmatprep.subr.mxu1 %v21980_v58  ;;  %16676 = vmatprep.subr.mxu0 %v21980_v58  ;;  %v9840_v10 = vmul.f32 %v20471_v24, %v19494_v14  ;;  %v9842_v28 = vmul.f32 %v20471_v24, %v19506_v55  ;;  %v9841_v48 = vmul.f32 %v20471_v24, %v19504_v63 }
 0x938   :  { %9854 = vrot.lane.b32.xlu0 %v9837_v42, %s17951_s11  ;;  %9931 = vrot.lane.b32.xlu1 %v9838_v45, %s17951_s11  ;;  %v9843_v44 = vmul.f32 %v20471_v24, %v19518_v39  ;;  %v9846_v23 = vmul.f32 %v20471_v24, %v19534_v3  ;;  %v22001_v42 = vld [vmem:[#allocation20_spill] sm:$0xff]  ;;  %v22002_v45 = vld [vmem:[#allocation23_spill] sm:$0xff] }
 0x939   :  { %16664 = vmatmul.mubr.msk.f32.vlgmr.msra.gmra.mrb[82].mxu1 %vm4387_vm4, %v4550_v41  ;;  %16669 = vmatmul.mubr.msk.f32.vlgmr.msra.gmra.mrb[98].mxu0 %vm4387_vm4, %v4551_v25  ;;  %v8460_v41 = vmul.f32 %v22000_v37, %v19487_v34  ;;  %v8461_v25 = vmul.f32 %v22000_v37, %v19494_v14 }
 0x93a   :  { %16672 = vmatpush3.msra.mxu1 %v7528_v40  ;;  %16677 = vmatpush3.msra.mxu0 %v20416_v60  ;;  %v17771_v60 = vpop.eup %17770  ;;  %v8458_v40 = vmul.f32 %v22000_v37, %v21993_v46 }
 0x93b   :  { %16673 = vmatprep.mubr.msk.f32.mxu1 %vm17948_vm3, %v21980_v58  ;;  %16678 = vmatprep.mubr.msk.f32.mxu0 %vm17948_vm3, %v21980_v58  ;;  %v17773_v52 = vpop.eup %17772  ;;  %v4555_v18 = vmul.f32 %v17771_v60, %v20131_v33  ;;  %v9844_v33 = vmul.f32 %v20471_v24, %v19520_v54  ;;  %v8465_v60 = vmul.f32 %v22000_v37, %v19520_v54 }
 0x93c   :  { %16681 = vmatprep.subr.mxu1 %v21980_v58  ;;  %16686 = vmatprep.subr.mxu0 %v21980_v58  ;;  %v4554_v13 = vmul.f32 %v17773_v52, %v20133_v47  ;;  %v7990_v47 = vpop.permute.xlu1 %7989  ;;  %v22007_v52 = vld [vmem:[#allocation27_spill] sm:$0xff] }
 0x93d   :  { %10008 = vrot.lane.b32.xlu0 %v9839_v38, %s17951_s11  ;;  %10085 = vrot.lane.b32.xlu1 %v9840_v10, %s17951_s11  ;;  %v8463_v38 = vmul.f32 %v22000_v37, %v19506_v55  ;;  %v22005_v10 = vld [vmem:[#allocation29_spill] sm:$0xff] }
 0x93e   :  { %16674 = vmatmul.mubr.msk.f32.vlgmr.msra.gmra.mrb[84].mxu1 %vm4387_vm4, %v4552_v36  ;;  %16679 = vmatmul.mubr.msk.f32.vlgmr.msra.gmra.mrb[100].mxu0 %vm4387_vm4, %v4553_v27  ;;  %v22006_v36 = vld [vmem:[#allocation26_spill] sm:$0xff]  ;;  %v8464_v27 = vmul.f32 %v22000_v37, %v19518_v39 }
 0x93f   :  { %16682 = vmatpush3.msra.mxu1 %v7682_v19  ;;  %16687 = vmatpush3.msra.mxu0 %v20423_v61  ;;  %v17775_v61 = vpop.eup %17774  ;;  %v8462_v19 = vmul.f32 %v22000_v37, %v19504_v63 }
 0x940   :  { %16683 = vmatprep.mubr.msk.f32.mxu1 %vm17948_vm3, %v21980_v58  ;;  %16688 = vmatprep.mubr.msk.f32.mxu0 %vm17948_vm3, %v21980_v58  ;;  %v17777_v22 = vpop.eup %17776 }
 0x941   :  { %16691 = vmatprep.subr.mxu1 %v21980_v58  ;;  %16696 = vmatprep.subr.mxu0 %v21980_v58  ;;  %v4556_v56 = vmul.f32 %v17777_v22, %v20143_v59  ;;  %v17779_v62 = vpop.eup %17778  ;;  %v8144_v59 = vpop.permute.xlu1 %8143  ;;  %v22011_v22 = vld [vmem:[#allocation15_spill] sm:$0xff] }
 0x942   :  { %10239 = vrot.lane.b32.xlu0 %v9842_v28, %s17951_s11  ;;  %10162 = vrot.lane.b32.xlu1 %v9841_v48, %s17951_s11  ;;  %v17781_v9 = vpop.eup %17780  ;;  %v4559_v20 = vmul.f32 %v17779_v62, %v20151_v51  ;;  %v9847_v51 = vmul.f32 %v20471_v24, %v19546_v8  ;;  %v8466_v28 = vmul.f32 %v22000_v37, %v19532_v2  ;;  %v22015_v62 = vld [vmem:[#allocation17_spill] sm:$0xff] }
 0x943   :  { %16684 = vmatmul.mubr.msk.f32.vlgmr.msra.gmra.mrb[86].mxu1 %vm4387_vm4, %v4554_v13  ;;  %16689 = vmatmul.mubr.msk.f32.vlgmr.msra.gmra.mrb[102].mxu0 %vm4387_vm4, %v4555_v18  ;;  %v4558_v31 = vmul.f32 %v17781_v9, %v20153_v1  ;;  %v21994_v1 = vld [vmem:[#allocation48_spill] sm:$0xff]  ;;  %v8467_v48 = vmul.f32 %v22000_v37, %v19534_v3  ;;  %v22009_v13 = vld [vmem:[#allocation31_spill] sm:$0xff]  ;;  %v8471_v9 = vmul.f32 %v22000_v37, %v22015_v62 }
 0x944   :  { %16692 = vmatpush3.msra.mxu1 %v7836_v12  ;;  %16697 = vmatpush3.msra.mxu0 %v20428_v26  ;;  %v4557_v26 = vmul.f32 %v17775_v61, %v20141_v11  ;;  %v9845_v11 = vmul.f32 %v20471_v24, %v19532_v2  ;;  %v22008_v12 = vld [vmem:[#allocation30_spill] sm:$0xff]  ;;  %v22010_v18 = vld [vmem:[#allocation28_spill] sm:$0xff]  ;;  %v8468_v61 = vmul.f32 %v22000_v37, %v19546_v8 }
 0x945   :  { %16693 = vmatprep.mubr.msk.f32.mxu1 %vm17948_vm3, %v21980_v58  ;;  %16698 = vmatprep.mubr.msk.f32.mxu0 %vm17948_vm3, %v21980_v58 }
 0x946   :  { %16701 = vmatprep.subr.mxu1 %v21980_v58  ;;  %16706 = vmatprep.subr.mxu0 %v21980_v58 }
 0x947   :  { %10393 = vrot.lane.b32.xlu0 %v9844_v33, %s17951_s11  ;;  %10316 = vrot.lane.b32.xlu1 %v9843_v44, %s17951_s11  ;;  %v22012_v33 = vld [vmem:[#allocation33_spill] sm:$0xff]  ;;  %v22013_v44 = vld [vmem:[#allocation32_spill] sm:$0xff] }
 0x948   :  { %16694 = vmatmul.mubr.msk.f32.vlgmr.msra.gmra.mrb[88].mxu1 %vm4387_vm4, %v4556_v56  ;;  %16699 = vmatmul.mubr.msk.f32.vlgmr.msra.gmra.mrb[104].mxu0 %vm4387_vm4, %v4557_v26  ;;  %v22014_v56 = vld [vmem:[#allocation16_spill] sm:$0xff] }
 0x949   :  { %16702 = vmatpush3.msra.mxu1 %v7990_v47  ;;  %16707 = vmatpush3.msra.mxu0 %v20434_v0  ;;  %v17783_v0 = vpop.eup %17782  ;;  %v8469_v47 = vmul.f32 %v22000_v37, %v22011_v22  ;;  %v8470_v26 = vmul.f32 %v22000_v37, %v22014_v56 }
 0x94a   :  { %16703 = vmatprep.mubr.msk.f32.mxu1 %vm17948_vm3, %v21980_v58  ;;  %16708 = vmatprep.mubr.msk.f32.mxu0 %vm17948_vm3, %v21980_v58  ;;  %v17785_v53 = vpop.eup %17784  ;;  %v4560_v50 = vmul.f32 %v17783_v0, %v21994_v1 }
 0x94b   :  { %16711 = vmatprep.subr.mxu1 %v21980_v58  ;;  %16716 = vmatprep.subr.mxu0 %v21980_v58  ;;  %v17787_v57 = vpop.eup %17786  ;;  %v4561_v29 = vmul.f32 %v17785_v53, %v21995_v30 }
 0x94c   :  { %10547 = vrot.lane.b32.xlu0 %v9846_v23, %s17951_s11  ;;  %10470 = vrot.lane.b32.xlu1 %v9845_v11, %s17951_s11  ;;  %v17789_v5 = vpop.eup %17788  ;;  %v4562_v35 = vmul.f32 %v17787_v57, %v21996_v21  ;;  %v22016_v23 = vld [vmem:[#allocation37_spill] sm:$0xff]  ;;  %v22017_v11 = vld [vmem:[#allocation34_spill] sm:$0xff] }
 0x94d   :  { %16704 = vmatmul.mubr.msk.f32.vlgmr.msra.gmra.mrb[90].mxu1 %vm4387_vm4, %v4558_v31  ;;  %16709 = vmatmul.mubr.msk.f32.vlgmr.msra.gmra.mrb[106].mxu0 %vm4387_vm4, %v4559_v20  ;;  %v4563_v49 = vmul.f32 %v17789_v5, %v21997_v4  ;;  %v22019_v20 = vld [vmem:[#allocation21_spill] sm:$0xff] }
 0x94e   :  { %16712 = vmatpush3.msra.mxu1 %v8144_v59  ;;  %16717 = vmatpush3.msra.mxu0 %v20443_v6  ;;  %v8298_v6 = vpop.permute.xlu1 %8297  ;;  %v22018_v59 = vld [vmem:[#allocation18_spill] sm:$0xff]  ;;  %v8473_v0 = vmul.f32 %v22000_v37, %v22019_v20 }
 0x94f   :  { %16713 = vmatprep.mubr.msk.f32.mxu1 %vm17948_vm3, %v21980_v58  ;;  %16718 = vmatprep.mubr.msk.f32.mxu0 %vm17948_vm3, %v21980_v58  ;;  %v8472_v31 = vmul.f32 %v22000_v37, %v22018_v59 }
 0x950   :  { %16721 = vmatprep.subr.mxu1 %v21980_v58  ;;  %16726 = vmatprep.subr.mxu0 %v21980_v58 }
 0x951   :  { %10624 = vrot.lane.b32.xlu1 %v9847_v51, %s17951_s11  ;;  %16714 = vmatmul.mubr.msk.f32.vlgmr.msra.gmra.mrb[92].mxu1 %vm4387_vm4, %v4560_v50 }
 0x952   :  { %16719 = vmatmul.mubr.msk.f32.vlgmr.msra.gmra.mrb[108].mxu0 %vm4387_vm4, %v4561_v29  ;;  %16722 = vmatpush3.msra.mxu1 %v8298_v6 }
 0x953   :  { %16727 = vmatpush3.msra.mxu0 %v20456_v17  ;;  %16723 = vmatprep.mubr.msk.f32.mxu1 %vm17948_vm3, %v21980_v58  ;;  %v21998_v17 = vld [vmem:[#allocation22_spill] sm:$0xff] }
 0x954   :  { %16728 = vmatprep.mubr.msk.f32.mxu0 %vm17948_vm3, %v21980_v58  ;;  %16731 = vmatprep.subr.mxu1 %v21980_v58 }
 0x955   :  { %16724 = vmatmul.mubr.msk.f32.vlgmr.msra.gmra.mrb[94].mxu1 %vm4387_vm4, %v4562_v35  ;;  %16736 = vmatprep.subr.mxu0 %v21980_v58 }
 0x956   :  { %16729 = vmatmul.mubr.msk.f32.vlgmr.msra.gmra.mrb[110].mxu0 %vm4387_vm4, %v4563_v49  ;;  %16733 = vmatprep.mubr.msk.f32.mxu1 %vm17948_vm3, %v21980_v58 }
 0x957   :  { %16738 = vmatprep.mubr.msk.f32.mxu0 %vm17948_vm3, %v21980_v58 }
 0x959   :  { %16732 = vmatpush3.xpose.msk.msra.mxu1 %vm1101_vm2, %v21998_v17 }
 0x95a   :  { %16737 = vmatpush3.xpose.msk.msra.mxu0 %vm1101_vm2, %v21999_v16  ;;  %16741 = vmatprep.subr.mxu1 %v21980_v58 }
 0x95b   :  { %16746 = vmatprep.subr.mxu0 %v21980_v58 }
 0x95c   :  { %16734 = vmatmul.mubr.msk.f32.vlgmr.msra.gmra.mrb[96].mxu1 %vm1101_vm2, %v8458_v40 }
 0x95d   :  { %16739 = vmatmul.mubr.msk.f32.vlgmr.msra.gmra.mrb[112].mxu0 %vm1101_vm2, %v8459_v43  ;;  %16742 = vmatpush3.xpose.msk.msra.mxu1 %vm1101_vm2, %v22001_v42 }
 0x95e   :  { %16747 = vmatpush3.xpose.msk.msra.mxu0 %vm1101_vm2, %v22002_v45  ;;  %16743 = vmatprep.mubr.msk.f32.mxu1 %vm17948_vm3, %v21980_v58 }
 0x95f   :  { %16748 = vmatprep.mubr.msk.f32.mxu0 %vm17948_vm3, %v21980_v58  ;;  %16751 = vmatprep.subr.mxu1 %v21980_v58 }
 0x960   :  { %16744 = vmatmul.mubr.msk.f32.vlgmr.msra.gmra.mrb[98].mxu1 %vm1101_vm2, %v8460_v41  ;;  %16756 = vmatprep.subr.mxu0 %v21980_v58 }
 0x961   :  { %16749 = vmatmul.mubr.msk.f32.vlgmr.msra.gmra.mrb[114].mxu0 %vm1101_vm2, %v8461_v25  ;;  %16752 = vmatpush3.xpose.msk.msra.mxu1 %vm1101_vm2, %v22003_v7 }
 0x962   :  { %16757 = vmatpush3.xpose.msk.msra.mxu0 %vm1101_vm2, %v22004_v15  ;;  %16753 = vmatprep.mubr.msk.f32.mxu1 %vm17948_vm3, %v21980_v58 }
 0x963   :  { %16758 = vmatprep.mubr.msk.f32.mxu0 %vm17948_vm3, %v21980_v58  ;;  %16761 = vmatprep.subr.mxu1 %v21980_v58 }
 0x964   :  { %16754 = vmatmul.mubr.msk.f32.vlgmr.msra.gmra.mrb[100].mxu1 %vm1101_vm2, %v8462_v19  ;;  %16766 = vmatprep.subr.mxu0 %v21980_v58 }
 0x965   :  { %16759 = vmatmul.mubr.msk.f32.vlgmr.msra.gmra.mrb[116].mxu0 %vm1101_vm2, %v8463_v38  ;;  %16762 = vmatpush3.xpose.msk.msra.mxu1 %vm1101_vm2, %v22005_v10 }
 0x966   :  { %16767 = vmatpush3.xpose.msk.msra.mxu0 %vm1101_vm2, %v22006_v36  ;;  %16763 = vmatprep.mubr.msk.f32.mxu1 %vm17948_vm3, %v21980_v58 }
 0x967   :  { %16768 = vmatprep.mubr.msk.f32.mxu0 %vm17948_vm3, %v21980_v58  ;;  %16771 = vmatprep.subr.mxu1 %v21980_v58 }
 0x968   :  { %16764 = vmatmul.mubr.msk.f32.vlgmr.msra.gmra.mrb[102].mxu1 %vm1101_vm2, %v8464_v27  ;;  %16776 = vmatprep.subr.mxu0 %v21980_v58 }
 0x969   :  { %16769 = vmatmul.mubr.msk.f32.vlgmr.msra.gmra.mrb[118].mxu0 %vm1101_vm2, %v8465_v60  ;;  %16772 = vmatpush3.xpose.msk.msra.mxu1 %vm1101_vm2, %v22007_v52 }
 0x96a   :  { %16777 = vmatpush3.xpose.msk.msra.mxu0 %vm1101_vm2, %v22008_v12  ;;  %16773 = vmatprep.mubr.msk.f32.mxu1 %vm17948_vm3, %v21980_v58 }
 0x96b   :  { %16778 = vmatprep.mubr.msk.f32.mxu0 %vm17948_vm3, %v21980_v58  ;;  %16781 = vmatprep.subr.mxu1 %v21980_v58 }
 0x96c   :  { %16774 = vmatmul.mubr.msk.f32.vlgmr.msra.gmra.mrb[104].mxu1 %vm1101_vm2, %v8466_v28  ;;  %16786 = vmatprep.subr.mxu0 %v21980_v58 }
 0x96d   :  { %16779 = vmatmul.mubr.msk.f32.vlgmr.msra.gmra.mrb[120].mxu0 %vm1101_vm2, %v8467_v48  ;;  %16782 = vmatpush3.xpose.msk.msra.mxu1 %vm1101_vm2, %v22009_v13 }
 0x96e   :  { %16787 = vmatpush3.xpose.msk.msra.mxu0 %vm1101_vm2, %v22010_v18  ;;  %16783 = vmatprep.mubr.msk.f32.mxu1 %vm17948_vm3, %v21980_v58 }
 0x96f   :  { %16788 = vmatprep.mubr.msk.f32.mxu0 %vm17948_vm3, %v21980_v58  ;;  %16791 = vmatprep.subr.mxu1 %v21980_v58 }
 0x970   :  { %16784 = vmatmul.mubr.msk.f32.vlgmr.msra.gmra.mrb[106].mxu1 %vm1101_vm2, %v8468_v61  ;;  %16796 = vmatprep.subr.mxu0 %v21980_v58 }
 0x971   :  { %16789 = vmatmul.mubr.msk.f32.vlgmr.msra.gmra.mrb[122].mxu0 %vm1101_vm2, %v8469_v47  ;;  %16792 = vmatpush3.xpose.msk.msra.mxu1 %vm1101_vm2, %v22012_v33 }
 0x972   :  { %16797 = vmatpush3.xpose.msk.msra.mxu0 %vm1101_vm2, %v22013_v44  ;;  %16793 = vmatprep.mubr.msk.f32.mxu1 %vm17948_vm3, %v21980_v58 }
 0x973   :  { %16798 = vmatprep.mubr.msk.f32.mxu0 %vm17948_vm3, %v21980_v58  ;;  %16801 = vmatprep.subr.mxu1 %v21980_v58 }
 0x974   :  { %16794 = vmatmul.mubr.msk.f32.vlgmr.msra.gmra.mrb[108].mxu1 %vm1101_vm2, %v8470_v26  ;;  %16806 = vmatprep.subr.mxu0 %v21980_v58 }
 0x975   :  { %16799 = vmatmul.mubr.msk.f32.vlgmr.msra.gmra.mrb[124].mxu0 %vm1101_vm2, %v8471_v9  ;;  %16802 = vmatpush3.xpose.msk.msra.mxu1 %vm1101_vm2, %v22016_v23 }
 0x976   :  { %16807 = vmatpush3.xpose.msk.msra.mxu0 %vm1101_vm2, %v22017_v11  ;;  %16803 = vmatprep.mubr.msk.f32.mxu1 %vm17948_vm3, %v21980_v58 }
 0x977   :  { %16808 = vmatprep.mubr.msk.f32.mxu0 %vm17948_vm3, %v21980_v58  ;;  %16811 = vmatprep.subr.mxu1 %v21980_v58 }
 0x978   :  { %16804 = vmatmul.mubr.msk.f32.vlgmr.msra.gmra.mrb[110].mxu1 %vm1101_vm2, %v8472_v31  ;;  %16816 = vmatprep.subr.mxu0 %v21980_v58 }
 0x979   :  { %16809 = vmatmul.mubr.msk.f32.vlgmr.msra.gmra.mrb[126].mxu0 %vm1101_vm2, %v8473_v0  ;;  %16813 = vmatprep.mubr.msk.f32.mxu1 %vm17948_vm3, %v21980_v58 }
 0x97a   :  { %16818 = vmatprep.mubr.msk.f32.mxu0 %vm17948_vm3, %v21980_v58 }
 0x9aa   :  { %v9855_v53 = vpop.permute.xlu0 %9854  ;;  %v9932_v51 = vpop.permute.xlu1 %9931 }
 0x9ab   :  { %16812 = vmatpush3.msra.mxu1 %v9855_v53  ;;  %16817 = vmatpush3.msra.mxu0 %v9932_v51 }
 0x9ac   :  { %16821 = vmatprep.subr.mxu1 %v21980_v58  ;;  %16826 = vmatprep.subr.mxu0 %v21980_v58 }
 0xa2f   :  { %v8543_v1 = vpop.f32.mrb[96].mxu1 }
 0xa30   :  { %v20724_v50 = vmul.f32 0.35355338, %v8543_v1  ;;  %v8616_v57 = vpop.f32.mrb[112].mxu0  ;;  %v16735_v30 = vpop.f32.mrb[97].mxu1 }
 0xa31   :  { %v20726_v29 = vmul.f32 0.35355338, %v8616_v57  ;;  %v16740_v5 = vpop.f32.mrb[113].mxu0 }
 0xa32   :  { %v9658_v6 = vsel %vm4387_vm4, %v20724_v50, -inf }
 0xa33   :  { %v9661_v21 = vsel %vm4387_vm4, %v20726_v29, -inf  ;;  %9659 = vmax.xlane.f32.xlu1 %v9658_v6  ;;  %v8689_v35 = vpop.f32.mrb[98].mxu1 }
 0xa34   :  { %9662 = vmax.xlane.f32.xlu0 %v9661_v21  ;;  %v8762_v4 = vpop.f32.mrb[114].mxu0  ;;  %v20732_v49 = vmul.f32 0.35355338, %v8689_v35  ;;  %v16745_v37 = vpop.f32.mrb[99].mxu1 }
 0xa35   :  { %v20734_v40 = vmul.f32 0.35355338, %v8762_v4  ;;  %v16750_v43 = vpop.f32.mrb[115].mxu0 }
 0xa36   :  { %v9664_v41 = vsel %vm4387_vm4, %v20732_v49, -inf }
 0xa37   :  { %v9667_v25 = vsel %vm4387_vm4, %v20734_v40, -inf  ;;  %v8835_v19 = vpop.f32.mrb[100].mxu1 }
 0xa38   :  { %v8908_v38 = vpop.f32.mrb[116].mxu0  ;;  %9668 = vmax.xlane.f32.xlu1 %v9667_v25  ;;  %9665 = vmax.xlane.f32.xlu0 %v9664_v41  ;;  %v20740_v27 = vmul.f32 0.35355338, %v8835_v19  ;;  %v16755_v60 = vpop.f32.mrb[101].mxu1 }
 0xa39   :  { %v20742_v28 = vmul.f32 0.35355338, %v8908_v38  ;;  %v16760_v48 = vpop.f32.mrb[117].mxu0 }
 0xa3a   :  { %v9670_v61 = vsel %vm4387_vm4, %v20740_v27, -inf }
 0xa3b   :  { %v9673_v47 = vsel %vm4387_vm4, %v20742_v28, -inf  ;;  %v8981_v26 = vpop.f32.mrb[102].mxu1 }
 0xa3c   :  { %v9054_v9 = vpop.f32.mrb[118].mxu0  ;;  %9674 = vmax.xlane.f32.xlu1 %v9673_v47  ;;  %9671 = vmax.xlane.f32.xlu0 %v9670_v61  ;;  %v20748_v31 = vmul.f32 0.35355338, %v8981_v26  ;;  %v16765_v0 = vpop.f32.mrb[103].mxu1 }
 0xa3d   :  { %v20750_v53 = vmul.f32 0.35355338, %v9054_v9  ;;  %v16770_v51 = vpop.f32.mrb[119].mxu0 }
 0xa3e   :  { %v9676_v1 = vsel %vm4387_vm4, %v20748_v31, -inf }
 0xa3f   :  { %v9679_v57 = vsel %vm4387_vm4, %v20750_v53, -inf  ;;  %v9127_v30 = vpop.f32.mrb[104].mxu1 }
 0xa40   :  { %v9200_v5 = vpop.f32.mrb[120].mxu0  ;;  %9680 = vmax.xlane.f32.xlu1 %v9679_v57  ;;  %9677 = vmax.xlane.f32.xlu0 %v9676_v1  ;;  %v20756_v6 = vmul.f32 0.35355338, %v9127_v30  ;;  %v16775_v21 = vpop.f32.mrb[105].mxu1 }
 0xa41   :  { %v20758_v35 = vmul.f32 0.35355338, %v9200_v5  ;;  %v16780_v4 = vpop.f32.mrb[121].mxu0 }
 0xa42   :  { %v9682_v37 = vsel %vm4387_vm4, %v20756_v6, -inf }
 0xa43   :  { %v9685_v43 = vsel %vm4387_vm4, %v20758_v35, -inf  ;;  %v9273_v41 = vpop.f32.mrb[106].mxu1 }
 0xa44   :  { %v9346_v25 = vpop.f32.mrb[122].mxu0  ;;  %9686 = vmax.xlane.f32.xlu1 %v9685_v43  ;;  %9683 = vmax.xlane.f32.xlu0 %v9682_v37  ;;  %v20764_v19 = vmul.f32 0.35355338, %v9273_v41  ;;  %v16785_v38 = vpop.f32.mrb[107].mxu1 }
 0xa45   :  { %v20766_v60 = vmul.f32 0.35355338, %v9346_v25  ;;  %v16790_v48 = vpop.f32.mrb[123].mxu0 }
 0xa46   :  { %v9688_v61 = vsel %vm4387_vm4, %v20764_v19, -inf }
 0xa47   :  { %v9691_v47 = vsel %vm4387_vm4, %v20766_v60, -inf  ;;  %v9419_v26 = vpop.f32.mrb[108].mxu1 }
 0xa48   :  { %v9492_v9 = vpop.f32.mrb[124].mxu0  ;;  %9692 = vmax.xlane.f32.xlu1 %v9691_v47  ;;  %9689 = vmax.xlane.f32.xlu0 %v9688_v61  ;;  %v20772_v0 = vmul.f32 0.35355338, %v9419_v26  ;;  %v16795_v51 = vpop.f32.mrb[109].mxu1  ;;  %v9849_v61 = vmul.f32 %v20471_v24, %v22014_v56  ;;  %v9848_v47 = vmul.f32 %v20471_v24, %v22011_v22 }
 0xa49   :  { %v20774_v1 = vmul.f32 0.35355338, %v9492_v9  ;;  %v16800_v57 = vpop.f32.mrb[125].mxu0  ;;  %v20794_v26 = vpop.permute.xlu1 %10085 }
 0xa4a   :  { %v9694_v30 = vsel %vm4387_vm4, %v20772_v0, -inf  ;;  %v20798_v51 = vpop.permute.xlu0 %10008 }
 0xa4b   :  { %v9697_v5 = vsel %vm4387_vm4, %v20774_v1, -inf  ;;  %v9565_v21 = vpop.f32.mrb[110].mxu1 }
 0xa4c   :  { %v9638_v4 = vpop.f32.mrb[126].mxu0  ;;  %9698 = vmax.xlane.f32.xlu1 %v9697_v5  ;;  %9695 = vmax.xlane.f32.xlu0 %v9694_v30  ;;  %v20780_v37 = vmul.f32 0.35355338, %v9565_v21  ;;  %v16805_v43 = vpop.f32.mrb[111].mxu1 }
 0xa4d   :  { %v20782_v41 = vmul.f32 0.35355338, %v9638_v4  ;;  %v16810_v25 = vpop.f32.mrb[127].mxu0  ;;  %v20796_v9 = vpop.permute.xlu1 %10162 }
 0xa4e   :  { %v9700_v38 = vsel %vm4387_vm4, %v20780_v37, -inf  ;;  %v20802_v30 = vpop.permute.xlu0 %10239 }
 0xa4f   :  { %v9703_v48 = vsel %vm4387_vm4, %v20782_v41, -inf }
 0xa50   :  { %9704 = vmax.xlane.f32.xlu1 %v9703_v48  ;;  %9701 = vmax.xlane.f32.xlu0 %v9700_v38 }
 0xa51   :  { %v20800_v57 = vpop.permute.xlu1 %10316 }
 0xa52   :  { %v20806_v21 = vpop.permute.xlu0 %10393 }
 0xa55   :  { %v20804_v5 = vpop.permute.xlu1 %10470 }
 0xa56   :  { %v20810_v43 = vpop.permute.xlu0 %10547 }
 0xa59   :  { %v20808_v4 = vpop.permute.xlu1 %10624 }
 0xa61   :  { %10778 = vrot.lane.b32.xlu1 %v9849_v61, %s17951_s11 }
 0xa66   :  { %10701 = vrot.lane.b32.xlu0 %v9848_v47, %s17951_s11 }
 0xac0   :  { %v9660_v25 = vpop.xlane.xlu1 %9659 }
 0xac1   :  { %v9663_v38 = vpop.xlane.xlu0 %9662  ;;  %v9706_v48 = vsub.f32 %v20724_v50, %v9660_v25 }
 0xac2   :  { %v9707_v61 = vsub.f32 %v20726_v29, %v9663_v38 }
 0xac3   :  { %v9722_v47 = vmul.f32 1.442695, %v9706_v48 }
 0xac4   :  { %v9724_v11 = vmul.f32 1.442695, %v9707_v61 }
 0xac5   :  { %17790 = vpow2.f32 %v9722_v47  ;;  %v9669_v44 = vpop.xlane.xlu1 %9668  ;;  %v9666_v22 = vpop.xlane.xlu0 %9665 }
 0xac6   :  { %v9708_v18 = vsub.f32 %v20732_v49, %v9666_v22  ;;  %17792 = vpow2.f32 %v9724_v11  ;;  %v9709_v23 = vsub.f32 %v20734_v40, %v9669_v44 }
 0xac8   :  { %v9726_v56 = vmul.f32 1.442695, %v9708_v18  ;;  %v9728_v8 = vmul.f32 1.442695, %v9709_v23 }
 0xac9   :  { %v9675_v12 = vpop.xlane.xlu1 %9674  ;;  %v9672_v33 = vpop.xlane.xlu0 %9671 }
 0xaca   :  { %v9711_v3 = vsub.f32 %v20742_v28, %v9675_v12  ;;  %17794 = vpow2.f32 %v9726_v56  ;;  %v9710_v50 = vsub.f32 %v20740_v27, %v9672_v33 }
 0xacc   :  { %v9732_v29 = vmul.f32 1.442695, %v9711_v3  ;;  %v9730_v48 = vmul.f32 1.442695, %v9710_v50 }
 0xacd   :  { %v9678_v25 = vpop.xlane.xlu0 %9677  ;;  %v9681_v11 = vpop.xlane.xlu1 %9680 }
 0xace   :  { %17796 = vpow2.f32 %v9732_v29  ;;  %v9712_v22 = vsub.f32 %v20748_v31, %v9678_v25  ;;  %v9713_v12 = vsub.f32 %v20750_v53, %v9681_v11 }
 0xacf   :  { %v20818_v38 = vpop.eup %17790  ;;  %17798 = vpow2.f32 %v9728_v8 }
 0xad0   :  { %v9754_v18 = vsel %vm4387_vm4, %v20818_v38, 0.0  ;;  %v20823_v44 = vpop.eup %17792  ;;  %17800 = vpow2.f32 %v9730_v48  ;;  %v9734_v33 = vmul.f32 1.442695, %v9712_v22  ;;  %v9736_v8 = vmul.f32 1.442695, %v9713_v12 }
 0xad1   :  { %9755 = vadd.xlane.f32.xlu1 %v9754_v18  ;;  %v9684_v3 = vpop.xlane.xlu0 %9683  ;;  %v9757_v56 = vsel %vm4387_vm4, %v20823_v44, 0.0  ;;  %v9687_v27 = vpop.xlane.xlu1 %9686 }
 0xad2   :  { %17802 = vpow2.f32 %v9734_v33  ;;  %v9714_v49 = vsub.f32 %v20756_v6, %v9684_v3  ;;  %v9715_v61 = vsub.f32 %v20758_v35, %v9687_v27 }
 0xad3   :  { %17804 = vpow2.f32 %v9736_v8 }
 0xad4   :  { %v20828_v23 = vpop.eup %17794  ;;  %v9738_v47 = vmul.f32 1.442695, %v9714_v49  ;;  %v9740_v25 = vmul.f32 1.442695, %v9715_v61 }
 0xad5   :  { %9758 = vadd.xlane.f32.xlu1 %v9757_v56  ;;  %v9760_v28 = vsel %vm4387_vm4, %v20828_v23, 0.0  ;;  %v9690_v50 = vpop.xlane.xlu0 %9689  ;;  %v9693_v22 = vpop.xlane.xlu1 %9692 }
 0xad6   :  { %17806 = vpow2.f32 %v9738_v47  ;;  %v9716_v48 = vsub.f32 %v20764_v19, %v9690_v50  ;;  %v9717_v35 = vsub.f32 %v20766_v60, %v9693_v22 }
 0xad7   :  { %17808 = vpow2.f32 %v9740_v25 }
 0xad8   :  { %v20831_v40 = vpop.eup %17796  ;;  %v9742_v12 = vmul.f32 1.442695, %v9716_v48  ;;  %v9744_v8 = vmul.f32 1.442695, %v9717_v35 }
 0xad9   :  { %v20835_v31 = vpop.eup %17798  ;;  %9761 = vadd.xlane.f32.xlu1 %v9760_v28  ;;  %v9769_v53 = vsel %vm4387_vm4, %v20831_v40, 0.0  ;;  %v9696_v33 = vpop.xlane.xlu0 %9695 }
 0xada   :  { %9770 = vadd.xlane.f32.xlu0 %v9769_v53  ;;  %v9763_v6 = vsel %vm4387_vm4, %v20835_v31, 0.0  ;;  %v20842_v29 = vpop.eup %17800  ;;  %17810 = vpow2.f32 %v9742_v12  ;;  %v9718_v19 = vsub.f32 %v20772_v0, %v9696_v33  ;;  %v9699_v49 = vpop.xlane.xlu1 %9698  ;;  %v9850_v0 = vmul.f32 %v20471_v24, %v22015_v62 }
 0xadb   :  { %v9766_v11 = vsel %vm4387_vm4, %v20842_v29, 0.0  ;;  %17812 = vpow2.f32 %v9744_v8  ;;  %v9719_v60 = vsub.f32 %v20774_v1, %v9699_v49 }
 0xadc   :  { %v20847_v18 = vpop.eup %17802  ;;  %v9746_v53 = vmul.f32 1.442695, %v9718_v19 }
 0xadd   :  { %9764 = vadd.xlane.f32.xlu1 %v9763_v6  ;;  %v9772_v3 = vsel %vm4387_vm4, %v20847_v18, 0.0  ;;  %v20852_v56 = vpop.eup %17804  ;;  %v9702_v61 = vpop.xlane.xlu0 %9701  ;;  %v9748_v6 = vmul.f32 1.442695, %v9719_v60 }
 0xade   :  { %v9775_v27 = vsel %vm4387_vm4, %v20852_v56, 0.0  ;;  %17814 = vpow2.f32 %v9746_v53  ;;  %v9720_v25 = vsub.f32 %v20780_v37, %v9702_v61  ;;  %v9705_v12 = vpop.xlane.xlu1 %9704 }
 0xadf   :  { %17816 = vpow2.f32 %v9748_v6  ;;  %v20904_v6 = vld [vmem:[%s21702_s13 + $0x3] ss:$0 sm:$0xff] }
 0xae0   :  { %v20857_v28 = vpop.eup %17806  ;;  %v9750_v22 = vmul.f32 1.442695, %v9720_v25 }
 0xae1   :  { %9767 = vadd.xlane.f32.xlu1 %v9766_v11  ;;  %v9778_v47 = vsel %vm4387_vm4, %v20857_v28, 0.0  ;;  %v20862_v50 = vpop.eup %17808 }
 0xae2   :  { %v9781_v1 = vsel %vm4387_vm4, %v20862_v50, 0.0  ;;  %17818 = vpow2.f32 %v9750_v22  ;;  %v20908_v25 = vpop.permute.xlu1 %10778 }
 0xae4   :  { %v20870_v48 = vpop.eup %17810 }
 0xae5   :  { %9773 = vadd.xlane.f32.xlu1 %v9772_v3  ;;  %v9784_v11 = vsel %vm4387_vm4, %v20870_v48, 0.0  ;;  %v20874_v35 = vpop.eup %17812  ;;  %v9721_v3 = vsub.f32 %v20782_v41, %v9705_v12 }
 0xae6   :  { %v9787_v37 = vsel %vm4387_vm4, %v20874_v35, 0.0 }
 0xae7   :  { %v9752_v49 = vmul.f32 1.442695, %v9721_v3 }
 0xae8   :  { %v20878_v33 = vpop.eup %17814 }
 0xae9   :  { %9776 = vadd.xlane.f32.xlu1 %v9775_v27  ;;  %v9790_v8 = vsel %vm4387_vm4, %v20878_v33, 0.0  ;;  %v20883_v19 = vpop.eup %17816  ;;  %17820 = vpow2.f32 %v9752_v49 }
 0xaea   :  { %v9793_v27 = vsel %vm4387_vm4, %v20883_v19, 0.0 }
 0xaec   :  { %v20887_v60 = vpop.eup %17818 }
 0xaed   :  { %9779 = vadd.xlane.f32.xlu1 %v9778_v47  ;;  %v9796_v53 = vsel %vm4387_vm4, %v20887_v60, 0.0  ;;  %v9851_v47 = vmul.f32 %v20471_v24, %v22018_v59 }
 0xaf0   :  { %10855 = vrot.lane.b32.xlu0 %v9850_v0, %s17951_s11  ;;  %v9852_v0 = vmul.f32 %v20471_v24, %v22019_v20 }
 0xaf1   :  { %9782 = vadd.xlane.f32.xlu1 %v9781_v1 }
 0xaf3   :  { %v20891_v41 = vpop.eup %17820 }
 0xaf4   :  { %v9799_v61 = vsel %vm4387_vm4, %v20891_v41, 0.0 }
 0xaf5   :  { %9785 = vadd.xlane.f32.xlu1 %v9784_v11  ;;  %v20910_v11 = vpop.permute.xlu0 %10701 }
 0xaf9   :  { %9788 = vadd.xlane.f32.xlu1 %v9787_v37 }
 0xafd   :  { %9791 = vadd.xlane.f32.xlu1 %v9790_v8 }
 0xb01   :  { %9794 = vadd.xlane.f32.xlu1 %v9793_v27 }
 0xb05   :  { %9797 = vadd.xlane.f32.xlu1 %v9796_v53 }
 0xb0f   :  { %9800 = vadd.xlane.f32.xlu0 %v9799_v61 }
 0xb16   :  { %10932 = vrot.lane.b32.xlu1 %v9851_v47, %s17951_s11 }
 0xb25   :  { %11009 = vrot.lane.b32.xlu0 %v9852_v0, %s17951_s11 }
 0xb29   :  { %12485 = vrot.lane.b32.xlu0 %v20904_v6, %s17951_s11 }
 0xb5e   :  { %v9756_v1 = vpop.xlane.xlu1 %9755 }
 0xb5f   :  { %17822 = vrcp.f32 %v9756_v1 }
 0xb62   :  { %v9759_v22 = vpop.xlane.xlu1 %9758 }
 0xb63   :  { %17824 = vrcp.f32 %v9759_v22 }
 0xb66   :  { %v9762_v12 = vpop.xlane.xlu1 %9761 }
 0xb67   :  { %17826 = vrcp.f32 %v9762_v12  ;;  %v9771_v3 = vpop.xlane.xlu0 %9770 }
 0xb69   :  { %v17823_v24 = vpop.eup %17822 }
 0xb6a   :  { %v9818_v37 = vmul.f32 %v17823_v24, %v20818_v38  ;;  %v9765_v8 = vpop.xlane.xlu1 %9764 }
 0xb6b   :  { %17828 = vrcp.f32 %v9765_v8  ;;  %v10856_v8 = vpop.permute.xlu0 %10855 }
 0xb6c   :  { %16814 = vmatmul.mubr.msk.f32.vlgmr.msra.gmra.mrb[80].mxu1 %vm4387_vm4, %v9818_v37  ;;  %17830 = vrcp.f32 %v9771_v3 }
 0xb6d   :  { %v17825_v49 = vpop.eup %17824  ;;  %16822 = vmatpush3.msra.mxu1 %v20798_v51  ;;  %16823 = vmatprep.mubr.msk.f32.mxu1 %vm17948_vm3, %v21980_v58 }
 0xb6e   :  { %v9819_v27 = vmul.f32 %v17825_v49, %v20823_v44  ;;  %v9768_v53 = vpop.xlane.xlu1 %9767  ;;  %16831 = vmatprep.subr.mxu1 %v21980_v58 }
 0xb6f   :  { %17832 = vrcp.f32 %v9768_v53 }
 0xb70   :  { %16819 = vmatmul.mubr.msk.f32.vlgmr.msra.gmra.mrb[96].mxu0 %vm4387_vm4, %v9819_v27 }
 0xb71   :  { %v17827_v38 = vpop.eup %17826  ;;  %16827 = vmatpush3.msra.mxu0 %v20794_v26  ;;  %16828 = vmatprep.mubr.msk.f32.mxu0 %vm17948_vm3, %v21980_v58 }
 0xb72   :  { %v9820_v61 = vmul.f32 %v17827_v38, %v20828_v23  ;;  %v9774_v51 = vpop.xlane.xlu1 %9773  ;;  %16836 = vmatprep.subr.mxu0 %v21980_v58 }
 0xb73   :  { %17834 = vrcp.f32 %v9774_v51 }
 0xb74   :  { %16824 = vmatmul.mubr.msk.f32.vlgmr.msra.gmra.mrb[82].mxu1 %vm4387_vm4, %v9820_v61 }
 0xb75   :  { %v17829_v44 = vpop.eup %17828  ;;  %16832 = vmatpush3.msra.mxu1 %v20796_v9  ;;  %16833 = vmatprep.mubr.msk.f32.mxu1 %vm17948_vm3, %v21980_v58 }
 0xb76   :  { %v9821_v47 = vmul.f32 %v17829_v44, %v20835_v31  ;;  %v9777_v26 = vpop.xlane.xlu1 %9776  ;;  %16841 = vmatprep.subr.mxu1 %v21980_v58  ;;  %v17831_v0 = vpop.eup %17830  ;;  %v11111_v44 = vmul.f32 %v20904_v6, %v19487_v34 }
 0xb77   :  { %17836 = vrcp.f32 %v9777_v26  ;;  %v9823_v9 = vmul.f32 %v17831_v0, %v20831_v40  ;;  %v22022_v0 = vld [vmem:[#allocation33_spill] sm:$0xff] }
 0xb78   :  { %16829 = vmatmul.mubr.msk.f32.vlgmr.msra.gmra.mrb[98].mxu0 %vm4387_vm4, %v9821_v47 }
 0xb79   :  { %v17833_v23 = vpop.eup %17832  ;;  %16837 = vmatpush3.msra.mxu0 %v20802_v30  ;;  %16838 = vmatprep.mubr.msk.f32.mxu0 %vm17948_vm3, %v21980_v58 }
 0xb7a   :  { %v9822_v1 = vmul.f32 %v17833_v23, %v20842_v29  ;;  %v9780_v22 = vpop.xlane.xlu1 %9779  ;;  %16846 = vmatprep.subr.mxu0 %v21980_v58  ;;  %v22023_v23 = vld [vmem:[#allocation30_spill] sm:$0xff] }
 0xb7b   :  { %17838 = vrcp.f32 %v9780_v22  ;;  %v22025_v22 = vld [vmem:[#allocation37_spill] sm:$0xff] }
 0xb7c   :  { %16834 = vmatmul.mubr.msk.f32.vlgmr.msra.gmra.mrb[84].mxu1 %vm4387_vm4, %v9822_v1  ;;  %16839 = vmatmul.mubr.msk.f32.vlgmr.msra.gmra.mrb[100].mxu0 %vm4387_vm4, %v9823_v9 }
 0xb7d   :  { %v17835_v31 = vpop.eup %17834  ;;  %16842 = vmatpush3.msra.mxu1 %v20800_v57  ;;  %16847 = vmatpush3.msra.mxu0 %v20806_v21 }
 0xb7e   :  { %v9824_v30 = vmul.f32 %v17835_v31, %v20847_v18  ;;  %v9783_v12 = vpop.xlane.xlu1 %9782  ;;  %16843 = vmatprep.mubr.msk.f32.mxu1 %vm17948_vm3, %v21980_v58  ;;  %16851 = vmatprep.subr.mxu1 %v21980_v58  ;;  %v22026_v31 = vld [vmem:[#allocation28_spill] sm:$0xff] }
 0xb7f   :  { %17840 = vrcp.f32 %v9783_v12  ;;  %16848 = vmatprep.mubr.msk.f32.mxu0 %vm17948_vm3, %v21980_v58  ;;  %16856 = vmatprep.subr.mxu0 %v21980_v58  ;;  %v22027_v12 = vld [vmem:[#allocation15_spill] sm:$0xff] }
 0xb80   :  { %16844 = vmatmul.mubr.msk.f32.vlgmr.msra.gmra.mrb[86].mxu1 %vm4387_vm4, %v9824_v30  ;;  %v11123_v30 = vmul.f32 %v20904_v6, %v22018_v59 }
 0xb81   :  { %v17837_v40 = vpop.eup %17836  ;;  %16852 = vmatpush3.msra.mxu1 %v20804_v5  ;;  %16853 = vmatprep.mubr.msk.f32.mxu1 %vm17948_vm3, %v21980_v58 }
 0xb82   :  { %v9825_v57 = vmul.f32 %v17837_v40, %v20852_v56  ;;  %v9786_v21 = vpop.xlane.xlu1 %9785  ;;  %16861 = vmatprep.subr.mxu1 %v21980_v58  ;;  %v11120_v40 = vmul.f32 %v20904_v6, %v22027_v12 }
 0xb83   :  { %17842 = vrcp.f32 %v9786_v21  ;;  %v11122_v21 = vmul.f32 %v20904_v6, %v22015_v62 }
 0xb84   :  { %16849 = vmatmul.mubr.msk.f32.vlgmr.msra.gmra.mrb[102].mxu0 %vm4387_vm4, %v9825_v57  ;;  %v22028_v57 = vld [vmem:[#allocation32_spill] sm:$0xff] }
 0xb85   :  { %v17839_v29 = vpop.eup %17838  ;;  %16857 = vmatpush3.msra.mxu0 %v20810_v43  ;;  %16858 = vmatprep.mubr.msk.f32.mxu0 %vm17948_vm3, %v21980_v58 }
 0xb86   :  { %v9826_v18 = vmul.f32 %v17839_v29, %v20857_v28  ;;  %v9789_v5 = vpop.xlane.xlu1 %9788  ;;  %16866 = vmatprep.subr.mxu0 %v21980_v58  ;;  %v22029_v29 = vld [vmem:[#allocation34_spill] sm:$0xff] }
 0xb87   :  { %17844 = vrcp.f32 %v9789_v5 }
 0xb88   :  { %16854 = vmatmul.mubr.msk.f32.vlgmr.msra.gmra.mrb[88].mxu1 %vm4387_vm4, %v9826_v18  ;;  %v11124_v18 = vmul.f32 %v20904_v6, %v22019_v20 }
 0xb89   :  { %v17841_v56 = vpop.eup %17840  ;;  %16862 = vmatpush3.msra.mxu1 %v20808_v4  ;;  %16863 = vmatprep.mubr.msk.f32.mxu1 %vm17948_vm3, %v21980_v58 }
 0xb8a   :  { %v9827_v24 = vmul.f32 %v17841_v56, %v20862_v50  ;;  %v9792_v43 = vpop.xlane.xlu1 %9791  ;;  %16871 = vmatprep.subr.mxu1 %v21980_v58 }
 0xb8b   :  { %17846 = vrcp.f32 %v9792_v43 }
 0xb8c   :  { %16859 = vmatmul.mubr.msk.f32.vlgmr.msra.gmra.mrb[104].mxu0 %vm4387_vm4, %v9827_v24 }
 0xb8d   :  { %v17843_v28 = vpop.eup %17842  ;;  %16867 = vmatpush3.msra.mxu0 %v20910_v11  ;;  %16868 = vmatprep.mubr.msk.f32.mxu0 %vm17948_vm3, %v21980_v58 }
 0xb8e   :  { %v9828_v37 = vmul.f32 %v17843_v28, %v20870_v48  ;;  %v9795_v4 = vpop.xlane.xlu1 %9794  ;;  %16876 = vmatprep.subr.mxu0 %v21980_v58 }
 0xb8f   :  { %17848 = vrcp.f32 %v9795_v4 }
 0xb90   :  { %16864 = vmatmul.mubr.msk.f32.vlgmr.msra.gmra.mrb[90].mxu1 %vm4387_vm4, %v9828_v37 }
 0xb91   :  { %v17845_v50 = vpop.eup %17844  ;;  %16872 = vmatpush3.msra.mxu1 %v20908_v25  ;;  %16873 = vmatprep.mubr.msk.f32.mxu1 %vm17948_vm3, %v21980_v58 }
 0xb92   :  { %v9829_v3 = vmul.f32 %v17845_v50, %v20874_v35  ;;  %v9798_v11 = vpop.xlane.xlu1 %9797  ;;  %16881 = vmatprep.subr.mxu1 %v21980_v58 }
 0xb93   :  { %17850 = vrcp.f32 %v9798_v11 }
 0xb94   :  { %16869 = vmatmul.mubr.msk.f32.vlgmr.msra.gmra.mrb[106].mxu0 %vm4387_vm4, %v9829_v3 }
 0xb95   :  { %v17847_v48 = vpop.eup %17846  ;;  %16877 = vmatpush3.msra.mxu0 %v10856_v8  ;;  %16878 = vmatprep.mubr.msk.f32.mxu0 %vm17948_vm3, %v21980_v58 }
 0xb96   :  { %v9830_v49 = vmul.f32 %v17847_v48, %v20878_v33  ;;  %v10933_v25 = vpop.permute.xlu1 %10932  ;;  %16886 = vmatprep.subr.mxu0 %v21980_v58 }
 0xb98   :  { %16874 = vmatmul.mubr.msk.f32.vlgmr.msra.gmra.mrb[92].mxu1 %vm4387_vm4, %v9830_v49 }
 0xb99   :  { %v17849_v35 = vpop.eup %17848  ;;  %16882 = vmatpush3.msra.mxu1 %v10933_v25  ;;  %16883 = vmatprep.mubr.msk.f32.mxu1 %vm17948_vm3, %v21980_v58 }
 0xb9a   :  { %v9831_v27 = vmul.f32 %v17849_v35, %v20883_v19  ;;  %16891 = vmatprep.subr.mxu1 %v21980_v58  ;;  %v11109_v19 = vmul.f32 %v20904_v6, %v21993_v46 }
 0xb9c   :  { %v9801_v53 = vpop.xlane.xlu0 %9800  ;;  %16879 = vmatmul.mubr.msk.f32.vlgmr.msra.gmra.mrb[108].mxu0 %vm4387_vm4, %v9831_v27 }
 0xb9d   :  { %v17851_v38 = vpop.eup %17850  ;;  %17852 = vrcp.f32 %v9801_v53  ;;  %16888 = vmatprep.mubr.msk.f32.mxu0 %vm17948_vm3, %v21980_v58 }
 0xb9e   :  { %v9832_v33 = vmul.f32 %v17851_v38, %v20887_v60 }
 0xba0   :  { %v11010_v61 = vpop.permute.xlu0 %11009  ;;  %16884 = vmatmul.mubr.msk.f32.vlgmr.msra.gmra.mrb[94].mxu1 %vm4387_vm4, %v9832_v33 }
 0xba1   :  { %16887 = vmatpush3.msra.mxu0 %v11010_v61  ;;  %16892 = vmatpush3.xpose.msk.msra.mxu1 %vm1101_vm2, %v21998_v17 }
 0xba2   :  { %16893 = vmatprep.mubr.msk.f32.mxu1 %vm17948_vm3, %v21980_v58  ;;  %16901 = vmatprep.subr.mxu1 %v21980_v58 }
 0xba3   :  { %16896 = vmatprep.subr.mxu0 %v21980_v58 }
 0xba4   :  { %v21002_v51 = vpop.permute.xlu0 %12485  ;;  %16894 = vmatmul.mubr.msk.f32.vlgmr.msra.gmra.mrb[112].mxu1 %vm1101_vm2, %v11109_v19 }
 0xba5   :  { %16902 = vmatpush3.xpose.msk.msra.mxu1 %vm1101_vm2, %v22001_v42  ;;  %v12489_v17 = vmul.f32 %v21002_v51, %v19480_v32  ;;  %v12488_v60 = vmul.f32 %v21002_v51, %v21993_v46  ;;  %16903 = vmatprep.mubr.msk.f32.mxu1 %vm17948_vm3, %v21980_v58  ;;  %v12491_v46 = vmul.f32 %v21002_v51, %v19494_v14 }
 0xba6   :  { %16911 = vmatprep.subr.mxu1 %v21980_v58  ;;  %v12490_v26 = vmul.f32 %v21002_v51, %v19487_v34  ;;  %v12492_v34 = vmul.f32 %v21002_v51, %v19504_v63 }
 0xba7   :  { %v17853_v47 = vpop.eup %17852  ;;  %12582 = vrot.lane.b32.xlu1 %v12489_v17, %s17951_s11  ;;  %12505 = vrot.lane.b32.xlu0 %v12488_v60, %s17951_s11 }
 0xba8   :  { %v9833_v42 = vmul.f32 %v17853_v47, %v20891_v41  ;;  %16904 = vmatmul.mubr.msk.f32.vlgmr.msra.gmra.mrb[114].mxu1 %vm1101_vm2, %v11111_v44  ;;  %v11110_v41 = vmul.f32 %v20904_v6, %v19480_v32  ;;  %v11115_v32 = vmul.f32 %v20904_v6, %v19518_v39 }
 0xba9   :  { %16912 = vmatpush3.xpose.msk.msra.mxu1 %vm1101_vm2, %v22003_v7  ;;  %16913 = vmatprep.mubr.msk.f32.mxu1 %vm17948_vm3, %v21980_v58  ;;  %v11113_v7 = vmul.f32 %v20904_v6, %v19504_v63  ;;  %v11112_v63 = vmul.f32 %v20904_v6, %v19494_v14  ;;  %v11117_v14 = vmul.f32 %v20904_v6, %v19532_v2 }
 0xbaa   :  { %16889 = vmatmul.mubr.msk.f32.vlgmr.msra.gmra.mrb[110].mxu0 %vm4387_vm4, %v9833_v42  ;;  %16921 = vmatprep.subr.mxu1 %v21980_v58 }
 0xbab   :  { %16897 = vmatpush3.xpose.msk.msra.mxu0 %vm1101_vm2, %v21999_v16  ;;  %12736 = vrot.lane.b32.xlu1 %v12491_v46, %s17951_s11  ;;  %v12494_v16 = vmul.f32 %v21002_v51, %v19518_v39  ;;  %v12496_v39 = vmul.f32 %v21002_v51, %v19532_v2 }
 0xbac   :  { %12659 = vrot.lane.b32.xlu0 %v12490_v26, %s17951_s11  ;;  %16898 = vmatprep.mubr.msk.f32.mxu0 %vm17948_vm3, %v21980_v58 }
 0xbad   :  { %16906 = vmatprep.subr.mxu0 %v21980_v58  ;;  %16914 = vmatmul.mubr.msk.f32.vlgmr.msra.gmra.mrb[116].mxu1 %vm1101_vm2, %v11113_v7 }
 0xbae   :  { %16922 = vmatpush3.xpose.msk.msra.mxu1 %vm1101_vm2, %v22005_v10  ;;  %16899 = vmatmul.mubr.msk.f32.vlgmr.msra.gmra.mrb[128].mxu0 %vm1101_vm2, %v11110_v41  ;;  %v11114_v10 = vmul.f32 %v20904_v6, %v19506_v55 }
 0xbaf   :  { %16907 = vmatpush3.xpose.msk.msra.mxu0 %vm1101_vm2, %v22002_v45  ;;  %12813 = vrot.lane.b32.xlu1 %v12492_v34, %s17951_s11  ;;  %v12493_v45 = vmul.f32 %v21002_v51, %v19506_v55  ;;  %v22020_v55 = vld [vmem:[#allocation13_spill] sm:$0xff] }
 0xbb0   :  { %12967 = vrot.lane.b32.xlu0 %v12494_v16, %s17951_s11  ;;  %16923 = vmatprep.mubr.msk.f32.mxu1 %vm17948_vm3, %v21980_v58  ;;  %v11119_v2 = vmul.f32 %v20904_v6, %v22020_v55 }
 0xbb1   :  { %16931 = vmatprep.subr.mxu1 %v21980_v58  ;;  %16908 = vmatprep.mubr.msk.f32.mxu0 %vm17948_vm3, %v21980_v58 }
 0xbb2   :  { %16916 = vmatprep.subr.mxu0 %v21980_v58  ;;  %16924 = vmatmul.mubr.msk.f32.vlgmr.msra.gmra.mrb[118].mxu1 %vm1101_vm2, %v11115_v32 }
 0xbb3   :  { %16932 = vmatpush3.xpose.msk.msra.mxu1 %vm1101_vm2, %v22007_v52  ;;  %16909 = vmatmul.mubr.msk.f32.vlgmr.msra.gmra.mrb[130].mxu0 %vm1101_vm2, %v11112_v63  ;;  %v11116_v52 = vmul.f32 %v20904_v6, %v19520_v54 }
 0xbb4   :  { %16917 = vmatpush3.xpose.msk.msra.mxu0 %vm1101_vm2, %v22004_v15  ;;  %12890 = vrot.lane.b32.xlu1 %v12493_v45, %s17951_s11  ;;  %v12495_v15 = vmul.f32 %v21002_v51, %v19520_v54  ;;  %v22024_v54 = vld [vmem:[#allocation16_spill] sm:$0xff] }
 0xbb5   :  { %13121 = vrot.lane.b32.xlu0 %v12496_v39, %s17951_s11  ;;  %16933 = vmatprep.mubr.msk.f32.mxu1 %vm17948_vm3, %v21980_v58  ;;  %v11121_v9 = vmul.f32 %v20904_v6, %v22024_v54 }
 0xbb6   :  { %16941 = vmatprep.subr.mxu1 %v21980_v58  ;;  %16918 = vmatprep.mubr.msk.f32.mxu0 %vm17948_vm3, %v21980_v58 }
 0xbb7   :  { %16926 = vmatprep.subr.mxu0 %v21980_v58  ;;  %16934 = vmatmul.mubr.msk.f32.vlgmr.msra.gmra.mrb[120].mxu1 %vm1101_vm2, %v11117_v14 }
 0xbb8   :  { %16942 = vmatpush3.xpose.msk.msra.mxu1 %vm1101_vm2, %v22009_v13  ;;  %16919 = vmatmul.mubr.msk.f32.vlgmr.msra.gmra.mrb[132].mxu0 %vm1101_vm2, %v11114_v10 }
 0xbb9   :  { %16927 = vmatpush3.xpose.msk.msra.mxu0 %vm1101_vm2, %v22006_v36  ;;  %13044 = vrot.lane.b32.xlu1 %v12495_v15, %s17951_s11  ;;  %v22021_v36 = vld [vmem:[#allocation12_spill] sm:$0xff] }
 0xbba   :  { %16943 = vmatprep.mubr.msk.f32.mxu1 %vm17948_vm3, %v21980_v58  ;;  %16951 = vmatprep.subr.mxu1 %v21980_v58  ;;  %v12497_v13 = vmul.f32 %v21002_v51, %v22021_v36  ;;  %v11118_v1 = vmul.f32 %v20904_v6, %v22021_v36 }
 0xbbb   :  { %16928 = vmatprep.mubr.msk.f32.mxu0 %vm17948_vm3, %v21980_v58  ;;  %16936 = vmatprep.subr.mxu0 %v21980_v58 }
 0xbbc   :  { %16944 = vmatmul.mubr.msk.f32.vlgmr.msra.gmra.mrb[122].mxu1 %vm1101_vm2, %v11119_v2  ;;  %16929 = vmatmul.mubr.msk.f32.vlgmr.msra.gmra.mrb[134].mxu0 %vm1101_vm2, %v11116_v52 }
 0xbbd   :  { %16952 = vmatpush3.xpose.msk.msra.mxu1 %vm1101_vm2, %v22022_v0  ;;  %16937 = vmatpush3.xpose.msk.msra.mxu0 %vm1101_vm2, %v22023_v23 }
 0xbbe   :  { %13198 = vrot.lane.b32.xlu1 %v12497_v13, %s17951_s11  ;;  %16953 = vmatprep.mubr.msk.f32.mxu1 %vm17948_vm3, %v21980_v58 }
 0xbbf   :  { %16961 = vmatprep.subr.mxu1 %v21980_v58  ;;  %16938 = vmatprep.mubr.msk.f32.mxu0 %vm17948_vm3, %v21980_v58 }
 0xbc0   :  { %16946 = vmatprep.subr.mxu0 %v21980_v58  ;;  %16954 = vmatmul.mubr.msk.f32.vlgmr.msra.gmra.mrb[124].mxu1 %vm1101_vm2, %v11121_v9 }
 0xbc1   :  { %16962 = vmatpush3.xpose.msk.msra.mxu1 %vm1101_vm2, %v22025_v22  ;;  %16939 = vmatmul.mubr.msk.f32.vlgmr.msra.gmra.mrb[136].mxu0 %vm1101_vm2, %v11118_v1 }
 0xbc2   :  { %16947 = vmatpush3.xpose.msk.msra.mxu0 %vm1101_vm2, %v22026_v31  ;;  %16963 = vmatprep.mubr.msk.f32.mxu1 %vm17948_vm3, %v21980_v58 }
 0xbc3   :  { %16948 = vmatprep.mubr.msk.f32.mxu0 %vm17948_vm3, %v21980_v58  ;;  %16956 = vmatprep.subr.mxu0 %v21980_v58 }
 0xbc4   :  { %16964 = vmatmul.mubr.msk.f32.vlgmr.msra.gmra.mrb[126].mxu1 %vm1101_vm2, %v11123_v30  ;;  %16971 = vmatprep.subr.mxu1 %v21980_v58 }
 0xbc5   :  { %16949 = vmatmul.mubr.msk.f32.vlgmr.msra.gmra.mrb[138].mxu0 %vm1101_vm2, %v11120_v40  ;;  %16973 = vmatprep.mubr.msk.f32.mxu1 %vm17948_vm3, %v21980_v58 }
 0xbc6   :  { %16957 = vmatpush3.xpose.msk.msra.mxu0 %vm1101_vm2, %v22028_v57  ;;  %16958 = vmatprep.mubr.msk.f32.mxu0 %vm17948_vm3, %v21980_v58 }
 0xbc7   :  { %16966 = vmatprep.subr.mxu0 %v21980_v58 }
 0xbc9   :  { %16959 = vmatmul.mubr.msk.f32.vlgmr.msra.gmra.mrb[140].mxu0 %vm1101_vm2, %v11122_v21 }
 0xbca   :  { %16967 = vmatpush3.xpose.msk.msra.mxu0 %vm1101_vm2, %v22029_v29  ;;  %16968 = vmatprep.mubr.msk.f32.mxu0 %vm17948_vm3, %v21980_v58 }
 0xbcb   :  { %16976 = vmatprep.subr.mxu0 %v21980_v58 }
 0xbcd   :  { %16969 = vmatmul.mubr.msk.f32.vlgmr.msra.gmra.mrb[142].mxu0 %vm1101_vm2, %v11124_v18 }
 0xbce   :  { %16978 = vmatprep.mubr.msk.f32.mxu0 %vm17948_vm3, %v21980_v58 }
 0xc19   :  { %v12583_v5 = vpop.permute.xlu1 %12582  ;;  %v12506_v56 = vpop.permute.xlu0 %12505 }
 0xc1a   :  { %16972 = vmatpush3.msra.mxu1 %v12506_v56  ;;  %16977 = vmatpush3.msra.mxu0 %v12583_v5 }
 0xc1b   :  { %16981 = vmatprep.subr.mxu1 %v21980_v58  ;;  %16986 = vmatprep.subr.mxu0 %v21980_v58 }
 0xc77   :  { %v11194_v24 = vpop.f32.mrb[112].mxu1 }
 0xc78   :  { %v21163_v43 = vmul.f32 0.35355338, %v11194_v24  ;;  %v16895_v28 = vpop.f32.mrb[113].mxu1 }
 0xc7a   :  { %v12309_v6 = vsel %vm4387_vm4, %v21163_v43, -inf }
 0xc7b   :  { %12310 = vmax.xlane.f32.xlu1 %v12309_v6  ;;  %v11340_v37 = vpop.f32.mrb[114].mxu1 }
 0xc7c   :  { %v16905_v4 = vpop.f32.mrb[115].mxu1  ;;  %v21169_v49 = vmul.f32 0.35355338, %v11340_v37 }
 0xc7e   :  { %v12315_v19 = vsel %vm4387_vm4, %v21169_v49, -inf }
 0xc80   :  { %v11486_v50 = vpop.f32.mrb[116].mxu1 }
 0xc81   :  { %v11267_v3 = vpop.f32.mrb[128].mxu0  ;;  %v16915_v11 = vpop.f32.mrb[117].mxu1  ;;  %v21175_v61 = vmul.f32 0.35355338, %v11486_v50 }
 0xc82   :  { %v21167_v8 = vmul.f32 0.35355338, %v11267_v3  ;;  %v16900_v48 = vpop.f32.mrb[129].mxu0  ;;  %v12499_v3 = vmul.f32 %v21002_v51, %v22027_v12  ;;  %v12498_v11 = vmul.f32 %v21002_v51, %v22020_v55 }
 0xc83   :  { %v12321_v7 = vsel %vm4387_vm4, %v21175_v61, -inf }
 0xc84   :  { %v12312_v25 = vsel %vm4387_vm4, %v21167_v8, -inf }
 0xc85   :  { %v11632_v35 = vpop.f32.mrb[118].mxu1  ;;  %12313 = vmax.xlane.f32.xlu0 %v12312_v25 }
 0xc86   :  { %v11413_v27 = vpop.f32.mrb[130].mxu0  ;;  %v16925_v53 = vpop.f32.mrb[119].mxu1  ;;  %v21181_v44 = vmul.f32 0.35355338, %v11632_v35 }
 0xc87   :  { %v21173_v38 = vmul.f32 0.35355338, %v11413_v27  ;;  %v16910_v33 = vpop.f32.mrb[131].mxu0  ;;  %v21233_v35 = vpop.permute.xlu1 %12736 }
 0xc88   :  { %v12327_v32 = vsel %vm4387_vm4, %v21181_v44, -inf  ;;  %v21241_v33 = vpop.permute.xlu0 %12659 }
 0xc89   :  { %v12318_v17 = vsel %vm4387_vm4, %v21173_v38, -inf  ;;  %12316 = vmax.xlane.f32.xlu0 %v12315_v19 }
 0xc8a   :  { %v11778_v60 = vpop.f32.mrb[120].mxu1  ;;  %12319 = vmax.xlane.f32.xlu1 %v12318_v17 }
 0xc8b   :  { %v11559_v47 = vpop.f32.mrb[132].mxu0  ;;  %v16935_v42 = vpop.f32.mrb[121].mxu1  ;;  %v21191_v63 = vmul.f32 0.35355338, %v11778_v60 }
 0xc8c   :  { %v21183_v46 = vmul.f32 0.35355338, %v11559_v47  ;;  %v16920_v26 = vpop.f32.mrb[133].mxu0  ;;  %v21235_v27 = vpop.permute.xlu1 %12813 }
 0xc8d   :  { %12322 = vmax.xlane.f32.xlu0 %v12321_v7  ;;  %v12333_v13 = vsel %vm4387_vm4, %v21191_v63, -inf  ;;  %v21245_v55 = vpop.permute.xlu0 %12967 }
 0xc8e   :  { %v12324_v41 = vsel %vm4387_vm4, %v21183_v46, -inf }
 0xc8f   :  { %v11924_v34 = vpop.f32.mrb[122].mxu1  ;;  %v11705_v16 = vpop.f32.mrb[134].mxu0  ;;  %12325 = vmax.xlane.f32.xlu1 %v12324_v41 }
 0xc90   :  { %v21193_v45 = vmul.f32 0.35355338, %v11705_v16  ;;  %v16945_v39 = vpop.f32.mrb[123].mxu1  ;;  %v16930_v14 = vpop.f32.mrb[135].mxu0  ;;  %v21197_v2 = vmul.f32 0.35355338, %v11924_v34 }
 0xc91   :  { %12328 = vmax.xlane.f32.xlu0 %v12327_v32  ;;  %v21237_v53 = vpop.permute.xlu1 %12890  ;;  %v21248_v42 = vpop.permute.xlu0 %13121 }
 0xc92   :  { %v12330_v10 = vsel %vm4387_vm4, %v21193_v45, -inf  ;;  %v12339_v40 = vsel %vm4387_vm4, %v21197_v2, -inf }
 0xc93   :  { %v12070_v15 = vpop.f32.mrb[124].mxu1  ;;  %12331 = vmax.xlane.f32.xlu1 %v12330_v10 }
 0xc94   :  { %v11851_v52 = vpop.f32.mrb[136].mxu0  ;;  %v16955_v36 = vpop.f32.mrb[125].mxu1  ;;  %v21205_v22 = vmul.f32 0.35355338, %v12070_v15 }
 0xc95   :  { %v21201_v0 = vmul.f32 0.35355338, %v11851_v52  ;;  %v16940_v23 = vpop.f32.mrb[137].mxu0  ;;  %12334 = vmax.xlane.f32.xlu0 %v12333_v13  ;;  %v21239_v12 = vpop.permute.xlu1 %13044 }
 0xc96   :  { %v12345_v56 = vsel %vm4387_vm4, %v21205_v22, -inf }
 0xc97   :  { %v12216_v9 = vpop.f32.mrb[126].mxu1  ;;  %v12336_v1 = vsel %vm4387_vm4, %v21201_v0, -inf }
 0xc98   :  { %v11997_v31 = vpop.f32.mrb[138].mxu0  ;;  %12337 = vmax.xlane.f32.xlu1 %v12336_v1  ;;  %v16965_v30 = vpop.f32.mrb[127].mxu1  ;;  %v21213_v18 = vmul.f32 0.35355338, %v12216_v9 }
 0xc99   :  { %v21209_v57 = vmul.f32 0.35355338, %v11997_v31  ;;  %v16950_v21 = vpop.f32.mrb[139].mxu0  ;;  %12340 = vmax.xlane.f32.xlu0 %v12339_v40  ;;  %v21243_v19 = vpop.permute.xlu1 %13198 }
 0xc9a   :  { %v12351_v4 = vsel %vm4387_vm4, %v21213_v18, -inf }
 0xc9b   :  { %v12342_v29 = vsel %vm4387_vm4, %v21209_v57, -inf }
 0xc9c   :  { %v12143_v5 = vpop.f32.mrb[140].mxu0  ;;  %12343 = vmax.xlane.f32.xlu1 %v12342_v29 }
 0xc9d   :  { %v21217_v24 = vmul.f32 0.35355338, %v12143_v5  ;;  %v16960_v28 = vpop.f32.mrb[141].mxu0  ;;  %12346 = vmax.xlane.f32.xlu0 %v12345_v56 }
 0xc9f   :  { %v12348_v6 = vsel %vm4387_vm4, %v21217_v24, -inf }
 0xca0   :  { %v12289_v37 = vpop.f32.mrb[142].mxu0  ;;  %12349 = vmax.xlane.f32.xlu1 %v12348_v6 }
 0xca1   :  { %v16970_v50 = vpop.f32.mrb[143].mxu0  ;;  %12352 = vmax.xlane.f32.xlu0 %v12351_v4  ;;  %v21229_v48 = vmul.f32 0.35355338, %v12289_v37  ;;  %v12501_v37 = vmul.f32 %v21002_v51, %v22015_v62  ;;  %v12500_v4 = vmul.f32 %v21002_v51, %v22024_v54 }
 0xca3   :  { %v12354_v25 = vsel %vm4387_vm4, %v21229_v48, -inf }
 0xcb1   :  { %13352 = vrot.lane.b32.xlu1 %v12499_v3, %s17951_s11 }
 0xcb7   :  { %13275 = vrot.lane.b32.xlu0 %v12498_v11, %s17951_s11 }
 0xcd5   :  { %12355 = vmax.xlane.f32.xlu1 %v12354_v25 }
 0xd08   :  { %v12311_v17 = vpop.xlane.xlu1 %12310 }
 0xd09   :  { %v12357_v60 = vsub.f32 %v21163_v43, %v12311_v17 }
 0xd0b   :  { %v12373_v47 = vmul.f32 1.442695, %v12357_v60 }
 0xd0d   :  { %17854 = vpow2.f32 %v12373_v47 }
 0xd12   :  { %v12314_v26 = vpop.xlane.xlu0 %12313 }
 0xd13   :  { %v12358_v7 = vsub.f32 %v21167_v8, %v12314_v26 }
 0xd15   :  { %v12375_v41 = vmul.f32 1.442695, %v12358_v7 }
 0xd16   :  { %v12317_v34 = vpop.xlane.xlu0 %12316 }
 0xd17   :  { %v21251_v16 = vpop.eup %17854  ;;  %17856 = vpow2.f32 %v12375_v41  ;;  %v12320_v32 = vpop.xlane.xlu1 %12319  ;;  %v12359_v39 = vsub.f32 %v21169_v49, %v12317_v34 }
 0xd18   :  { %v12360_v14 = vsub.f32 %v21173_v38, %v12320_v32  ;;  %v12405_v43 = vsel %vm4387_vm4, %v21251_v16, 0.0 }
 0xd19   :  { %v12377_v10 = vmul.f32 1.442695, %v12359_v39  ;;  %12406 = vadd.xlane.f32.xlu1 %v12405_v43 }
 0xd1a   :  { %v12379_v15 = vmul.f32 1.442695, %v12360_v14  ;;  %v12323_v52 = vpop.xlane.xlu0 %12322 }
 0xd1b   :  { %17858 = vpow2.f32 %v12377_v10  ;;  %v12361_v8 = vsub.f32 %v21175_v61, %v12323_v52 }
 0xd1c   :  { %v12326_v36 = vpop.xlane.xlu1 %12325  ;;  %17860 = vpow2.f32 %v12379_v15 }
 0xd1d   :  { %v12362_v13 = vsub.f32 %v21183_v46, %v12326_v36  ;;  %v12381_v23 = vmul.f32 1.442695, %v12361_v8 }
 0xd1e   :  { %v12329_v9 = vpop.xlane.xlu0 %12328 }
 0xd1f   :  { %v12363_v49 = vsub.f32 %v21181_v44, %v12329_v9  ;;  %v12383_v38 = vmul.f32 1.442695, %v12362_v13  ;;  %17862 = vpow2.f32 %v12381_v23 }
 0xd20   :  { %v12332_v50 = vpop.xlane.xlu1 %12331 }
 0xd21   :  { %v21260_v1 = vpop.eup %17856  ;;  %v12385_v31 = vmul.f32 1.442695, %v12363_v49  ;;  %v12364_v11 = vsub.f32 %v21193_v45, %v12332_v50 }
 0xd22   :  { %v12408_v30 = vsel %vm4387_vm4, %v21260_v1, 0.0  ;;  %v12335_v17 = vpop.xlane.xlu0 %12334 }
 0xd23   :  { %17864 = vpow2.f32 %v12385_v31  ;;  %12409 = vadd.xlane.f32.xlu1 %v12408_v30  ;;  %v12387_v60 = vmul.f32 1.442695, %v12364_v11  ;;  %v12365_v47 = vsub.f32 %v21191_v63, %v12335_v17  ;;  %v12503_v11 = vmul.f32 %v21002_v51, %v22019_v20 }
 0xd24   :  { %17866 = vpow2.f32 %v12383_v38 }
 0xd25   :  { %v21264_v40 = vpop.eup %17858  ;;  %v12338_v3 = vpop.xlane.xlu1 %12337  ;;  %17868 = vpow2.f32 %v12387_v60  ;;  %v12389_v7 = vmul.f32 1.442695, %v12365_v47 }
 0xd26   :  { %v12411_v61 = vsel %vm4387_vm4, %v21264_v40, 0.0  ;;  %v21268_v46 = vpop.eup %17860  ;;  %v12366_v62 = vsub.f32 %v21201_v0, %v12338_v3  ;;  %v12341_v41 = vpop.xlane.xlu0 %12340  ;;  %v12502_v3 = vmul.f32 %v21002_v51, %v22018_v59 }
 0xd27   :  { %12412 = vadd.xlane.f32.xlu1 %v12411_v61  ;;  %v12414_v44 = vsel %vm4387_vm4, %v21268_v46, 0.0  ;;  %17870 = vpow2.f32 %v12389_v7  ;;  %v12367_v34 = vsub.f32 %v21197_v2, %v12341_v41 }
 0xd28   :  { %v12391_v54 = vmul.f32 1.442695, %v12366_v62 }
 0xd29   :  { %v21272_v21 = vpop.eup %17862  ;;  %v12344_v25 = vpop.xlane.xlu1 %12343  ;;  %v12393_v39 = vmul.f32 1.442695, %v12367_v34 }
 0xd2a   :  { %v12417_v5 = vsel %vm4387_vm4, %v21272_v21, 0.0  ;;  %17872 = vpow2.f32 %v12391_v54  ;;  %v12368_v45 = vsub.f32 %v21209_v57, %v12344_v25  ;;  %v12347_v43 = vpop.xlane.xlu0 %12346 }
 0xd2b   :  { %12415 = vadd.xlane.f32.xlu1 %v12414_v44  ;;  %17874 = vpow2.f32 %v12393_v39  ;;  %v12369_v52 = vsub.f32 %v21205_v22, %v12347_v43 }
 0xd2c   :  { %v12395_v0 = vmul.f32 1.442695, %v12368_v45 }
 0xd2d   :  { %v21274_v29 = vpop.eup %17864  ;;  %v12350_v26 = vpop.xlane.xlu1 %12349  ;;  %v12397_v36 = vmul.f32 1.442695, %v12369_v52 }
 0xd2e   :  { %v12423_v56 = vsel %vm4387_vm4, %v21274_v29, 0.0  ;;  %v21280_v28 = vpop.eup %17866  ;;  %v12370_v57 = vsub.f32 %v21217_v24, %v12350_v26  ;;  %v12353_v13 = vpop.xlane.xlu0 %12352 }
 0xd2f   :  { %12418 = vadd.xlane.f32.xlu1 %v12417_v5  ;;  %12424 = vadd.xlane.f32.xlu0 %v12423_v56  ;;  %v12420_v6 = vsel %vm4387_vm4, %v21280_v28, 0.0  ;;  %v21298_v10 = vpop.eup %17868  ;;  %v12371_v22 = vsub.f32 %v21213_v18, %v12353_v13 }
 0xd30   :  { %v12426_v2 = vsel %vm4387_vm4, %v21298_v10, 0.0  ;;  %v12399_v9 = vmul.f32 1.442695, %v12370_v57 }
 0xd31   :  { %v21294_v32 = vpop.permute.xlu1 %13352  ;;  %v21303_v8 = vpop.eup %17870  ;;  %v12401_v24 = vmul.f32 1.442695, %v12371_v22 }
 0xd32   :  { %v21349_v59 = vpop.permute.xlu0 %13275 }
 0xd33   :  { %12421 = vadd.xlane.f32.xlu1 %v12420_v6 }
 0xd34   :  { %v21308_v23 = vpop.eup %17872 }
 0xd35   :  { %v12432_v49 = vsel %vm4387_vm4, %v21308_v23, 0.0  ;;  %v21313_v38 = vpop.eup %17874 }
 0xd36   :  { %v12435_v61 = vsel %vm4387_vm4, %v21313_v38, 0.0 }
 0xd44   :  { %13506 = vrot.lane.b32.xlu1 %v12501_v37, %s17951_s11 }
 0xd45   :  { %13429 = vrot.lane.b32.xlu0 %v12500_v4, %s17951_s11 }
 0xd62   :  { %v12356_v14 = vpop.xlane.xlu1 %12355 }
 0xd63   :  { %v12372_v63 = vsub.f32 %v21229_v48, %v12356_v14  ;;  %v12429_v48 = vsel %vm4387_vm4, %v21303_v8, 0.0 }
 0xd65   :  { %v12403_v15 = vmul.f32 1.442695, %v12372_v63 }
 0xd67   :  { %17876 = vpow2.f32 %v12403_v15 }
 0xd68   :  { %12427 = vadd.xlane.f32.xlu1 %v12426_v2  ;;  %17878 = vpow2.f32 %v12395_v0 }
 0xd69   :  { %17880 = vpow2.f32 %v12397_v36 }
 0xd6a   :  { %17882 = vpow2.f32 %v12399_v9 }
 0xd6b   :  { %17884 = vpow2.f32 %v12401_v24 }
 0xd6c   :  { %12430 = vadd.xlane.f32.xlu1 %v12429_v48 }
 0xd70   :  { %12433 = vadd.xlane.f32.xlu1 %v12432_v49 }
 0xd71   :  { %v21315_v31 = vpop.eup %17876 }
 0xd72   :  { %v12450_v30 = vsel %vm4387_vm4, %v21315_v31, 0.0  ;;  %v21321_v44 = vpop.eup %17878 }
 0xd73   :  { %12451 = vadd.xlane.f32.xlu0 %v12450_v30  ;;  %v12438_v18 = vsel %vm4387_vm4, %v21321_v44, 0.0  ;;  %v21325_v5 = vpop.eup %17880 }
 0xd74   :  { %12436 = vadd.xlane.f32.xlu1 %v12435_v61  ;;  %v12441_v56 = vsel %vm4387_vm4, %v21325_v5, 0.0  ;;  %v21329_v6 = vpop.eup %17882 }
 0xd75   :  { %v12444_v37 = vsel %vm4387_vm4, %v21329_v6, 0.0  ;;  %v21333_v4 = vpop.eup %17884 }
 0xd76   :  { %v12447_v50 = vsel %vm4387_vm4, %v21333_v4, 0.0 }
 0xd78   :  { %12439 = vadd.xlane.f32.xlu1 %v12438_v18 }
 0xd7c   :  { %12442 = vadd.xlane.f32.xlu1 %v12441_v56 }
 0xd80   :  { %12445 = vadd.xlane.f32.xlu1 %v12444_v37 }
 0xd84   :  { %12448 = vadd.xlane.f32.xlu1 %v12447_v50 }
 0xd89   :  { %13583 = vrot.lane.b32.xlu0 %v12502_v3, %s17951_s11 }
 0xd95   :  { %13660 = vrot.lane.b32.xlu1 %v12503_v11, %s17951_s11 }
 0xda6   :  { %v12407_v25 = vpop.xlane.xlu1 %12406 }
 0xda7   :  { %17886 = vrcp.f32 %v12407_v25 }
 0xdb0   :  { %v12410_v17 = vpop.xlane.xlu1 %12409 }
 0xdb1   :  { %v17887_v60 = vpop.eup %17886  ;;  %17888 = vrcp.f32 %v12410_v17 }
 0xdb2   :  { %v12469_v47 = vmul.f32 %v17887_v60, %v21251_v16 }
 0xdb4   :  { %v12413_v26 = vpop.xlane.xlu1 %12412  ;;  %16974 = vmatmul.mubr.msk.f32.vlgmr.msra.gmra.mrb[80].mxu1 %vm4387_vm4, %v12469_v47 }
 0xdb5   :  { %17890 = vrcp.f32 %v12413_v26  ;;  %16982 = vmatpush3.msra.mxu1 %v21241_v33  ;;  %16983 = vmatprep.mubr.msk.f32.mxu1 %vm17948_vm3, %v21980_v58 }
 0xdb6   :  { %16991 = vmatprep.subr.mxu1 %v21980_v58 }
 0xdb8   :  { %v12416_v20 = vpop.xlane.xlu1 %12415 }
 0xdb9   :  { %17892 = vrcp.f32 %v12416_v20 }
 0xdbb   :  { %v17889_v51 = vpop.eup %17888 }
 0xdbc   :  { %v12470_v62 = vmul.f32 %v17889_v51, %v21260_v1  ;;  %v12419_v7 = vpop.xlane.xlu1 %12418  ;;  %v12425_v16 = vpop.xlane.xlu0 %12424 }
 0xdbd   :  { %17894 = vrcp.f32 %v12419_v7 }
 0xdbe   :  { %16979 = vmatmul.mubr.msk.f32.vlgmr.msra.gmra.mrb[96].mxu0 %vm4387_vm4, %v12470_v62  ;;  %17896 = vrcp.f32 %v12425_v16 }
 0xdbf   :  { %v17891_v41 = vpop.eup %17890  ;;  %16987 = vmatpush3.msra.mxu0 %v21233_v35  ;;  %16988 = vmatprep.mubr.msk.f32.mxu0 %vm17948_vm3, %v21980_v58 }
 0xdc0   :  { %v12471_v33 = vmul.f32 %v17891_v41, %v21264_v40  ;;  %v12422_v54 = vpop.xlane.xlu1 %12421  ;;  %16996 = vmatprep.subr.mxu0 %v21980_v58 }
 0xdc1   :  { %17898 = vrcp.f32 %v12422_v54 }
 0xdc2   :  { %16984 = vmatmul.mubr.msk.f32.vlgmr.msra.gmra.mrb[82].mxu1 %vm4387_vm4, %v12471_v33 }
 0xdc3   :  { %v17893_v1 = vpop.eup %17892  ;;  %16992 = vmatpush3.msra.mxu1 %v21235_v27  ;;  %16993 = vmatprep.mubr.msk.f32.mxu1 %vm17948_vm3, %v21980_v58 }
 0xdc4   :  { %v12472_v34 = vmul.f32 %v17893_v1, %v21268_v46  ;;  %17001 = vmatprep.subr.mxu1 %v21980_v58 }
 0xdc6   :  { %16989 = vmatmul.mubr.msk.f32.vlgmr.msra.gmra.mrb[98].mxu0 %vm4387_vm4, %v12472_v34 }
 0xdc7   :  { %v17895_v35 = vpop.eup %17894  ;;  %16997 = vmatpush3.msra.mxu0 %v21237_v53  ;;  %16998 = vmatprep.mubr.msk.f32.mxu0 %vm17948_vm3, %v21980_v58 }
 0xdc8   :  { %v12473_v40 = vmul.f32 %v17895_v35, %v21272_v21  ;;  %17006 = vmatprep.subr.mxu0 %v21980_v58  ;;  %v17897_v27 = vpop.eup %17896 }
 0xdc9   :  { %v12475_v46 = vmul.f32 %v17897_v27, %v21274_v29 }
 0xdca   :  { %16994 = vmatmul.mubr.msk.f32.vlgmr.msra.gmra.mrb[84].mxu1 %vm4387_vm4, %v12473_v40 }
 0xdcb   :  { %v17899_v45 = vpop.eup %17898  ;;  %17002 = vmatpush3.msra.mxu1 %v21245_v55  ;;  %17003 = vmatprep.mubr.msk.f32.mxu1 %vm17948_vm3, %v21980_v58  ;;  %v13507_v55 = vpop.permute.xlu1 %13506 }
 0xdcc   :  { %v12474_v53 = vmul.f32 %v17899_v45, %v21280_v28  ;;  %17011 = vmatprep.subr.mxu1 %v21980_v58 }
 0xdce   :  { %16999 = vmatmul.mubr.msk.f32.vlgmr.msra.gmra.mrb[100].mxu0 %vm4387_vm4, %v12474_v53  ;;  %17004 = vmatmul.mubr.msk.f32.vlgmr.msra.gmra.mrb[86].mxu1 %vm4387_vm4, %v12475_v46 }
 0xdcf   :  { %17007 = vmatpush3.msra.mxu0 %v21239_v12  ;;  %17012 = vmatpush3.msra.mxu1 %v21248_v42 }
 0xdd0   :  { %17008 = vmatprep.mubr.msk.f32.mxu0 %vm17948_vm3, %v21980_v58  ;;  %17016 = vmatprep.subr.mxu0 %v21980_v58 }
 0xdd1   :  { %17013 = vmatprep.mubr.msk.f32.mxu1 %vm17948_vm3, %v21980_v58  ;;  %17021 = vmatprep.subr.mxu1 %v21980_v58 }
 0xdf5   :  { %v12428_v21 = vpop.xlane.xlu1 %12427 }
 0xdf6   :  { %17900 = vrcp.f32 %v12428_v21  ;;  %v22031_v21 = vld [vmem:[#allocation65_spill] sm:$0xff] }
 0xdf9   :  { %v12431_v29 = vpop.xlane.xlu1 %12430 }
 0xdfa   :  { %17902 = vrcp.f32 %v12431_v29  ;;  %v22032_v29 = vld [vmem:[#allocation66_spill] sm:$0xff] }
 0xdfd   :  { %v12434_v28 = vpop.xlane.xlu1 %12433 }
 0xdfe   :  { %17904 = vrcp.f32 %v12434_v28  ;;  %v17428_v28 = vpack.c.bf16 %v22032_v29, %v22031_v21 }
 0xe00   :  { %v17901_v12 = vpop.eup %17900 }
 0xe01   :  { %v12476_v42 = vmul.f32 %v17901_v12, %v21298_v10  ;;  %v12437_v39 = vpop.xlane.xlu1 %12436  ;;  %v13430_v10 = vpop.permute.xlu0 %13429  ;;  %v22033_v12 = vld [vmem:[#allocation69_spill] sm:$0xff] }
 0xe02   :  { %17906 = vrcp.f32 %v12437_v39 }
 0xe03   :  { %17009 = vmatmul.mubr.msk.f32.vlgmr.msra.gmra.mrb[102].mxu0 %vm4387_vm4, %v12476_v42  ;;  %v22034_v42 = vld [vmem:[#allocation70_spill] sm:$0xff] }
 0xe04   :  { %v17903_v14 = vpop.eup %17902  ;;  %17017 = vmatpush3.msra.mxu0 %v21243_v19  ;;  %17018 = vmatprep.mubr.msk.f32.mxu0 %vm17948_vm3, %v21980_v58  ;;  %v17434_v39 = vpack.c.bf16 %v22034_v42, %v22033_v12 }
 0xe05   :  { %v12477_v43 = vmul.f32 %v17903_v14, %v21303_v8  ;;  %v12440_v63 = vpop.xlane.xlu1 %12439  ;;  %17026 = vmatprep.subr.mxu0 %v21980_v58  ;;  %v12452_v2 = vpop.xlane.xlu0 %12451 }
 0xe06   :  { %17908 = vrcp.f32 %v12440_v63 }
 0xe07   :  { %17014 = vmatmul.mubr.msk.f32.vlgmr.msra.gmra.mrb[88].mxu1 %vm4387_vm4, %v12477_v43 }
 0xe08   :  { %v17905_v15 = vpop.eup %17904  ;;  %17022 = vmatpush3.msra.mxu1 %v21349_v59  ;;  %17023 = vmatprep.mubr.msk.f32.mxu1 %vm17948_vm3, %v21980_v58 }
 0xe09   :  { %v12478_v19 = vmul.f32 %v17905_v15, %v21308_v23  ;;  %v12443_v0 = vpop.xlane.xlu1 %12442  ;;  %17031 = vmatprep.subr.mxu1 %v21980_v58  ;;  %v13584_v9 = vpop.permute.xlu0 %13583 }
 0xe0a   :  { %17910 = vrcp.f32 %v12443_v0 }
 0xe0b   :  { %17019 = vmatmul.mubr.msk.f32.vlgmr.msra.gmra.mrb[104].mxu0 %vm4387_vm4, %v12478_v19 }
 0xe0c   :  { %v17907_v52 = vpop.eup %17906  ;;  %17027 = vmatpush3.msra.mxu0 %v21294_v32  ;;  %17028 = vmatprep.mubr.msk.f32.mxu0 %vm17948_vm3, %v21980_v58 }
 0xe0d   :  { %v12479_v8 = vmul.f32 %v17907_v52, %v21313_v38  ;;  %v12446_v57 = vpop.xlane.xlu1 %12445  ;;  %17036 = vmatprep.subr.mxu0 %v21980_v58 }
 0xe0e   :  { %17912 = vrcp.f32 %v12446_v57 }
 0xe0f   :  { %17024 = vmatmul.mubr.msk.f32.vlgmr.msra.gmra.mrb[90].mxu1 %vm4387_vm4, %v12479_v8  ;;  %17914 = vrcp.f32 %v12452_v2 }
 0xe10   :  { %v17909_v36 = vpop.eup %17908  ;;  %17032 = vmatpush3.msra.mxu1 %v13430_v10  ;;  %17033 = vmatprep.mubr.msk.f32.mxu1 %vm17948_vm3, %v21980_v58 }
 0xe11   :  { %v12480_v32 = vmul.f32 %v17909_v36, %v21321_v44  ;;  %v12449_v13 = vpop.xlane.xlu1 %12448  ;;  %17041 = vmatprep.subr.mxu1 %v21980_v58 }
 0xe12   :  { %17916 = vrcp.f32 %v12449_v13 }
 0xe13   :  { %17029 = vmatmul.mubr.msk.f32.vlgmr.msra.gmra.mrb[106].mxu0 %vm4387_vm4, %v12480_v32 }
 0xe14   :  { %v17911_v48 = vpop.eup %17910  ;;  %17037 = vmatpush3.msra.mxu0 %v13507_v55  ;;  %17038 = vmatprep.mubr.msk.f32.mxu0 %vm17948_vm3, %v21980_v58  ;;  %v22030_v55 = vmov 0.0|0.0  }
 0xe15   :  { %v12481_v23 = vmul.f32 %v17911_v48, %v21325_v5  ;;  %17046 = vmatprep.subr.mxu0 %v21980_v58  ;;  %v13661_v24 = vpop.permute.xlu1 %13660 }
 0xe17   :  { %17034 = vmatmul.mubr.msk.f32.vlgmr.msra.gmra.mrb[92].mxu1 %vm4387_vm4, %v12481_v23 }
 0xe18   :  { %v17913_v22 = vpop.eup %17912  ;;  %17042 = vmatpush3.msra.mxu1 %v13584_v9  ;;  %17043 = vmatprep.mubr.msk.f32.mxu1 %vm17948_vm3, %v21980_v58 }
 0xe19   :  { %v12482_v49 = vmul.f32 %v17913_v22, %v21329_v6  ;;  %v17915_v38 = vpop.eup %17914  ;;  %17427 = vmatprep.subr.bf16.mxu1 %v22030_v55 }
 0xe1a   :  { %v12484_v61 = vmul.f32 %v17915_v38, %v21315_v31 }
 0xe1b   :  { %17039 = vmatmul.mubr.msk.f32.vlgmr.msra.gmra.mrb[108].mxu0 %vm4387_vm4, %v12482_v49 }
 0xe1c   :  { %v17917_v30 = vpop.eup %17916  ;;  %17047 = vmatpush3.msra.mxu0 %v13661_v24  ;;  %17048 = vmatprep.mubr.msk.f32.mxu0 %vm17948_vm3, %v21980_v58 }
 0xe1d   :  { %v12483_v44 = vmul.f32 %v17917_v30, %v21333_v4  ;;  %17433 = vmatprep.subr.bf16.mxu0 %v22030_v55 }
 0xe1f   :  { %17044 = vmatmul.mubr.msk.f32.vlgmr.msra.gmra.mrb[94].mxu1 %vm4387_vm4, %v12483_v44  ;;  %17049 = vmatmul.mubr.msk.f32.vlgmr.msra.gmra.mrb[110].mxu0 %vm4387_vm4, %v12484_v61 }
 0xe87   :  { %v12577_v18 = vpop.f32.mrb[80].mxu1 }
 0xe88   :  { %v16975_v5 = vpop.f32.mrb[81].mxu1 }
 0xe91   :  { %v12654_v56 = vpop.f32.mrb[96].mxu0 }
 0xe92   :  { %v16980_v6 = vpop.f32.mrb[97].mxu0 }
 0xe95   :  { %v21427_v37 = vpop.f32.mrb[82].mxu1 }
 0xe96   :  { %v16985_v50 = vpop.f32.mrb[83].mxu1 }
 0xe99   :  { %v21429_v3 = vpop.f32.mrb[98].mxu0 }
 0xe9a   :  { %v16990_v11 = vpop.f32.mrb[99].mxu0 }
 0xe9d   :  { %v21431_v25 = vpop.f32.mrb[84].mxu1 }
 0xe9e   :  { %v16995_v17 = vpop.f32.mrb[85].mxu1 }
 0xea1   :  { %v21433_v31 = vpop.f32.mrb[100].mxu0  ;;  %v21435_v4 = vpop.f32.mrb[86].mxu1 }
 0xea2   :  { %v17000_v60 = vpop.f32.mrb[101].mxu0  ;;  %v17005_v47 = vpop.f32.mrb[87].mxu1 }
 0xed6   :  { %v21437_v26 = vpop.f32.mrb[102].mxu0 }
 0xed7   :  { %v17010_v59 = vpop.f32.mrb[103].mxu0 }
 0xeda   :  { %v21439_v20 = vpop.f32.mrb[88].mxu1 }
 0xedb   :  { %v17015_v51 = vpop.f32.mrb[89].mxu1 }
 0xede   :  { %v21441_v62 = vpop.f32.mrb[104].mxu0 }
 0xedf   :  { %v17020_v7 = vpop.f32.mrb[105].mxu0 }
 0xee2   :  { %v21443_v16 = vpop.f32.mrb[90].mxu1 }
 0xee3   :  { %v17025_v41 = vpop.f32.mrb[91].mxu1 }
 0xee6   :  { %v21445_v33 = vpop.f32.mrb[106].mxu0 }
 0xee7   :  { %v17030_v54 = vpop.f32.mrb[107].mxu0 }
 0xeea   :  { %v21447_v1 = vpop.f32.mrb[92].mxu1 }
 0xeeb   :  { %v17035_v34 = vpop.f32.mrb[93].mxu1 }
 0xeee   :  { %v21449_v35 = vpop.f32.mrb[108].mxu0 }
 0xeef   :  { %v17040_v40 = vpop.f32.mrb[109].mxu0 }
 0xef2   :  { %v21451_v27 = vpop.f32.mrb[94].mxu1  ;;  %v21453_v45 = vpop.f32.mrb[110].mxu0 }
 0xef3   :  { %v17045_v46 = vpop.f32.mrb[95].mxu1  ;;  %v17050_v53 = vpop.f32.mrb[111].mxu0 }
 0xef4   :  { %17942 = dma.done.wait [#allocation4 + $0x1], 8192 }
 0xef5   :  { %17943 = vsyncadd [#allocation4 + $0x1], 4294959104  ;;  %17059 = vmatprep.mubr.msk.f32.mxu1 %vm17948_vm3, %v21980_v58  ;;  %17070 = vmatprep.mubr.msk.f32.mxu0 %vm17948_vm3, %v21980_v58  ;;  %v22035_v14 = vld [vmem:[#allocation67_spill] sm:$0xff]  ;;  %v22036_v43 = vld [vmem:[#allocation68_spill] sm:$0xff]  ;;  %s17952_s4 = smov [#allocation5]  }
 0xef6   :  { %17429 = vmatpush3.bf16.msra.mxu1 %v17428_v28  ;;  %17435 = vmatpush3.bf16.msra.mxu0 %v17434_v39  ;;  %v17431_v63 = vpack.c.bf16 %v22036_v43, %v22035_v14  ;;  %v22037_v15 = vld [vmem:[#allocation71_spill] sm:$0xff]  ;;  %v22038_v10 = vld [vmem:[#allocation72_spill] sm:$0xff]  ;;  %v22039_v0 = vld [vmem:[#allocation73_spill] sm:$0xff]  ;;  %s15119_s13 = sshll.u32 %s17952_s4, 4  ;;  %s15120_s13 = int_to_ptr.vmem [resolvable:$true] %s15119_s13 }
 0xef7   :  { %v17437_v19 = vpack.c.bf16 %v22038_v10, %v22037_v15  ;;  %17430 = vmatprep.subr.bf16.mxu1 %v22030_v55  ;;  %17436 = vmatprep.subr.bf16.mxu0 %v22030_v55  ;;  %v22040_v52 = vld [vmem:[#allocation74_spill] sm:$0xff]  ;;  %v22041_v8 = vld [vmem:[#allocation77_spill] sm:$0xff]  ;;  %v22043_v32 = vld [vmem:[#allocation75_spill] sm:$0xff]  ;;  %s17918_s8 = scalar_lea.vmem %s15120_s13, 2048  ;;  %p17923_p1 = scmp.lt.s32.totalorder %s15120_s13, %s15120_s13 }
 0xef8   :  { %v17440_v2 = vpack.c.bf16 %v22040_v52, %v22039_v0  ;;  %v22042_v57 = vld [vmem:[#allocation78_spill] sm:$0xff]  ;;  %v22044_v13 = vld [vmem:[#allocation76_spill] sm:$0xff]  ;;  %v22045_v23 = vld [vmem:[#allocation79_spill] sm:$0xff]  ;;  %p17919_p0 = scmp.ne.s32.totalorder %s15120_s13, %s17918_s8  ;;  %p17924_p2 = scmp.lt.s32.totalorder %s17918_s8, %s17918_s8 }
 0xef9   :  { %v17446_v36 = vpack.c.bf16 %v22042_v57, %v22041_v8  ;;  %v17443_v48 = vpack.c.bf16 %v22044_v13, %v22043_v32  ;;  %v22046_v9 = vld [vmem:[#allocation80_spill] sm:$0xff]  ;;  %v22047_v49 = vld [vmem:[#allocation81_spill] sm:$0xff]  ;;  %v22048_v38 = vld [vmem:[#allocation82_spill] sm:$0xff] }
 0xefa   :  { %17432 = vmatpush3.bf16.msra.mxu1 %v17431_v63  ;;  %17438 = vmatpush3.bf16.msra.mxu0 %v17437_v19  ;;  %v17449_v22 = vpack.c.bf16 %v22046_v9, %v22045_v23  ;;  %v17452_v24 = vpack.c.bf16 %v22048_v38, %v22047_v49  ;;  %v22049_v30 = vld [vmem:[#allocation85_spill] sm:$0xff]  ;;  %v22050_v61 = vld [vmem:[#allocation86_spill] sm:$0xff]  ;;  %v22052_v5 = vld [vmem:[#allocation84_spill] sm:$0xff]  ;;  %p17925_p3 = por %p17924_p2, %p17923_p1 }
 0xefb   :  { %17439 = vmatprep.subr.bf16.mxu1 %v22030_v55  ;;  %17445 = vmatprep.subr.bf16.mxu0 %v22030_v55  ;;  %v17458_v44 = vpack.c.bf16 %v22050_v61, %v22049_v30  ;;  %v22053_v6 = vld [vmem:[#allocation87_spill] sm:$0xff]  ;;  %v22054_v50 = vld [vmem:[#allocation88_spill] sm:$0xff]  ;;  %v22057_v60 = vld [vmem:[#allocation93_spill] sm:$0xff] }
 0xefc   :  { %v17461_v11 = vpack.c.bf16 %v22054_v50, %v22053_v6  ;;  %v22058_v47 = vld [vmem:[#allocation94_spill] sm:$0xff]  ;;  %v22059_v51 = vld [vmem:[#allocation91_spill] sm:$0xff]  ;;  %v22060_v7 = vld [vmem:[#allocation92_spill] sm:$0xff]  ;;  %p17926_p4 = pnand %p17925_p3, %p17919_p0 }
 0xefd   :  { %17060 = vmatmul.mubr.msk.f32.vlgmr.msra.gmra.mrb[128].mxu1 %vm1101_vm2, %v12577_v18  ;;  %17071 = vmatmul.mubr.msk.f32.vlgmr.msra.gmra.mrb[144].mxu0 %vm1101_vm2, %v12654_v56  ;;  %v22051_v18 = vld [vmem:[#allocation83_spill] sm:$0xff]  ;;  %v17470_v59 = vpack.c.bf16 %v22058_v47, %v22057_v60  ;;  %v17467_v41 = vpack.c.bf16 %v22060_v7, %v22059_v51  ;;  %v22062_v34 = vld [vmem:[#allocation96_spill] sm:$0xff]  ;;  %v22065_v53 = vld [vmem:[#allocation101_spill] sm:$0xff] }
 0xefe   :  { %17441 = vmatpush3.bf16.msra.mxu1 %v17440_v2  ;;  %17447 = vmatpush3.bf16.msra.mxu0 %v17446_v36  ;;  %v17455_v56 = vpack.c.bf16 %v22052_v5, %v22051_v18  ;;  %v22061_v54 = vld [vmem:[#allocation95_spill] sm:$0xff]  ;;  %v22066_v21 = vld [vmem:[#allocation102_spill] sm:$0xff]  ;;  %v22068_v12 = vld [vmem:[#allocation100_spill] sm:$0xff] }
 0xeff   :  { %17442 = vmatprep.subr.bf16.mxu1 %v22030_v55  ;;  %17448 = vmatprep.subr.bf16.mxu0 %v22030_v55  ;;  %v17473_v40 = vpack.c.bf16 %v22062_v34, %v22061_v54  ;;  %v17482_v29 = vpack.c.bf16 %v22066_v21, %v22065_v53  ;;  %v22067_v28 = vld [vmem:[#allocation99_spill] sm:$0xff]  ;;  %v22070_v14 = vld [vmem:[#allocation104_spill] sm:$0xff]  ;;  %v22073_v15 = vld [vmem:[#allocation109_spill] sm:$0xff] }
 0xf00   :  { %17081 = vmatprep.mubr.msk.f32.mxu1 %vm17948_vm3, %v21980_v58  ;;  %17092 = vmatprep.mubr.msk.f32.mxu0 %vm17948_vm3, %v21980_v58  ;;  %v17479_v42 = vpack.c.bf16 %v22068_v12, %v22067_v28  ;;  %v22069_v39 = vld [vmem:[#allocation103_spill] sm:$0xff]  ;;  %v22074_v10 = vld [vmem:[#allocation110_spill] sm:$0xff]  ;;  %v22076_v52 = vld [vmem:[#allocation108_spill] sm:$0xff] }
 0xf01   :  { %v17485_v43 = vpack.c.bf16 %v22070_v14, %v22069_v39  ;;  %v17494_v19 = vpack.c.bf16 %v22074_v10, %v22073_v15  ;;  %v22075_v0 = vld [vmem:[#allocation107_spill] sm:$0xff]  ;;  %v22078_v57 = vld [vmem:[#allocation112_spill] sm:$0xff]  ;;  %v22081_v13 = vld [vmem:[#allocation117_spill] sm:$0xff] }
 0xf02   :  { %17444 = vmatpush3.bf16.msra.mxu1 %v17443_v48  ;;  %17450 = vmatpush3.bf16.msra.mxu0 %v17449_v22  ;;  %v17491_v2 = vpack.c.bf16 %v22076_v52, %v22075_v0  ;;  %v22077_v8 = vld [vmem:[#allocation111_spill] sm:$0xff]  ;;  %v22082_v48 = vld [vmem:[#allocation118_spill] sm:$0xff]  ;;  %v22084_v22 = vld [vmem:[#allocation116_spill] sm:$0xff] }
 0xf03   :  { %17451 = vmatprep.subr.bf16.mxu1 %v22030_v55  ;;  %17457 = vmatprep.subr.bf16.mxu0 %v22030_v55  ;;  %v17497_v36 = vpack.c.bf16 %v22078_v57, %v22077_v8  ;;  %v17506_v23 = vpack.c.bf16 %v22082_v48, %v22081_v13  ;;  %v22083_v9 = vld [vmem:[#allocation115_spill] sm:$0xff]  ;;  %v22090_v18 = vld [vmem:[#allocation126_spill] sm:$0xff]  ;;  %v22092_v6 = vld [vmem:[#allocation124_spill] sm:$0xff] }
 0xf04   :  { %v17503_v49 = vpack.c.bf16 %v22084_v22, %v22083_v9  ;;  %v22085_v38 = vld [vmem:[#allocation119_spill] sm:$0xff]  ;;  %v15433_v39 = vld [vmem:[%s21701_s12 + $0x7] ss:$0 sm:$0xff]  ;;  %v15434_v10 = vld [vmem:[%s21701_s12 + $0x8] ss:$0 sm:$0xff] }
 0xf05   :  { %17082 = vmatmul.mubr.msk.f32.vlgmr.msra.gmra.mrb[130].mxu1 %vm1101_vm2, %v21427_v37  ;;  %17093 = vmatmul.mubr.msk.f32.vlgmr.msra.gmra.mrb[146].mxu0 %vm1101_vm2, %v21429_v3  ;;  %v22055_v37 = vld [vmem:[#allocation89_spill] sm:$0xff]  ;;  %v22056_v3 = vld [vmem:[#allocation90_spill] sm:$0xff] }
 0xf06   :  { %17453 = vmatpush3.bf16.msra.mxu1 %v17452_v24  ;;  %17459 = vmatpush3.bf16.msra.mxu0 %v17458_v44  ;;  %v17464_v17 = vpack.c.bf16 %v22056_v3, %v22055_v37  ;;  %v22086_v24 = vld [vmem:[#allocation120_spill] sm:$0xff]  ;;  %v22089_v44 = vld [vmem:[#allocation125_spill] sm:$0xff] }
 0xf07   :  { %17454 = vmatprep.subr.bf16.mxu1 %v22030_v55  ;;  %17460 = vmatprep.subr.bf16.mxu0 %v22030_v55  ;;  %v17509_v30 = vpack.c.bf16 %v22086_v24, %v22085_v38  ;;  %v17518_v5 = vpack.c.bf16 %v22090_v18, %v22089_v44  ;;  %v22094_v37 = vld [vmem:[#allocation128_spill] sm:$0xff]  ;;  %v15439_v38 = vld [vmem:[%s21701_s12 + $0xd] ss:$0 sm:$0xff]  ;;  %v15440_v18 = vld [vmem:[%s21701_s12 + $0xe] ss:$0 sm:$0xff] }
 0xf08   :  { %17103 = vmatprep.mubr.msk.f32.mxu1 %vm17948_vm3, %v21980_v58  ;;  %17114 = vmatprep.mubr.msk.f32.mxu0 %vm17948_vm3, %v21980_v58 }
 0xf0a   :  { %17456 = vmatpush3.bf16.msra.mxu1 %v17455_v56  ;;  %17462 = vmatpush3.bf16.msra.mxu0 %v17461_v11  ;;  %v22091_v56 = vld [vmem:[#allocation123_spill] sm:$0xff] }
 0xf0b   :  { %17463 = vmatprep.subr.bf16.mxu1 %v22030_v55  ;;  %17469 = vmatprep.subr.bf16.mxu0 %v22030_v55  ;;  %v17515_v50 = vpack.c.bf16 %v22092_v6, %v22091_v56  ;;  %v22093_v11 = vld [vmem:[#allocation127_spill] sm:$0xff] }
 0xf0c   :  { %v17521_v3 = vpack.c.bf16 %v22094_v37, %v22093_v11 }
 0xf0d   :  { %17104 = vmatmul.mubr.msk.f32.vlgmr.msra.gmra.mrb[132].mxu1 %vm1101_vm2, %v21431_v25  ;;  %17115 = vmatmul.mubr.msk.f32.vlgmr.msra.gmra.mrb[148].mxu0 %vm1101_vm2, %v21433_v31  ;;  %v22063_v25 = vld [vmem:[#allocation97_spill] sm:$0xff]  ;;  %v22064_v31 = vld [vmem:[#allocation98_spill] sm:$0xff] }
 0xf0e   :  { %17465 = vmatpush3.bf16.msra.mxu1 %v17464_v17  ;;  %17471 = vmatpush3.bf16.msra.mxu0 %v17470_v59  ;;  %v17476_v46 = vpack.c.bf16 %v22064_v31, %v22063_v25  ;;  %v15430_v25 = vld [vmem:[%s21701_s12 + $0x4] ss:$0 sm:$0xff]  ;;  %v15431_v31 = vld [vmem:[%s21701_s12 + $0x5] ss:$0 sm:$0xff] }
 0xf0f   :  { %17466 = vmatprep.subr.bf16.mxu1 %v22030_v55  ;;  %17472 = vmatprep.subr.bf16.mxu0 %v22030_v55 }
 0xf10   :  { %17125 = vmatprep.mubr.msk.f32.mxu1 %vm17948_vm3, %v21980_v58  ;;  %17136 = vmatprep.mubr.msk.f32.mxu0 %vm17948_vm3, %v21980_v58 }
 0xf12   :  { %17468 = vmatpush3.bf16.msra.mxu1 %v17467_v41  ;;  %17474 = vmatpush3.bf16.msra.mxu0 %v17473_v40 }
 0xf13   :  { %17475 = vmatprep.subr.bf16.mxu1 %v22030_v55  ;;  %17481 = vmatprep.subr.bf16.mxu0 %v22030_v55 }
 0xf15   :  { %17126 = vmatmul.mubr.msk.f32.vlgmr.msra.gmra.mrb[134].mxu1 %vm1101_vm2, %v21435_v4  ;;  %17137 = vmatmul.mubr.msk.f32.vlgmr.msra.gmra.mrb[150].mxu0 %vm1101_vm2, %v21437_v26  ;;  %v22071_v4 = vld [vmem:[#allocation105_spill] sm:$0xff]  ;;  %v22072_v26 = vld [vmem:[#allocation106_spill] sm:$0xff] }
 0xf16   :  { %17477 = vmatpush3.bf16.msra.mxu1 %v17476_v46  ;;  %17483 = vmatpush3.bf16.msra.mxu0 %v17482_v29  ;;  %v17488_v63 = vpack.c.bf16 %v22072_v26, %v22071_v4 }
 0xf17   :  { %17478 = vmatprep.subr.bf16.mxu1 %v22030_v55  ;;  %17484 = vmatprep.subr.bf16.mxu0 %v22030_v55 }
 0xf18   :  { %17147 = vmatprep.mubr.msk.f32.mxu1 %vm17948_vm3, %v21980_v58  ;;  %17158 = vmatprep.mubr.msk.f32.mxu0 %vm17948_vm3, %v21980_v58 }
 0xf1a   :  { %17480 = vmatpush3.bf16.msra.mxu1 %v17479_v42  ;;  %17486 = vmatpush3.bf16.msra.mxu0 %v17485_v43  ;;  %v15432_v42 = vld [vmem:[%s21701_s12 + $0x6] ss:$0 sm:$0xff] }
 0xf1b   :  { %17487 = vmatprep.subr.bf16.mxu1 %v22030_v55  ;;  %17493 = vmatprep.subr.bf16.mxu0 %v22030_v55 }
 0xf1d   :  { %17148 = vmatmul.mubr.msk.f32.vlgmr.msra.gmra.mrb[136].mxu1 %vm1101_vm2, %v21439_v20  ;;  %17159 = vmatmul.mubr.msk.f32.vlgmr.msra.gmra.mrb[152].mxu0 %vm1101_vm2, %v21441_v62  ;;  %v22079_v20 = vld [vmem:[#allocation113_spill] sm:$0xff]  ;;  %v22080_v62 = vld [vmem:[#allocation114_spill] sm:$0xff] }
 0xf1e   :  { %17489 = vmatpush3.bf16.msra.mxu1 %v17488_v63  ;;  %17495 = vmatpush3.bf16.msra.mxu0 %v17494_v19  ;;  %v17500_v32 = vpack.c.bf16 %v22080_v62, %v22079_v20  ;;  %v15435_v19 = vld [vmem:[%s21701_s12 + $0x9] ss:$0 sm:$0xff]  ;;  %v15436_v20 = vld [vmem:[%s21701_s12 + $0xa] ss:$0 sm:$0xff]  ;;  %v15437_v62 = vld [vmem:[%s21701_s12 + $0xb] ss:$0 sm:$0xff] }
 0xf1f   :  { %17490 = vmatprep.subr.bf16.mxu1 %v22030_v55  ;;  %17496 = vmatprep.subr.bf16.mxu0 %v22030_v55 }
 0xf20   :  { %17169 = vmatprep.mubr.msk.f32.mxu1 %vm17948_vm3, %v21980_v58  ;;  %17180 = vmatprep.mubr.msk.f32.mxu0 %vm17948_vm3, %v21980_v58 }
 0xf22   :  { %17492 = vmatpush3.bf16.msra.mxu1 %v17491_v2  ;;  %17498 = vmatpush3.bf16.msra.mxu0 %v17497_v36 }
 0xf23   :  { %17499 = vmatprep.subr.bf16.mxu1 %v22030_v55  ;;  %17505 = vmatprep.subr.bf16.mxu0 %v22030_v55 }
 0xf25   :  { %17170 = vmatmul.mubr.msk.f32.vlgmr.msra.gmra.mrb[138].mxu1 %vm1101_vm2, %v21443_v16  ;;  %17181 = vmatmul.mubr.msk.f32.vlgmr.msra.gmra.mrb[154].mxu0 %vm1101_vm2, %v21445_v33  ;;  %v22087_v16 = vld [vmem:[#allocation121_spill] sm:$0xff]  ;;  %v22088_v33 = vld [vmem:[#allocation122_spill] sm:$0xff] }
 0xf26   :  { %17501 = vmatpush3.bf16.msra.mxu1 %v17500_v32  ;;  %17507 = vmatpush3.bf16.msra.mxu0 %v17506_v23  ;;  %v17512_v61 = vpack.c.bf16 %v22088_v33, %v22087_v16 }
 0xf27   :  { %17502 = vmatprep.subr.bf16.mxu1 %v22030_v55  ;;  %17508 = vmatprep.subr.bf16.mxu0 %v22030_v55 }
 0xf28   :  { %17191 = vmatprep.mubr.msk.f32.mxu1 %vm17948_vm3, %v21980_v58  ;;  %17202 = vmatprep.mubr.msk.f32.mxu0 %vm17948_vm3, %v21980_v58 }
 0xf2a   :  { %17504 = vmatpush3.bf16.msra.mxu1 %v17503_v49  ;;  %17510 = vmatpush3.bf16.msra.mxu0 %v17509_v30  ;;  %v15438_v49 = vld [vmem:[%s21701_s12 + $0xc] ss:$0 sm:$0xff] }
 0xf2b   :  { %17511 = vmatprep.subr.bf16.mxu1 %v22030_v55  ;;  %17517 = vmatprep.subr.bf16.mxu0 %v22030_v55 }
 0xf2d   :  { %17192 = vmatmul.mubr.msk.f32.vlgmr.msra.gmra.mrb[140].mxu1 %vm1101_vm2, %v21447_v1  ;;  %17203 = vmatmul.mubr.msk.f32.vlgmr.msra.gmra.mrb[156].mxu0 %vm1101_vm2, %v21449_v35  ;;  %v15426_v1 = vld [vmem:[%s21701_s12] ss:$0 sm:$0xff]  ;;  %v15427_v35 = vld [vmem:[%s21701_s12 + $0x1] ss:$0 sm:$0xff] }
 0xf2e   :  { %17513 = vmatpush3.bf16.msra.mxu1 %v17512_v61  ;;  %17519 = vmatpush3.bf16.msra.mxu0 %v17518_v5  ;;  %v15441_v5 = vld [vmem:[%s21701_s12 + $0xf] ss:$0 sm:$0xff] }
 0xf2f   :  { %17514 = vmatprep.subr.bf16.mxu1 %v22030_v55  ;;  %17520 = vmatprep.subr.bf16.mxu0 %v22030_v55 }
 0xf30   :  { %17213 = vmatprep.mubr.msk.f32.mxu1 %vm17948_vm3, %v21980_v58  ;;  %17224 = vmatprep.mubr.msk.f32.mxu0 %vm17948_vm3, %v21980_v58 }
 0xf32   :  { %17516 = vmatpush3.bf16.msra.mxu1 %v17515_v50  ;;  %17522 = vmatpush3.bf16.msra.mxu0 %v17521_v3 }
 0xf35   :  { %17214 = vmatmul.mubr.msk.f32.vlgmr.msra.gmra.mrb[142].mxu1 %vm1101_vm2, %v21451_v27  ;;  %17225 = vmatmul.mubr.msk.f32.vlgmr.msra.gmra.mrb[158].mxu0 %vm1101_vm2, %v21453_v45  ;;  %v15428_v27 = vld [vmem:[%s21701_s12 + $0x2] ss:$0 sm:$0xff]  ;;  %v15429_v45 = vld [vmem:[%s21701_s12 + $0x3] ss:$0 sm:$0xff] }
 0xfd0   :  { %v13999_v55 = vpop.f32.mrb[128].mxu1  ;;  %v14072_v17 = vpop.f32.mrb[144].mxu0 }
 0xfd1   :  { %v14000_v60 = vadd.f32 %v15426_v1, %v13999_v55  ;;  %v14073_v58 = vadd.f32 %v15427_v35, %v14072_v17  ;;  %v17061_v47 = vpop.f32.mrb[129].mxu1  ;;  %v17072_v59 = vpop.f32.mrb[145].mxu0 }
 0xfd3   :  { %15098 = vst.msk [vmem:[#allocation5] sm:$0xff] %vm1101_vm2, %v14000_v60  ;;  %15099 = vst.msk [vmem:[#allocation5 + $0x8] sm:$0xff] %vm1101_vm2, %v14073_v58 }
 0xfd8   :  { %v14145_v51 = vpop.f32.mrb[130].mxu1  ;;  %v14218_v7 = vpop.f32.mrb[146].mxu0 }
 0xfd9   :  { %v14146_v41 = vadd.f32 %v15428_v27, %v14145_v51  ;;  %v14219_v54 = vadd.f32 %v15429_v45, %v14218_v7  ;;  %v17083_v34 = vpop.f32.mrb[131].mxu1  ;;  %v17094_v40 = vpop.f32.mrb[147].mxu0 }
 0xfdb   :  { %15100 = vst.msk [vmem:[#allocation5 + $0x10] sm:$0xff] %vm1101_vm2, %v14146_v41  ;;  %15101 = vst.msk [vmem:[#allocation5 + $0x18] sm:$0xff] %vm1101_vm2, %v14219_v54 }
 0xfe0   :  { %v14291_v46 = vpop.f32.mrb[132].mxu1  ;;  %v14364_v53 = vpop.f32.mrb[148].mxu0 }
 0xfe1   :  { %v14292_v21 = vadd.f32 %v15430_v25, %v14291_v46  ;;  %v14365_v29 = vadd.f32 %v15431_v31, %v14364_v53  ;;  %v17105_v28 = vpop.f32.mrb[133].mxu1  ;;  %v17116_v12 = vpop.f32.mrb[149].mxu0 }
 0xfe3   :  { %15102 = vst.msk [vmem:[#allocation5 + $0x20] sm:$0xff] %vm1101_vm2, %v14292_v21  ;;  %15103 = vst.msk [vmem:[#allocation5 + $0x28] sm:$0xff] %vm1101_vm2, %v14365_v29 }
 0xfe8   :  { %v14437_v14 = vpop.f32.mrb[134].mxu1  ;;  %v14510_v43 = vpop.f32.mrb[150].mxu0 }
 0xfe9   :  { %v14438_v4 = vadd.f32 %v15432_v42, %v14437_v14  ;;  %v14511_v26 = vadd.f32 %v15433_v39, %v14510_v43  ;;  %v17127_v63 = vpop.f32.mrb[135].mxu1  ;;  %v17138_v15 = vpop.f32.mrb[151].mxu0 }
 0xfeb   :  { %15104 = vst.msk [vmem:[#allocation5 + $0x30] sm:$0xff] %vm1101_vm2, %v14438_v4  ;;  %15105 = vst.msk [vmem:[#allocation5 + $0x38] sm:$0xff] %vm1101_vm2, %v14511_v26 }
 0xff0   :  { %v14583_v0 = vpop.f32.mrb[136].mxu1  ;;  %v14656_v52 = vpop.f32.mrb[152].mxu0 }
 0xff1   :  { %v14584_v2 = vadd.f32 %v15434_v10, %v14583_v0  ;;  %v14657_v8 = vadd.f32 %v15435_v19, %v14656_v52  ;;  %v17149_v57 = vpop.f32.mrb[137].mxu1  ;;  %v17160_v36 = vpop.f32.mrb[153].mxu0 }
 0xff3   :  { %15106 = vst.msk [vmem:[#allocation5 + $0x40] sm:$0xff] %vm1101_vm2, %v14584_v2  ;;  %15107 = vst.msk [vmem:[#allocation5 + $0x48] sm:$0xff] %vm1101_vm2, %v14657_v8 }
 0xff8   :  { %v14729_v32 = vpop.f32.mrb[138].mxu1  ;;  %v14802_v13 = vpop.f32.mrb[154].mxu0 }
 0xff9   :  { %v14730_v48 = vadd.f32 %v15436_v20, %v14729_v32  ;;  %v14803_v23 = vadd.f32 %v15437_v62, %v14802_v13  ;;  %v17171_v9 = vpop.f32.mrb[139].mxu1  ;;  %v17182_v22 = vpop.f32.mrb[155].mxu0 }
 0xffb   :  { %15108 = vst.msk [vmem:[#allocation5 + $0x50] sm:$0xff] %vm1101_vm2, %v14730_v48  ;;  %15109 = vst.msk [vmem:[#allocation5 + $0x58] sm:$0xff] %vm1101_vm2, %v14803_v23 }
0x1000   :  { %v14875_v24 = vpop.f32.mrb[140].mxu1  ;;  %v14948_v30 = vpop.f32.mrb[156].mxu0 }
0x1001   :  { %v14876_v16 = vadd.f32 %v15438_v49, %v14875_v24  ;;  %v14949_v33 = vadd.f32 %v15439_v38, %v14948_v30  ;;  %v17193_v61 = vpop.f32.mrb[141].mxu1  ;;  %v17204_v44 = vpop.f32.mrb[157].mxu0 }
0x1003   :  { %15110 = vst.msk [vmem:[#allocation5 + $0x60] sm:$0xff] %vm1101_vm2, %v14876_v16  ;;  %15111 = vst.msk [vmem:[#allocation5 + $0x68] sm:$0xff] %vm1101_vm2, %v14949_v33 }
0x1008   :  { %v15021_v56 = vpop.f32.mrb[142].mxu1  ;;  %v15094_v6 = vpop.f32.mrb[158].mxu0 }
0x1009   :  { %v15022_v50 = vadd.f32 %v15440_v18, %v15021_v56  ;;  %v15095_v11 = vadd.f32 %v15441_v5, %v15094_v6  ;;  %v17215_v37 = vpop.f32.mrb[143].mxu1  ;;  %v17226_v3 = vpop.f32.mrb[159].mxu0 }
0x100b   :  { %15112 = vst.msk [vmem:[#allocation5 + $0x70] sm:$0xff] %vm1101_vm2, %v15022_v50  ;;  %15113 = vst.msk [vmem:[#allocation5 + $0x78] sm:$0xff] %vm1101_vm2, %v15095_v11 }
0x100c   :  { %17929 = shalt.err (!%p17926_p4)
}
0x100d   :  { %s17930_s30 = scalar_lea.hbm %s21705_s16, 2048 }
0x100e   :  { %p17931_p5 = scmp.ne.s32.totalorder %s21705_s16, %s17930_s30  ;;  %p17934_p6 = scmp.lt.u32.totalorder %s17930_s30, %s21705_s16 }
0x1010   :  { %p17936_p7 = pnand %p17934_p6, %p17931_p5 }
0x1012   :  { %17939 = shalt.err (!%p17936_p7)
}
0x1013   :  { %s17953_s24 = smov 128   ;;  %s17954_s17 = smov 8  }
0x1014   :  { %15125 = dma.vmem_to_hbm [thread:$0]  %s15120_s13, 2048, %s21705_s16, [#allocation6], %s17953_s24, %s17953_s24, %s17954_s17  }
0x1015   :  { %17944 = dma.done.wait [#allocation6], 2048  }
0x1016   :  { %17945 = vsyncadd [#allocation6], 4294965248 }
0x1017   :  { %15129 = vsyncpa [#allocation6], 1 }
0x1018   :  { %15130 = vsyncmov [#allocation4] }
0x101b   :  { %s15131_s5 = vpop.sfrf %15130 }
0x101c   :  { %p15458_p8 = scmp.ne.s32.totalorder %s15131_s5, 0 }
0x101e   :  { %15135 = shalt.err (%p15458_p8)  }
0x101f   :  { %15137 = vsyncmov [#allocation4 + $0x1] }
0x1022   :  { %s15138_s18 = vpop.sfrf %15137 }
0x1023   :  { %p15459_p9 = scmp.ne.s32.totalorder %s15138_s18, 0 }
0x1025   :  { %15142 = shalt.err (%p15459_p9)  }

</bundles_post_ra>
